<compile_context>
chip_gen: v7x
topology: tpu7x:2x2x1
jax: 0.10.0
libtpu: 0.0.40
codegen_flags: <defaults>
</compile_context>

<pallas_src>
import jax
import jax.numpy as jnp
import numpy as np
from jax.experimental import pallas as pl
from jax.experimental.pallas import tpu as pltpu

_MIN_TM = 128
_HEADROOM = 8 * 1024 * 1024          # Mosaic internal scratch / spill slack


def _vmem_capacity_bytes() -> int:
    """Physical VMEM per TensorCore (64 MiB on v7x, 128 MiB on v5e/v6e)."""
    try:
        cap = getattr(pltpu.get_tpu_info(), "vmem_capacity_bytes", None)
        if cap:
            return int(cap)
    except Exception:
        pass
    return 64 * 1024 * 1024          # conservative default: fits every chip


def _silu_gate(g, u):
    # sigmoid(g) = 1 / (1 + exp(-g)); exp + approximate reciprocal both run
    # on the EUP slot, keeping VPU slots free under the MXU.
    sig = pl.reciprocal(1.0 + jnp.exp(-g), approx=True)
    return (g * sig) * u


def _ffn_kernel_resident(x_ref, w1_ref, w3_ref, w2_ref, o_ref):
    """nj == 1: weights fully resident; no accumulator, direct store."""
    x = x_ref[...]
    g = jnp.dot(x, w1_ref[...], preferred_element_type=jnp.float32)
    u = jnp.dot(x, w3_ref[...], preferred_element_type=jnp.float32)
    h = _silu_gate(g, u)
    o_ref[...] = jnp.dot(h.astype(w2_ref.dtype), w2_ref[...],
                         preferred_element_type=jnp.float32).astype(o_ref.dtype)


def _ffn_kernel_streamed(x_ref, w1_ref, w3_ref, w2_ref, o_ref, acc_ref):
    """nj > 1: intermediate dim tiled; accumulate the down-projection in f32."""
    j = pl.program_id(1)

    @pl.when(j == 0)
    def _():
        acc_ref[...] = jnp.zeros_like(acc_ref)

    x = x_ref[...]
    g = jnp.dot(x, w1_ref[...], preferred_element_type=jnp.float32)
    u = jnp.dot(x, w3_ref[...], preferred_element_type=jnp.float32)
    h = _silu_gate(g, u)
    acc_ref[...] += jnp.dot(h.astype(w2_ref.dtype), w2_ref[...],
                            preferred_element_type=jnp.float32)

    @pl.when(j == pl.num_programs(1) - 1)
    def _():
        o_ref[...] = acc_ref[...].astype(o_ref.dtype)


def prepare_feed_forward_weights(w1, w2, w3):
    """Hoisted layout prep — do ONCE at weight-load time, reuse every call.

    w1, w3: (I, H) nn.Linear layout; w2: (H, I).
    Returns (w1_t, w2_t, w3_t) with shapes (H, I), (I, H), (H, I).
    """
    return jnp.transpose(w1), jnp.transpose(w2), jnp.transpose(w3)


def feed_forward_prepared(x, w1_t, w2_t, w3_t, *, tm=256, ti=None):
    """SwiGLU FFN on pre-transposed weights:
        out = (silu(x @ w1_t) * (x @ w3_t)) @ w2_t

    x    : (..., H)
    w1_t, w3_t : (H, I)     w2_t : (I, H)
    tm   : token tile (rows per grid step).  Shrunk automatically for short
           sequences so the parallel axis has >= 2 steps (v7x has 2 TCs).
    ti   : intermediate tile.  None -> resident (ti = I) whenever it fits
           this chip's VMEM; otherwise a streaming fallback is chosen.
    """
    orig_shape = x.shape
    H = orig_shape[-1]
    I = w1_t.shape[1]
    assert w1_t.shape == (H, I) and w3_t.shape == (H, I) and w2_t.shape == (I, H)
    assert H % 128 == 0, "hidden_size must be a multiple of 128 (lane tile)"
    assert I % 128 == 0, "intermediate_size must be a multiple of 128"

    x2d = x.reshape(-1, H)
    M = x2d.shape[0]

    x_isz = jnp.dtype(x2d.dtype).itemsize
    w_isz = jnp.dtype(w1_t.dtype).itemsize
    vmem_cap = _vmem_capacity_bytes()

    # --- token tile: keep >= 2 steps on the parallel axis when the token
    #     count allows (both v7x TensorCores get work); floor at 128. -------
    while tm > _MIN_TM and M <= tm:
        tm //= 2
    tm = max(tm, _MIN_TM)
    assert tm % 16 == 0, "tm must be a multiple of 16 (bf16 sublane packing)"

    # --- per-grid-step VMEM footprint (bytes) -------------------------------
    def footprint(ti_c, tm_c, nj_c):
        w_buf = 1 if nj_c == 1 else 2           # resident weights single-buffered
        acc = 0 if nj_c == 1 else tm_c * H * 4  # f32 accumulator (streamed only)
        return (2 * tm_c * H * x_isz            # x double buffer
                + 2 * tm_c * H * x_isz          # output double buffer
                + w_buf * 2 * H * ti_c * w_isz  # w1_t + w3_t tiles
                + w_buf * ti_c * H * w_isz      # w2_t tile
                + acc
                + 3 * tm_c * ti_c * 4           # g, u, h f32 matmul results
                + tm_c * ti_c * w_isz)          # h cast for the 2nd matmul

    # --- intermediate tile: resident unless it can't fit this chip's VMEM ---
    if ti is None or ti >= I:
        if footprint(I, tm, 1) + _HEADROOM <= vmem_cap:
            ti = I
        else:
            # Streaming fallback: all weights are re-read once per token tile,
            # so use a larger token tile to amortize the weight HBM traffic.
            if M >= 1024:
                tm = 512
            ti = None
            for cand in (4096, 2048, 1024, 512, 256, 128):
                if (cand < I and I % cand == 0
                        and footprint(cand, tm, I // cand) + _HEADROOM <= vmem_cap):
                    ti = cand
                    break
            if ti is None:
                tm, ti = _MIN_TM, 128           # last resort
    assert I % ti == 0, "intermediate_size must be divisible by ti"
    assert ti % 128 == 0, "ti must be a multiple of 128 (lane tile)"
    nj = I // ti

    # --- token padding: no divisibility requirement for callers -------------
    Mp = ((M + tm - 1) // tm) * tm
    if Mp != M:
        x2d = jnp.pad(x2d, ((0, Mp - M), (0, 0)))
    ni = Mp // tm

    # --- VMEM budget, clamped to this chip's physical VMEM ------------------
    fp = footprint(ti, tm, nj)
    vmem_limit = int(min(max(fp + _HEADROOM, 32 * 1024 * 1024),
                         vmem_cap - 4 * 1024 * 1024))

    # --- cost estimate: weights read once (resident) or ni times (streamed) -
    w_reads = 1 if nj == 1 else ni
    cost = pl.CostEstimate(
        flops=6 * M * H * I,
        transcendentals=M * I,
        bytes_accessed=int(Mp * H * x_isz
                           + w_reads * 3 * I * H * w_isz
                           + Mp * H * x_isz),
    )

    if nj == 1:
        # Resident path: constant-index weights single-buffered (DMA'd once),
        # no accumulator scratch, direct o_ref store.
        grid_spec = pltpu.PrefetchScalarGridSpec(
            num_scalar_prefetch=0,
            grid=(ni,),
            in_specs=[
                pl.BlockSpec((tm, H), lambda i: (i, 0)),
                pl.BlockSpec((H, I), lambda i: (0, 0),
                             pipeline_mode=pl.Buffered(1)),
                pl.BlockSpec((H, I), lambda i: (0, 0),
                             pipeline_mode=pl.Buffered(1)),
                pl.BlockSpec((I, H), lambda i: (0, 0),
                             pipeline_mode=pl.Buffered(1)),
            ],
            out_specs=pl.BlockSpec((tm, H), lambda i: (i, 0)),
            scratch_shapes=[],
        )
        kernel = _ffn_kernel_resident
        dim_sem = ("parallel",)
    else:
        grid_spec = pltpu.PrefetchScalarGridSpec(
            num_scalar_prefetch=0,
            grid=(ni, nj),
            in_specs=[
                pl.BlockSpec((tm, H), lambda i, j: (i, 0)),
                pl.BlockSpec((H, ti), lambda i, j: (0, j)),
                pl.BlockSpec((H, ti), lambda i, j: (0, j)),
                pl.BlockSpec((ti, H), lambda i, j: (j, 0)),
            ],
            out_specs=pl.BlockSpec((tm, H), lambda i, j: (i, 0)),
            scratch_shapes=[pltpu.VMEM((tm, H), jnp.float32)],
        )
        kernel = _ffn_kernel_streamed
        dim_sem = ("parallel", "arbitrary")

    out = pl.pallas_call(
        kernel,
        out_shape=jax.ShapeDtypeStruct((Mp, H), x.dtype),
        grid_spec=grid_spec,
        compiler_params=pltpu.CompilerParams(
            dimension_semantics=dim_sem,
            vmem_limit_bytes=vmem_limit,
        ),
        cost_estimate=cost,
    )(x2d, w1_t, w3_t, w2_t)

    if Mp != M:
        out = out[:M]
    return out.reshape(orig_shape)


def feed_forward(x, w1, w2, w3, *, tm=256, ti=None):
    """Convenience wrapper taking raw nn.Linear-layout weights.

    Prefer prepare_feed_forward_weights() once at init time plus
    feed_forward_prepared() per step: otherwise the transposes below re-read
    the full weights from HBM on every call.
    """
    w1_t, w2_t, w3_t = prepare_feed_forward_weights(w1, w2, w3)
    return feed_forward_prepared(x, w1_t, w2_t, w3_t, tm=tm, ti=ti)


if __name__ == "__main__":
    # Small VisionEncoderArgs-consistent shapes.
    hidden_size = 128
    intermediate_size = 512
    batch, seq = 2, 256                 # M = 512 tokens -> two tm=256 tiles

    key = jax.random.PRNGKey(0)
    kx, k1, k2, k3, kr = jax.random.split(key, 5)

    x = jax.random.normal(kx, (batch, seq, hidden_size), dtype=jnp.float32)
    # nn.Linear weight layout: (out_features, in_features)
    w1 = jax.random.normal(k1, (intermediate_size, hidden_size), jnp.float32) * 0.02
    w2 = jax.random.normal(k2, (hidden_size, intermediate_size), jnp.float32) * 0.02
    w3 = jax.random.normal(k3, (intermediate_size, hidden_size), jnp.float32) * 0.02

    def ref_ffn(xn, w1n, w2n, w3n):
        xn, w1n, w2n, w3n = (np.asarray(a, np.float64)
                             for a in (xn, w1n, w2n, w3n))
        g = xn @ w1n.T
        return (g / (1.0 + np.exp(-g)) * (xn @ w3n.T)) @ w2n.T

    def max_rel_err(a, b):
        a = np.asarray(a, np.float64)
        return float(np.max(np.abs(a - b)) / (np.max(np.abs(b)) + 1e-12))

    # Weight prep hoisted out of the per-call path (done once).
    w1_t, w2_t, w3_t = prepare_feed_forward_weights(w1, w2, w3)

    # --- run 1: f32, resident (ti = I) path, no accumulator -----------------
    out = jax.block_until_ready(feed_forward_prepared(x, w1_t, w2_t, w3_t))
    ref = ref_ffn(x, w1, w2, w3)
    assert out.shape == x.shape
    err = max_rel_err(out, ref)
    assert err < 2e-2, f"f32 resident path mismatch: rel err {err}"

    # --- run 2: bf16 weights/activations, ragged token count (padding, tm
    #            auto-shrinks to 128 so ni >= 2) and the streamed ti < I path.
    x_r = jax.random.normal(kr, (batch, 100, hidden_size), jnp.float32)
    w1_b, w2_b, w3_b = (w.astype(jnp.bfloat16) for w in (w1_t, w2_t, w3_t))
    out_bf16 = jax.block_until_ready(
        feed_forward_prepared(x_r.astype(jnp.bfloat16), w1_b, w2_b, w3_b,
                              ti=256))
    ref_r = ref_ffn(x_r, w1, w2, w3)
    assert out_bf16.shape == x_r.shape
    err_bf16 = max_rel_err(np.asarray(out_bf16, np.float32), ref_r)
    assert err_bf16 < 6e-2, f"bf16 streamed path mismatch: rel err {err_bf16}"

    print("KERNEL_OK")
</pallas_src>

<mosaic_0001>
module attributes {stable_mosaic.version = 11 : i64} {
  func.func @_ffn_kernel_resident(%arg0: i32, %arg1: memref<256x128xf32, #tpu.memory_space<vmem>>, %arg2: memref<128x512xf32, #tpu.memory_space<vmem>>, %arg3: memref<128x512xf32, #tpu.memory_space<vmem>>, %arg4: memref<512x128xf32, #tpu.memory_space<vmem>>, %arg5: memref<256x128xf32, #tpu.memory_space<vmem>>) attributes {dimension_semantics = [#tpu.dimension_semantics<parallel>], iteration_bounds = array<i64: 2>, scalar_prefetch = 0 : i64, scratch_operands = 0 : i64, tpu.core_type = #tpu.core_type<tc>, window_params = [{transform_indices = @transform_0, window_bounds = array<i64: 256, 128>}, {pipeline_mode = #tpu.pipeline_mode<synchronous>, transform_indices = @transform_1, window_bounds = array<i64: 128, 512>}, {pipeline_mode = #tpu.pipeline_mode<synchronous>, transform_indices = @transform_2, window_bounds = array<i64: 128, 512>}, {pipeline_mode = #tpu.pipeline_mode<synchronous>, transform_indices = @transform_3, window_bounds = array<i64: 512, 128>}, {transform_indices = @transform_4, window_bounds = array<i64: 256, 128>}]} {
    %c0 = arith.constant 0 : index
    %c0_0 = arith.constant 0 : index
    %0 = vector.load %arg1[%c0, %c0_0] : memref<256x128xf32, #tpu.memory_space<vmem>>, vector<256x128xf32>
    %c0_1 = arith.constant 0 : index
    %c0_2 = arith.constant 0 : index
    %1 = vector.load %arg2[%c0_1, %c0_2] : memref<128x512xf32, #tpu.memory_space<vmem>>, vector<128x512xf32>
    %cst = arith.constant dense<0.000000e+00> : vector<256x512xf32>
    %2 = tpu.matmul %0, %1, %cst {dimension_numbers = #tpu.dot_dimension_numbers<[1], [0], [0], [1], [0, 0, 1, 1], [], []>} : vector<256x128xf32>, vector<128x512xf32>, vector<256x512xf32> -> vector<256x512xf32>
    %c0_3 = arith.constant 0 : index
    %c0_4 = arith.constant 0 : index
    %3 = vector.load %arg3[%c0_3, %c0_4] : memref<128x512xf32, #tpu.memory_space<vmem>>, vector<128x512xf32>
    %cst_5 = arith.constant dense<0.000000e+00> : vector<256x512xf32>
    %4 = tpu.matmul %0, %3, %cst_5 {dimension_numbers = #tpu.dot_dimension_numbers<[1], [0], [0], [1], [0, 0, 1, 1], [], []>} : vector<256x128xf32>, vector<128x512xf32>, vector<256x512xf32> -> vector<256x512xf32>
    %cst_6 = arith.constant 0.000000e+00 : f32
    %5 = vector.broadcast %cst_6 : f32 to vector<256x512xf32>
    %6 = arith.subf %5, %2 : vector<256x512xf32>
    %7 = math.exp %6 : vector<256x512xf32>
    %cst_7 = arith.constant 1.000000e+00 : f32
    %8 = vector.broadcast %cst_7 : f32 to vector<256x512xf32>
    %9 = arith.addf %8, %7 : vector<256x512xf32>
    %10 = tpu.reciprocal %9 {approx = true} : vector<256x512xf32> -> vector<256x512xf32>
    %11 = arith.mulf %2, %10 : vector<256x512xf32>
    %12 = arith.mulf %11, %4 : vector<256x512xf32>
    %c0_8 = arith.constant 0 : index
    %c0_9 = arith.constant 0 : index
    %13 = vector.load %arg4[%c0_8, %c0_9] : memref<512x128xf32, #tpu.memory_space<vmem>>, vector<512x128xf32>
    %cst_10 = arith.constant dense<0.000000e+00> : vector<256x128xf32>
    %14 = tpu.matmul %12, %13, %cst_10 {dimension_numbers = #tpu.dot_dimension_numbers<[1], [0], [0], [1], [0, 0, 1, 1], [], []>} : vector<256x512xf32>, vector<512x128xf32>, vector<256x128xf32> -> vector<256x128xf32>
    %c0_11 = arith.constant 0 : index
    %c0_12 = arith.constant 0 : index
    %15 = vector.load %arg5[%c0_11, %c0_12] : memref<256x128xf32, #tpu.memory_space<vmem>>, vector<256x128xf32>
    tpu.vector_store %arg5[%c0_11, %c0_12], %14 {strides = array<i32>} : memref<256x128xf32, #tpu.memory_space<vmem>>, vector<256x128xf32>,
    return
  }
  func.func @transform_0(%arg0: i32) -> (i32, i32) {
    %c0_i32 = arith.constant 0 : i32
    %c0_i32_0 = arith.constant 0 : i32
    return %arg0, %c0_i32 : i32, i32
  }
  func.func @transform_1(%arg0: i32) -> (i32, i32) {
    %c0_i32 = arith.constant 0 : i32
    %c0_i32_0 = arith.constant 0 : i32
    %c0_i32_1 = arith.constant 0 : i32
    return %c0_i32, %c0_i32_0 : i32, i32
  }
  func.func @transform_2(%arg0: i32) -> (i32, i32) {
    %c0_i32 = arith.constant 0 : i32
    %c0_i32_0 = arith.constant 0 : i32
    %c0_i32_1 = arith.constant 0 : i32
    return %c0_i32, %c0_i32_0 : i32, i32
  }
  func.func @transform_3(%arg0: i32) -> (i32, i32) {
    %c0_i32 = arith.constant 0 : i32
    %c0_i32_0 = arith.constant 0 : i32
    %c0_i32_1 = arith.constant 0 : i32
    return %c0_i32, %c0_i32_0 : i32, i32
  }
  func.func @transform_4(%arg0: i32) -> (i32, i32) {
    %c0_i32 = arith.constant 0 : i32
    %c0_i32_0 = arith.constant 0 : i32
    return %arg0, %c0_i32 : i32, i32
  }
}

</mosaic_0001>

<bundles_post_ra>
// kernel: tpu_custom_call.1
= control target key start
LH: loop header
LB: loop body
LE: loop exit
PB: predicated region body
PF: predicated region fallthrough
CT: control target
= control target key end

     0   :  { %9 = vsyncpa [#allocation3], 0  ;;  %s5569_s0 = inlined_call_operand.hbm [shape: f32[512,128], index: 0, kind: input, shape index: {}]   ;;  %s5570_s1 = inlined_call_operand.hbm [shape: f32[128,512], index: 1, kind: input, shape index: {}]   ;;  %s5571_s2 = inlined_call_operand.hbm [shape: f32[128,512], index: 2, kind: input, shape index: {}]   ;;  %s5572_s3 = inlined_call_operand.hbm [shape: f32[512,128], index: 3, kind: input, shape index: {}]   ;;  %s5573_s4 = inlined_call_operand.hbm [shape: f32[512,128], index: 4, kind: output, shape index: {}]  }
   0x1   :  { %11 = vsyncpa [#allocation3 + $0x1], 0 }
   0x2   :  { %12 = vsyncpa [#allocation6], 0 }
   0x3   :  { %13 = vsyncpa [#allocation9], 0 }
   0x4   :  { %14 = vsyncpa [#allocation4], 0 }
   0x5   :  { %16 = vsyncpa [#allocation4 + $0x1], 0  ;;  %s4175_s15 = smov 0   ;;  %s4177_s16 = smov 0  }
   0x6   :  { %s4179_s17 = smov 0   ;;  %s4181_s18 = smov 0  }
   0x7 LB: > { %s4196_s19 = sadd.s32 4294967295, %s4135_s18   ;;  %s3008_s20 = sadd.s32 4294967294, %s4135_s18   ;;  %s4135_s18 = sphi %s4181_s18, %s5671_s18   ;;  %s4131_s17 = sphi %s4179_s17, %s5670_s17   ;;  %s4127_s16 = sphi %s4177_s16, %s5669_s16   ;;  %s4123_s15 = sphi %s4175_s15, %s5668_s15  }
   0x8   : > { %p42_p0 = scmp.ne.s32.totalorder %s4127_s16, %s4123_s15  ;;  %p5574_p1 = scmp.eq.s32.totalorder %s4196_s19, 0 }
   0x9   : > { %p135_p3 = scmp.eq.s32.totalorder %s3008_s20, 1  ;;  %p3009_p5 = scmp.ge.s32.totalorder %s4135_s18, 1 }
   0xa   : > { %p4205_p4 = por %p5574_p1, %p42_p0  ;;  %p142_p7 = scmp.lt.s32.totalorder %s4135_s18, 3 }
   0xb   : > { %p4210_p6 = por %p135_p3, %p42_p0  ;;  %s4137_s24 = smov [#allocation5]  }
   0xc   : > { %s5602_s21 = scalar_select %p4205_p4, 1, 0 }
   0xd   : > { %s5603_s22 = scalar_select %p4210_p6, 1, 0 }
   0xe   : > { %p4215_p8 = pnand %p3009_p5, %p142_p7  ;;  %s154_s25 = sshll.u32 %s4137_s24, 4  ;;  %s4219_s25 = int_to_ptr.vmem [resolvable:$true] %s154_s25 }
   0xf   : > { %s4138_s27 = smov [#allocation7]   ;;  %s4139_s29 = smov [#allocation8]  }
  0x10   : > { %s5604_s23 = scalar_select %p4215_p8, 1, 0 }
  0x11   : > { %p3334_p9 = pneg %p4215_p8  ;;  %s167_s28 = sshll.u32 %s4138_s27, 4  ;;  %s4230_s28 = int_to_ptr.vmem [resolvable:$true] %s167_s28 }
  0x12   : > { %s4232_s30 = sshll.u32 %s4139_s29, 4  ;;  %s3947_s7 = scalar_lea.hbm %s5570_s1, 8192  ;;  %s181_s30 = int_to_ptr.vmem [resolvable:$true] %s4232_s30 }
  0x13   : > { %p4226_p11 = pnand %p3334_p9, %p5574_p1  ;;  %p3948_p12 = scmp.ne.s32.totalorder %s5570_s1, %s3947_s7 }
  0x14   : > { %p3954_p5 = scmp.lt.u32.totalorder %s3947_s7, %s5570_s1 }
  0x15   : > { %p4242_p13 = pneg %p4226_p11 }
  0x17   : > { %p3950_p0 = pnand %p4242_p13, %p3948_p12 }
  0x19   : > { %p3951_p3 = pneg %p3950_p0 }
  0x1b   : > { %p3956_p7 = pnand %p3954_p5, %p3951_p3 }
  0x1d   : > { %3959 = shalt.err (!%p3956_p7)
}
  0x1e   : > { %s3960_s13 = scalar_lea.vmem %s4219_s25, 8192  ;;  %p3968_p2 = scmp.lt.s32.totalorder %s4219_s25, %s4219_s25 }
  0x1f   : > { %p3961_p9 = scmp.ne.s32.totalorder %s4219_s25, %s3960_s13  ;;  %p3969_p6 = scmp.lt.s32.totalorder %s3960_s13, %s3960_s13 }
  0x21   : > { %p3963_p10 = pnand %p3961_p9, %p4242_p13  ;;  %p3970_p12 = por %p3969_p6, %p3968_p2 }
  0x23   : > { %p3964_p1 = pneg %p3963_p10 }
  0x25   : > { %p3971_p0 = pnand %p3970_p12, %p3964_p1 }
  0x27   : > { %3974 = shalt.err (!%p3971_p0)
}
  0x28   : > { %s4140_s14 = smov 512   ;;  %s4141_s20 = smov 32  }
  0x29   : > { %3337 = dma.hbm_to_vmem [thread:$0]  (!%p4226_p11), %s5570_s1, 8192, %s4219_s25, [#allocation6], %s4140_s14, %s4140_s14, %s4141_s20  }
  0x2a   : > { %s3975_s6 = scalar_lea.hbm %s5571_s2, 8192 }
  0x2b   : > { %p3976_p2 = scmp.ne.s32.totalorder %s5571_s2, %s3975_s6  ;;  %p3982_p10 = scmp.lt.u32.totalorder %s3975_s6, %s5571_s2 }
  0x2d   : > { %p3978_p1 = pnand %p3976_p2, %p4242_p13 }
  0x2f   : > { %p3979_p6 = pneg %p3978_p1 }
  0x31   : > { %p3984_p3 = pnand %p3982_p10, %p3979_p6 }
  0x33   : > { %3987 = shalt.err (!%p3984_p3)
}
  0x34   : > { %s3988_s25 = scalar_lea.vmem %s4230_s28, 8192  ;;  %p3996_p12 = scmp.lt.s32.totalorder %s4230_s28, %s4230_s28 }
  0x35   : > { %p3989_p5 = scmp.ne.s32.totalorder %s4230_s28, %s3988_s25  ;;  %p3997_p0 = scmp.lt.s32.totalorder %s3988_s25, %s3988_s25 }
  0x37   : > { %p3991_p7 = pnand %p3989_p5, %p4242_p13  ;;  %p3998_p2 = por %p3997_p0, %p3996_p12 }
  0x39   : > { %p3992_p9 = pneg %p3991_p7 }
  0x3b   : > { %p3999_p1 = pnand %p3998_p2, %p3992_p9 }
  0x3d   : > { %4002 = shalt.err (!%p3999_p1)
}
  0x3e   : > { %3340 = dma.hbm_to_vmem [thread:$0]  (!%p4226_p11), %s5571_s2, 8192, %s4230_s28, [#allocation6], %s4140_s14, %s4140_s14, %s4141_s20  }
  0x3f   : > { %s4003_s29 = scalar_lea.hbm %s5572_s3, 8192 }
  0x40   : > { %p4004_p6 = scmp.ne.s32.totalorder %s5572_s3, %s4003_s29  ;;  %p4010_p5 = scmp.lt.u32.totalorder %s4003_s29, %s5572_s3 }
  0x42   : > { %p4006_p10 = pnand %p4004_p6, %p4242_p13 }
  0x44   : > { %p4007_p3 = pneg %p4006_p10 }
  0x46   : > { %p4012_p7 = pnand %p4010_p5, %p4007_p3 }
  0x48   : > { %4015 = shalt.err (!%p4012_p7)
}
  0x49   : > { %s4016_s9 = scalar_lea.vmem %s181_s30, 8192  ;;  %p4024_p2 = scmp.lt.s32.totalorder %s181_s30, %s181_s30 }
  0x4a   : > { %p4017_p9 = scmp.ne.s32.totalorder %s181_s30, %s4016_s9  ;;  %p4025_p1 = scmp.lt.s32.totalorder %s4016_s9, %s4016_s9 }
  0x4c   : > { %p4019_p12 = pnand %p4017_p9, %p4242_p13  ;;  %p4026_p4 = por %p4025_p1, %p4024_p2 }
  0x4e   : > { %p4020_p0 = pneg %p4019_p12 }
  0x50   : > { %p4027_p8 = pnand %p4026_p4, %p4020_p0 }
  0x52   : > { %4030 = shalt.err (!%p4027_p8)
}
  0x53   : > { %s4142_s28 = smov 128   ;;  %s4143_s10 = smov 8  }
  0x54   : > { %3343 = dma.hbm_to_vmem [thread:$0]  (!%p4226_p11), %s5572_s3, 8192, %s181_s30, [#allocation9], %s4142_s28, %s4142_s28, %s4143_s10  }
  0x55   : > { %s4309_s11 = sadd.s32 1, %s4135_s18   ;;  %s29_s12 = sadd.s32 1, %s4131_s17 }
  0x56   : > { %s26_s25 = ssub.s32 %s4135_s18, %s4309_s11  ;;  %p36_p8 = scmp.ne.s32.totalorder %s4131_s17, %s4127_s16 }
  0x57   : > { %p27_p4 = scmp.eq.s32.totalorder %s26_s25, 0  ;;  %p37_p13 = scmp.eq.s32.totalorder %s4135_s18, 0 }
  0x58   : > { %p3355_p6 = scmp.lt.s32.totalorder %s4135_s18, 2  ;;  %p5607_p3 = scmp.eq.s32.totalorder %s4196_s19, 1 }
  0x59   : > { %s4319_s13 = scalar_select %p27_p4, %s4131_s17, %s29_s12  }
  0x5a   : > { %p38_p10 = por %p37_p13, %p36_p8  ;;  %p4323_p5 = por %p5607_p3, %p36_p8 }
  0x5b   : > { %s194_s24 = sand.u32 1, %s4131_s17   ;;  %s3028_s27 = sshll.u32 %s4135_s18, 12 }
  0x5c   : > { %s3014_s30 = sshll.u32 %s194_s24, 8  ;;  %s4332_s6 = scalar_lea.hbm %s5569_s0, %s3028_s27 }
  0x5d   : > { %s198_s7 = scalar_lea.vmem [#allocation2], %s3014_s30  ;;  %p4334_p11 = pnand %p3355_p6, %p38_p10 }
  0x5e   : > { %s205_s8 = sshll.u32 %s198_s7, 4  ;;  %s4340_s14 = scalar_lea.sflag [#allocation3], %s194_s24  ;;  %s4338_s8 = int_to_ptr.vmem [resolvable:$true] %s205_s8 }
  0x5f   : > { %s4031_s20 = scalar_lea.hbm %s4332_s6, 4096  ;;  %p4033_p9 = pneg %p4334_p11 }
  0x60   : > { %p4032_p7 = scmp.ne.s32.totalorder %s4332_s6, %s4031_s20  ;;  %s4036_s27 = scalar_lea.hbm %s5569_s0, 8192 }
  0x61   : > { %p4037_p2 = scmp.lt.u32.totalorder %s4332_s6, %s5569_s0  ;;  %p4038_p1 = scmp.lt.u32.totalorder %s4036_s27, %s4031_s20 }
  0x62   : > { %p4034_p12 = pnand %p4033_p9, %p4032_p7  ;;  %p4040_p8 = scmp.lt.u32.totalorder %s4031_s20, %s4332_s6 }
  0x63   : > { %p4039_p4 = por %p4038_p1, %p4037_p2 }
  0x64   : > { %p4035_p0 = pneg %p4034_p12 }
  0x65   : > { %p4041_p13 = por %p4040_p8, %p4039_p4 }
  0x67   : > { %p4042_p6 = pnand %p4041_p13, %p4035_p0 }
  0x69   : > { %4045 = shalt.err (!%p4042_p6)
}
  0x6a   : > { %s4046_s24 = scalar_lea.vmem %s4338_s8, 4096  ;;  %s4144_s5 = smov [#allocation2]  }
  0x6b   : > { %p4047_p10 = scmp.ne.s32.totalorder %s4338_s8, %s4046_s24  ;;  %s4051_s7 = sshll.u32 %s4144_s5, 4  ;;  %s4052_s7 = int_to_ptr.vmem [resolvable:$false] %s4051_s7 }
  0x6c   : > { %s4053_s25 = scalar_lea.vmem %s4052_s7, 8192  ;;  %p4054_p12 = scmp.lt.s32.totalorder %s4338_s8, %s4052_s7 }
  0x6d   : > { %p4049_p3 = pnand %p4047_p10, %p4033_p9  ;;  %p4055_p2 = scmp.lt.s32.totalorder %s4053_s25, %s4046_s24 }
  0x6f   : > { %p4050_p7 = pneg %p4049_p3  ;;  %p4056_p1 = por %p4055_p2, %p4054_p12 }
  0x71   : > { %p4057_p4 = pnand %p4056_p1, %p4050_p7 }
  0x73   : > { %4060 = shalt.err (!%p4057_p4)
}
  0x74   : > { %3347 = dma.hbm_to_vmem [thread:$0]  (!%p4334_p11), %s4332_s6, 4096, %s4338_s8, %s4340_s14, %s4142_s28, %s4142_s28, %s4143_s10  }
  0x75   : > { %p5610_p9 = scmp.ne.s32.totalorder %s5604_s23, 0 }
  0x77   : > { %217 = sbr.rel (%p5610_p9) target bundleno = 996 (0x3e4), region = 36 }
  0x7e   : > { %s4374_s20 = sand.u32 1, %s4127_s16   ;;  %p5611_p0 = scmp.ne.s32.totalorder %s5602_s21, 0 }
  0x7f   : > { %s3018_s12 = sshll.u32 %s4374_s20, 8  ;;  %s220_s27 = scalar_lea.sflag [#allocation3], %s4374_s20 }
  0x80   : > { %s4380_s9 = scalar_lea.vmem [#allocation2], %s3018_s12 }
  0x81   : > { %4106 = dma.done.wait (%p5611_p0), %s220_s27, 4096  }
  0x82   : > { %4108 = vsyncadd (%p5611_p0), %s220_s27, 4294963200  ;;  %p5612_p11 = scmp.eq.s32.totalorder %s4196_s19, 0 }
  0x84   : > { %4110 = dma.done.wait (%p5612_p11), [#allocation6], 16384   ;;  %p5613_p8 = pmov %p5612_p11 }
  0x86   : > { %4112 = vsyncadd (%p5613_p8), [#allocation6], 4294950912  ;;  %p5614_p13 = pmov %p5613_p8 }
  0x87   : > { %p5615_p6 = pmov %p5613_p8 }
  0x88   : > { %4114 = dma.done.wait (%p5614_p13), [#allocation9], 8192  }
  0x89   : > { %4116 = vsyncadd (%p5615_p6), [#allocation9], 4294959104  ;;  %v4145_v0 = vmov 0.0   ;;  %v295_v1 = vld [vmem:[#allocation5 + $0x8] sm:$0xff]  ;;  %v294_v3 = vld [vmem:[#allocation5] sm:$0xff]  ;;  %s5484_s21 = scalar_lea.vmem [#allocation10], %s3018_s12 }
  0x8a   : > { %422 = vmatprep.mubr.f32.mxu1 %v4145_v0  ;;  %1000 = vmatprep.mubr.f32.mxu0 %v4145_v0  ;;  %v299_v2 = vld [vmem:[#allocation5 + $0x28] sm:$0xff]  ;;  %v298_v5 = vld [vmem:[#allocation5 + $0x20] sm:$0xff]  ;;  %s3029_s23 = sshll.u32 %s4196_s19, 12  ;;  %s2906_s28 = sshll.u32 %s5484_s21, 4  ;;  %s5524_s28 = int_to_ptr.vmem [resolvable:$true] %s2906_s28 }
  0x8b   : > { %v3030_v4 = vpack.c.bf16 %v299_v2, %v295_v1  ;;  %v303_v6 = vld [vmem:[#allocation5 + $0x48] sm:$0xff]  ;;  %v3032_v8 = vpack.c.bf16 %v298_v5, %v294_v3  ;;  %v302_v10 = vld [vmem:[#allocation5 + $0x40] sm:$0xff]  ;;  %s5522_s8 = scalar_lea.hbm %s5573_s4, %s3029_s23  ;;  %s2893_s14 = scalar_lea.sflag [#allocation4], %s4374_s20 }
  0x8c   : > { %v307_v7 = vld [vmem:[#allocation5 + $0x68] sm:$0xff]  ;;  %v306_v11 = vld [vmem:[#allocation5 + $0x60] sm:$0xff]  ;;  %s4061_s30 = scalar_lea.vmem %s5524_s28, 4096  ;;  %s4147_s19 = smov [#allocation10]  }
  0x8d   : > { %v3034_v9 = vpack.c.bf16 %v307_v7, %v303_v6  ;;  %v311_v12 = vld [vmem:[#allocation5 + $0x88] sm:$0xff]  ;;  %3031 = vmatprep.subr.bf16.mxu1 %v3030_v4  ;;  %v3036_v14 = vpack.c.bf16 %v306_v11, %v302_v10  ;;  %v310_v16 = vld [vmem:[#allocation5 + $0x80] sm:$0xff]  ;;  %p4062_p10 = scmp.ne.s32.totalorder %s5524_s28, %s4061_s30  ;;  %s4065_s29 = sshll.u32 %s4147_s19, 4  ;;  %s4066_s29 = int_to_ptr.vmem [resolvable:$false] %s4065_s29 }
  0x8e   : > { %v315_v13 = vld [vmem:[#allocation5 + $0xa8] sm:$0xff]  ;;  %3033 = vmatpush1.bf16.msra.mxu1 %v3032_v8  ;;  %v314_v17 = vld [vmem:[#allocation5 + $0xa0] sm:$0xff]  ;;  %s4067_s24 = scalar_lea.vmem %s4066_s29, 8192  ;;  %p4068_p12 = scmp.lt.s32.totalorder %s5524_s28, %s4066_s29 }
  0x8f   : > { %3035 = vmatprep.subr.bf16.mxu1 %v3034_v9  ;;  %v3038_v15 = vpack.c.bf16 %v315_v13, %v311_v12  ;;  %v319_v18 = vld [vmem:[#allocation5 + $0xc8] sm:$0xff]  ;;  %v3040_v20 = vpack.c.bf16 %v314_v17, %v310_v16  ;;  %v318_v22 = vld [vmem:[#allocation5 + $0xc0] sm:$0xff]  ;;  %v297_v16 = vld [vmem:[#allocation5 + $0x18] sm:$0xff]  ;;  %p4063_p3 = pnand %p4062_p10, %p4323_p5  ;;  %p4069_p2 = scmp.lt.s32.totalorder %s4067_s24, %s4061_s30 }
  0x90   : > { %v323_v19 = vld [vmem:[#allocation5 + $0xe8] sm:$0xff]  ;;  %v322_v23 = vld [vmem:[#allocation5 + $0xe0] sm:$0xff]  ;;  %v301_v17 = vld [vmem:[#allocation5 + $0x38] sm:$0xff] }
  0x91   : > { %v3042_v21 = vpack.c.bf16 %v323_v19, %v319_v18  ;;  %v327_v24 = vld [vmem:[#allocation5 + $0x108] sm:$0xff]  ;;  %v872_v28 = vld [vmem:[#allocation7] sm:$0xff]  ;;  %v3044_v30 = vpack.c.bf16 %v322_v23, %v318_v22  ;;  %v3062_v23 = vpack.c.bf16 %v301_v17, %v297_v16  ;;  %v344_v16 = vld [vmem:[#allocation5 + $0x190] sm:$0xff]  ;;  %p4064_p7 = pneg %p4063_p3  ;;  %p4070_p1 = por %p4069_p2, %p4068_p12 }
  0x92   : > { %3037 = vmatpush1.bf16.msra.mxu1 %v3036_v14  ;;  %v331_v25 = vld [vmem:[#allocation5 + $0x128] sm:$0xff]  ;;  %v876_v29 = vld [vmem:[#allocation7 + $0x20] sm:$0xff]  ;;  %v348_v17 = vld [vmem:[#allocation5 + $0x1b0] sm:$0xff] }
  0x93   : > { %3039 = vmatprep.subr.bf16.mxu1 %v3038_v15  ;;  %v873_v26 = vld [vmem:[#allocation7 + $0x8] sm:$0xff]  ;;  %v326_v31 = vld [vmem:[#allocation5 + $0x100] sm:$0xff]  ;;  %v3096_v34 = vpack.c.bf16 %v876_v29, %v872_v28  ;;  %v3046_v35 = vpack.c.bf16 %v331_v25, %v327_v24  ;;  %v296_v24 = vld [vmem:[#allocation5 + $0x10] sm:$0xff]  ;;  %p4071_p4 = pnand %p4070_p1, %p4064_p7 }
  0x94   : > { %v877_v27 = vld [vmem:[#allocation7 + $0x28] sm:$0xff]  ;;  %v330_v32 = vld [vmem:[#allocation5 + $0x120] sm:$0xff]  ;;  %v300_v25 = vld [vmem:[#allocation5 + $0x30] sm:$0xff] }
  0x95   : > { %v3094_v33 = vpack.c.bf16 %v877_v27, %v873_v26  ;;  %v335_v36 = vld [vmem:[#allocation5 + $0x148] sm:$0xff]  ;;  %v880_v40 = vld [vmem:[#allocation7 + $0x40] sm:$0xff]  ;;  %v3048_v46 = vpack.c.bf16 %v330_v32, %v326_v31  ;;  %v305_v26 = vld [vmem:[#allocation5 + $0x58] sm:$0xff]  ;;  %v3064_v32 = vpack.c.bf16 %v300_v25, %v296_v24 }
  0x96   : > { %3041 = vmatpush1.bf16.msra.mxu1 %v3040_v20  ;;  %v339_v37 = vld [vmem:[#allocation5 + $0x168] sm:$0xff]  ;;  %v884_v41 = vld [vmem:[#allocation7 + $0x60] sm:$0xff]  ;;  %v309_v27 = vld [vmem:[#allocation5 + $0x78] sm:$0xff] }
  0x97   : > { %3043 = vmatprep.subr.bf16.mxu1 %v3042_v21  ;;  %v881_v38 = vld [vmem:[#allocation7 + $0x48] sm:$0xff]  ;;  %3095 = vmatprep.subr.bf16.mxu0 %v3094_v33  ;;  %v3100_v43 = vpack.c.bf16 %v884_v41, %v880_v40  ;;  %v334_v47 = vld [vmem:[#allocation5 + $0x140] sm:$0xff]  ;;  %v3050_v51 = vpack.c.bf16 %v339_v37, %v335_v36  ;;  %v304_v36 = vld [vmem:[#allocation5 + $0x50] sm:$0xff] }
  0x98   : > { %v885_v39 = vld [vmem:[#allocation7 + $0x68] sm:$0xff]  ;;  %3097 = vmatpush1.bf16.msra.mxu0 %v3096_v34  ;;  %v888_v49 = vld [vmem:[#allocation7 + $0x80] sm:$0xff]  ;;  %v308_v37 = vld [vmem:[#allocation5 + $0x70] sm:$0xff] }
  0x99   : > { %v3098_v42 = vpack.c.bf16 %v885_v39, %v881_v38  ;;  %v889_v44 = vld [vmem:[#allocation7 + $0x88] sm:$0xff]  ;;  %v892_v50 = vld [vmem:[#allocation7 + $0xa0] sm:$0xff]  ;;  %v313_v41 = vld [vmem:[#allocation5 + $0x98] sm:$0xff] }
  0x9a   : > { %v893_v45 = vld [vmem:[#allocation7 + $0xa8] sm:$0xff]  ;;  %3045 = vmatpush1.bf16.msra.mxu1 %v3044_v30  ;;  %v338_v52 = vld [vmem:[#allocation5 + $0x160] sm:$0xff]  ;;  %v3104_v57 = vpack.c.bf16 %v892_v50, %v888_v49  ;;  %v312_v50 = vld [vmem:[#allocation5 + $0x90] sm:$0xff] }
  0x9b   : > { %v3102_v48 = vpack.c.bf16 %v893_v45, %v889_v44  ;;  %3047 = vmatprep.subr.bf16.mxu1 %v3046_v35  ;;  %3099 = vmatprep.subr.bf16.mxu0 %v3098_v42  ;;  %v897_v53 = vld [vmem:[#allocation7 + $0xc8] sm:$0xff]  ;;  %v3052_v58 = vpack.c.bf16 %v338_v52, %v334_v47  ;;  %v342_v59 = vld [vmem:[#allocation5 + $0x180] sm:$0xff]  ;;  %v3066_v35 = vpack.c.bf16 %v309_v27, %v305_v26  ;;  %v317_v42 = vld [vmem:[#allocation5 + $0xb8] sm:$0xff] }
  0x9c   : > { %v901_v54 = vld [vmem:[#allocation7 + $0xe8] sm:$0xff]  ;;  %3101 = vmatpush1.bf16.msra.mxu0 %v3100_v43  ;;  %v896_v61 = vld [vmem:[#allocation7 + $0xc0] sm:$0xff]  ;;  %v3068_v45 = vpack.c.bf16 %v308_v37, %v304_v36  ;;  %v3070_v49 = vpack.c.bf16 %v317_v42, %v313_v41  ;;  %v321_v52 = vld [vmem:[#allocation5 + $0xd8] sm:$0xff] }
  0x9d   : > { %v343_v55 = vld [vmem:[#allocation5 + $0x188] sm:$0xff]  ;;  %3103 = vmatprep.subr.bf16.mxu0 %v3102_v48  ;;  %v3106_v60 = vpack.c.bf16 %v901_v54, %v897_v53  ;;  %v900_v62 = vld [vmem:[#allocation7 + $0xe0] sm:$0xff]  ;;  %v325_v53 = vld [vmem:[#allocation5 + $0xf8] sm:$0xff] }
  0x9e   : > { %v347_v56 = vld [vmem:[#allocation5 + $0x1a8] sm:$0xff]  ;;  %3049 = vmatpush1.bf16.msra.mxu1 %v3048_v46  ;;  %v346_v1 = vld [vmem:[#allocation5 + $0x1a0] sm:$0xff]  ;;  %v3108_v6 = vpack.c.bf16 %v900_v62, %v896_v61  ;;  %v333_v61 = vld [vmem:[#allocation5 + $0x138] sm:$0xff] }
  0x9f   : > { %3051 = vmatprep.subr.bf16.mxu1 %v3050_v51  ;;  %v3054_v63 = vpack.c.bf16 %v347_v56, %v343_v55  ;;  %v905_v2 = vld [vmem:[#allocation7 + $0x108] sm:$0xff]  ;;  %v3056_v7 = vpack.c.bf16 %v346_v1, %v342_v59  ;;  %v350_v8 = vld [vmem:[#allocation5 + $0x1c0] sm:$0xff]  ;;  %v316_v51 = vld [vmem:[#allocation5 + $0xb0] sm:$0xff] }
  0xa0   : > { %v909_v3 = vld [vmem:[#allocation7 + $0x128] sm:$0xff]  ;;  %3105 = vmatpush1.bf16.msra.mxu0 %v3104_v57  ;;  %v904_v10 = vld [vmem:[#allocation7 + $0x100] sm:$0xff]  ;;  %v4407_v55 = vld [vmem:[%s4380_s9 + $0x10] sm:$0xff]  ;;  %v3072_v56 = vpack.c.bf16 %v316_v51, %v312_v50  ;;  %v3074_v57 = vpack.c.bf16 %v325_v53, %v321_v52 }
  0xa1   : > { %v351_v4 = vld [vmem:[#allocation5 + $0x1c8] sm:$0xff]  ;;  %3107 = vmatprep.subr.bf16.mxu0 %v3106_v60  ;;  %v3110_v9 = vpack.c.bf16 %v909_v3, %v905_v2  ;;  %v908_v11 = vld [vmem:[#allocation7 + $0x120] sm:$0xff]  ;;  %v324_v59 = vld [vmem:[#allocation5 + $0xf0] sm:$0xff] }
  0xa2   : > { %v355_v5 = vld [vmem:[#allocation5 + $0x1e8] sm:$0xff]  ;;  %3053 = vmatpush1.bf16.msra.mxu1 %v3052_v58  ;;  %v354_v13 = vld [vmem:[#allocation5 + $0x1e0] sm:$0xff]  ;;  %v3112_v18 = vpack.c.bf16 %v908_v11, %v904_v10  ;;  %v320_v58 = vld [vmem:[#allocation5 + $0xd0] sm:$0xff] }
  0xa3   : > { %3055 = vmatprep.subr.bf16.mxu1 %v3054_v63  ;;  %v3058_v12 = vpack.c.bf16 %v355_v5, %v351_v4  ;;  %v913_v14 = vld [vmem:[#allocation7 + $0x148] sm:$0xff]  ;;  %v3060_v19 = vpack.c.bf16 %v354_v13, %v350_v8  ;;  %v912_v21 = vld [vmem:[#allocation7 + $0x140] sm:$0xff]  ;;  %v329_v60 = vld [vmem:[#allocation5 + $0x118] sm:$0xff]  ;;  %v3076_v63 = vpack.c.bf16 %v324_v59, %v320_v58 }
  0xa4   : > { %v917_v15 = vld [vmem:[#allocation7 + $0x168] sm:$0xff]  ;;  %3109 = vmatpush1.bf16.msra.mxu0 %v3108_v6  ;;  %v916_v22 = vld [vmem:[#allocation7 + $0x160] sm:$0xff]  ;;  %v4412_v62 = vld [vmem:[%s4380_s9 + $0x18] sm:$0xff]  ;;  %v3078_v1 = vpack.c.bf16 %v333_v61, %v329_v60 }
  0xa5   : > { %3111 = vmatprep.subr.bf16.mxu0 %v3110_v9  ;;  %v3114_v20 = vpack.c.bf16 %v917_v15, %v913_v14  ;;  %v921_v28 = vld [vmem:[#allocation7 + $0x188] sm:$0xff]  ;;  %v3116_v30 = vpack.c.bf16 %v916_v22, %v912_v21  ;;  %v4397_v31 = vld [vmem:[%s4380_s9] sm:$0xff]  ;;  %v328_v2 = vld [vmem:[#allocation5 + $0x110] sm:$0xff]  ;;  %v3088_v21 = vpack.c.bf16 %v348_v17, %v344_v16 }
  0xa6   : > { %3057 = vmatpush1.bf16.msra.mxu1 %v3056_v7  ;;  %v925_v29 = vld [vmem:[#allocation7 + $0x1a8] sm:$0xff]  ;;  %v920_v33 = vld [vmem:[#allocation7 + $0x180] sm:$0xff]  ;;  %v332_v3 = vld [vmem:[#allocation5 + $0x130] sm:$0xff] }
  0xa7   : > { %3059 = vmatprep.subr.bf16.mxu1 %v3058_v12  ;;  %v924_v34 = vld [vmem:[#allocation7 + $0x1a0] sm:$0xff]  ;;  %v3118_v38 = vpack.c.bf16 %v925_v29, %v921_v28  ;;  %v929_v39 = vld [vmem:[#allocation7 + $0x1c8] sm:$0xff]  ;;  %v337_v4 = vld [vmem:[#allocation5 + $0x158] sm:$0xff]  ;;  %v3080_v7 = vpack.c.bf16 %v332_v3, %v328_v2 }
  0xa8   : > { %3113 = vmatpush1.bf16.msra.mxu0 %v3112_v18  ;;  %v933_v40 = vld [vmem:[#allocation7 + $0x1e8] sm:$0xff]  ;;  %v3120_v43 = vpack.c.bf16 %v924_v34, %v920_v33  ;;  %v928_v46 = vld [vmem:[#allocation7 + $0x1c0] sm:$0xff]  ;;  %v341_v5 = vld [vmem:[#allocation5 + $0x178] sm:$0xff] }
  0xa9   : > { %3115 = vmatprep.subr.bf16.mxu0 %v3114_v20  ;;  %v4402_v44 = vld [vmem:[%s4380_s9 + $0x8] sm:$0xff]  ;;  %v932_v47 = vld [vmem:[#allocation7 + $0x1e0] sm:$0xff]  ;;  %v3122_v48 = vpack.c.bf16 %v933_v40, %v929_v39  ;;  %v3082_v8 = vpack.c.bf16 %v341_v5, %v337_v4  ;;  %v336_v9 = vld [vmem:[#allocation5 + $0x150] sm:$0xff]  ;;  %v4146_v40 = vmov 0.0|0.0  }
  0xaa   : > { %3061 = vmatpush1.bf16.msra.mxu1 %v3060_v19  ;;  %v3124_v54 = vpack.c.bf16 %v932_v47, %v928_v46  ;;  %v4419_v6 = vld [vmem:[%s4380_s9 + $0x20] sm:$0xff]  ;;  %v340_v10 = vld [vmem:[#allocation5 + $0x170] sm:$0xff]  ;;  %v345_v11 = vld [vmem:[#allocation5 + $0x198] sm:$0xff] }
  0xab   : > { %3063 = vmatprep.subr.bf16.mxu1 %v3062_v23  ;;  %v349_v12 = vld [vmem:[#allocation5 + $0x1b8] sm:$0xff]  ;;  %v4426_v13 = vld [vmem:[%s4380_s9 + $0x28] sm:$0xff]  ;;  %v3084_v14 = vpack.c.bf16 %v340_v10, %v336_v9  ;;  %v4433_v20 = vld [vmem:[%s4380_s9 + $0x30] sm:$0xff] }
  0xac   : > { %3117 = vmatpush1.bf16.msra.mxu0 %v3116_v30  ;;  %v3086_v15 = vpack.c.bf16 %v349_v12, %v345_v11  ;;  %v353_v18 = vld [vmem:[#allocation5 + $0x1d8] sm:$0xff]  ;;  %v352_v23 = vld [vmem:[#allocation5 + $0x1d0] sm:$0xff]  ;;  %v4447_v30 = vld [vmem:[%s4380_s9 + $0x40] sm:$0xff] }
  0xad   : > { %423 = vmatmul.mubr.f32.vlgmr.msra.gmra.mrb[0].mxu1 %v4397_v31  ;;  %3119 = vmatprep.subr.bf16.mxu0 %v3118_v38  ;;  %v357_v19 = vld [vmem:[#allocation5 + $0x1f8] sm:$0xff]  ;;  %v356_v24 = vld [vmem:[#allocation5 + $0x1f0] sm:$0xff]  ;;  %v4482_v36 = vld [vmem:[%s4380_s9 + $0x68] sm:$0xff] }
  0xae   : > { %3065 = vmatpush1.bf16.msra.mxu1 %v3064_v32  ;;  %428 = vmatprep.mubr.f32.mxu1 %v4145_v0  ;;  %v3090_v22 = vpack.c.bf16 %v357_v19, %v353_v18  ;;  %v875_v25 = vld [vmem:[#allocation7 + $0x18] sm:$0xff]  ;;  %v3092_v28 = vpack.c.bf16 %v356_v24, %v352_v23  ;;  %v4454_v32 = vld [vmem:[%s4380_s9 + $0x48] sm:$0xff]  ;;  %v4461_v33 = vld [vmem:[%s4380_s9 + $0x50] sm:$0xff] }
  0xaf   : > { %3067 = vmatprep.subr.bf16.mxu1 %v3066_v35  ;;  %v879_v26 = vld [vmem:[#allocation7 + $0x38] sm:$0xff]  ;;  %v4475_v35 = vld [vmem:[%s4380_s9 + $0x60] sm:$0xff]  ;;  %v2347_v38 = vld [vmem:[#allocation8 + $0x8] sm:$0xff] }
  0xb0   : > { %3121 = vmatpush1.bf16.msra.mxu0 %v3120_v43  ;;  %v4440_v27 = vld [vmem:[%s4380_s9 + $0x38] sm:$0xff]  ;;  %v3126_v29 = vpack.c.bf16 %v879_v26, %v875_v25  ;;  %v2346_v37 = vld [vmem:[#allocation8] sm:$0xff]  ;;  %v4489_v39 = vld [vmem:[%s4380_s9 + $0x70] sm:$0xff] }
  0xb1   : > { %429 = vmatmul.mubr.f32.gmra.mrb[2].mxu1 %v4402_v44  ;;  %3123 = vmatprep.subr.bf16.mxu0 %v3122_v48  ;;  %v4468_v34 = vld [vmem:[%s4380_s9 + $0x58] sm:$0xff]  ;;  %v3159_v41 = vpack.c.bf16 %v2347_v38, %v2346_v37  ;;  %v2348_v42 = vld [vmem:[#allocation8 + $0x10] sm:$0xff]  ;;  %v2350_v47 = vld [vmem:[#allocation8 + $0x20] sm:$0xff] }
  0xb2   : > { %434 = vmatprep.mubr.f32.mxu1 %v4145_v0  ;;  %3069 = vmatpush1.bf16.msra.mxu1 %v3068_v45  ;;  %v2349_v43 = vld [vmem:[#allocation8 + $0x18] sm:$0xff]  ;;  %v2351_v48 = vld [vmem:[#allocation8 + $0x28] sm:$0xff]  ;;  %v2352_v52 = vld [vmem:[#allocation8 + $0x30] sm:$0xff] }
  0xb3   : > { %3071 = vmatprep.subr.bf16.mxu1 %v3070_v49  ;;  %v4497_v45 = vld [vmem:[%s4380_s9 + $0x78] sm:$0xff]  ;;  %v3162_v46 = vpack.c.bf16 %v2349_v43, %v2348_v42  ;;  %v4505_v49 = vld [vmem:[%s4380_s9 + $0x80] sm:$0xff]  ;;  %v3165_v50 = vpack.c.bf16 %v2351_v48, %v2350_v47  ;;  %v4513_v51 = vld [vmem:[%s4380_s9 + $0x88] sm:$0xff] }
  0xb4   : > { %3125 = vmatpush1.bf16.msra.mxu0 %v3124_v54  ;;  %v2353_v53 = vld [vmem:[#allocation8 + $0x38] sm:$0xff]  ;;  %v4521_v58 = vld [vmem:[%s4380_s9 + $0x90] sm:$0xff]  ;;  %v2358_v2 = vld [vmem:[#allocation8 + $0x60] sm:$0xff] }
  0xb5   : > { %435 = vmatmul.mubr.f32.gmra.mrb[4].mxu1 %v4407_v55  ;;  %3158 = vmatprep.subr.bf16.mxu0 %v4146_v40  ;;  %v3168_v54 = vpack.c.bf16 %v2353_v53, %v2352_v52  ;;  %v2356_v60 = vld [vmem:[#allocation8 + $0x50] sm:$0xff]  ;;  %v2357_v61 = vld [vmem:[#allocation8 + $0x58] sm:$0xff]  ;;  %v2359_v3 = vld [vmem:[#allocation8 + $0x68] sm:$0xff] }
  0xb6   : > { %440 = vmatprep.mubr.f32.mxu1 %v4145_v0  ;;  %3073 = vmatpush1.bf16.msra.mxu1 %v3072_v56  ;;  %v2354_v56 = vld [vmem:[#allocation8 + $0x40] sm:$0xff]  ;;  %v3177_v5 = vpack.c.bf16 %v2359_v3, %v2358_v2  ;;  %v2361_v9 = vld [vmem:[#allocation8 + $0x78] sm:$0xff]  ;;  %v2363_v12 = vld [vmem:[#allocation8 + $0x88] sm:$0xff] }
  0xb7   : > { %3075 = vmatprep.subr.bf16.mxu1 %v3074_v57  ;;  %1001 = vmatmul.mubr.f32.vlgmr.msra.gmra.mrb[0].mxu0 %v4397_v31  ;;  %v2355_v57 = vld [vmem:[#allocation8 + $0x48] sm:$0xff]  ;;  %v4537_v4 = vld [vmem:[%s4380_s9 + $0xa0] sm:$0xff]  ;;  %v2364_v16 = vld [vmem:[#allocation8 + $0x90] sm:$0xff] }
  0xb8   : > { %1006 = vmatprep.mubr.f32.mxu0 %v4145_v0  ;;  %3160 = vmatpush1.bf16.msra.mxu0 %v3159_v41  ;;  %v3171_v59 = vpack.c.bf16 %v2355_v57, %v2354_v56  ;;  %v2362_v11 = vld [vmem:[#allocation8 + $0x80] sm:$0xff]  ;;  %v2365_v17 = vld [vmem:[#allocation8 + $0x98] sm:$0xff]  ;;  %v4577_v25 = vld [vmem:[%s4380_s9 + $0xc8] sm:$0xff] }
  0xb9   : > { %441 = vmatmul.mubr.f32.gmra.mrb[6].mxu1 %v4412_v62  ;;  %3161 = vmatprep.subr.bf16.mxu0 %v4146_v40  ;;  %v4561_v18 = vld [vmem:[%s4380_s9 + $0xb8] sm:$0xff]  ;;  %v3186_v19 = vpack.c.bf16 %v2365_v17, %v2364_v16  ;;  %v4569_v23 = vld [vmem:[%s4380_s9 + $0xc0] sm:$0xff]  ;;  %v2368_v26 = vld [vmem:[#allocation8 + $0xb0] sm:$0xff] }
  0xba   : > { %446 = vmatprep.mubr.f32.mxu1 %v4145_v0  ;;  %3077 = vmatpush1.bf16.msra.mxu1 %v3076_v63  ;;  %v4529_v63 = vld [vmem:[%s4380_s9 + $0x98] sm:$0xff]  ;;  %v4585_v37 = vld [vmem:[%s4380_s9 + $0xd0] sm:$0xff]  ;;  %v2370_v38 = vld [vmem:[#allocation8 + $0xc0] sm:$0xff] }
  0xbb   : > { %3079 = vmatprep.subr.bf16.mxu1 %v3078_v1  ;;  %1007 = vmatmul.mubr.f32.gmra.mrb[2].mxu0 %v4402_v44  ;;  %v3174_v1 = vpack.c.bf16 %v2357_v61, %v2356_v60  ;;  %v2371_v41 = vld [vmem:[#allocation8 + $0xc8] sm:$0xff]  ;;  %v4593_v43 = vld [vmem:[%s4380_s9 + $0xd8] sm:$0xff]  ;;  %v2374_v52 = vld [vmem:[#allocation8 + $0xe0] sm:$0xff] }
  0xbc   : > { %1012 = vmatprep.mubr.f32.mxu0 %v4145_v0  ;;  %3163 = vmatpush1.bf16.msra.mxu0 %v3162_v46  ;;  %v3195_v42 = vpack.c.bf16 %v2371_v41, %v2370_v38  ;;  %v2372_v46 = vld [vmem:[#allocation8 + $0xd0] sm:$0xff]  ;;  %v2373_v47 = vld [vmem:[#allocation8 + $0xd8] sm:$0xff]  ;;  %v2375_v53 = vld [vmem:[#allocation8 + $0xe8] sm:$0xff] }
  0xbd   : > { %447 = vmatmul.mubr.f32.gmra.mrb[8].mxu1 %v4419_v6  ;;  %3164 = vmatprep.subr.bf16.mxu0 %v4146_v40  ;;  %v3198_v48 = vpack.c.bf16 %v2373_v47, %v2372_v46  ;;  %v4609_v56 = vld [vmem:[%s4380_s9 + $0xe8] sm:$0xff]  ;;  %v2376_v57 = vld [vmem:[#allocation8 + $0xf0] sm:$0xff]  ;;  %v895_v16 = vld [vmem:[#allocation7 + $0xb8] sm:$0xff] }
  0xbe   : > { %452 = vmatprep.mubr.f32.mxu1 %v4145_v0  ;;  %3081 = vmatpush1.bf16.msra.mxu1 %v3080_v7  ;;  %v4545_v7 = vld [vmem:[%s4380_s9 + $0xa8] sm:$0xff]  ;;  %v4617_v61 = vld [vmem:[%s4380_s9 + $0xf0] sm:$0xff]  ;;  %v907_v41 = vld [vmem:[#allocation7 + $0x118] sm:$0xff] }
  0xbf   : > { %3083 = vmatprep.subr.bf16.mxu1 %v3082_v8  ;;  %1013 = vmatmul.mubr.f32.gmra.mrb[4].mxu0 %v4407_v55  ;;  %v2360_v8 = vld [vmem:[#allocation8 + $0x70] sm:$0xff] }
  0xc0   : > { %1018 = vmatprep.mubr.f32.mxu0 %v4145_v0  ;;  %3166 = vmatpush1.bf16.msra.mxu0 %v3165_v50  ;;  %v3180_v10 = vpack.c.bf16 %v2361_v9, %v2360_v8  ;;  %v4601_v50 = vld [vmem:[%s4380_s9 + $0xe0] sm:$0xff]  ;;  %v874_v2 = vld [vmem:[#allocation7 + $0x10] sm:$0xff]  ;;  %v887_v8 = vld [vmem:[#allocation7 + $0x78] sm:$0xff] }
  0xc1   : > { %453 = vmatmul.mubr.f32.gmra.mrb[10].mxu1 %v4426_v13  ;;  %3167 = vmatprep.subr.bf16.mxu0 %v4146_v40  ;;  %v878_v3 = vld [vmem:[#allocation7 + $0x30] sm:$0xff] }
  0xc2   : > { %458 = vmatprep.mubr.f32.mxu1 %v4145_v0  ;;  %3085 = vmatpush1.bf16.msra.mxu1 %v3084_v14  ;;  %v4553_v14 = vld [vmem:[%s4380_s9 + $0xb0] sm:$0xff]  ;;  %v3128_v9 = vpack.c.bf16 %v878_v3, %v874_v2  ;;  %v927_v2 = vld [vmem:[#allocation7 + $0x1b8] sm:$0xff] }
  0xc3   : > { %3087 = vmatprep.subr.bf16.mxu1 %v3086_v15  ;;  %1019 = vmatmul.mubr.f32.gmra.mrb[6].mxu0 %v4412_v62  ;;  %v3183_v15 = vpack.c.bf16 %v2363_v12, %v2362_v11  ;;  %v882_v11 = vld [vmem:[#allocation7 + $0x50] sm:$0xff] }
  0xc4   : > { %1024 = vmatprep.mubr.f32.mxu0 %v4145_v0  ;;  %3169 = vmatpush1.bf16.msra.mxu0 %v3168_v54  ;;  %v3201_v54 = vpack.c.bf16 %v2375_v53, %v2374_v52  ;;  %v886_v12 = vld [vmem:[#allocation7 + $0x70] sm:$0xff]  ;;  %v915_v52 = vld [vmem:[#allocation7 + $0x158] sm:$0xff] }
  0xc5   : > { %459 = vmatmul.mubr.f32.gmra.mrb[12].mxu1 %v4433_v20  ;;  %3170 = vmatprep.subr.bf16.mxu0 %v4146_v40  ;;  %v3132_v17 = vpack.c.bf16 %v886_v12, %v882_v11  ;;  %v902_v38 = vld [vmem:[#allocation7 + $0xf0] sm:$0xff]  ;;  %v919_v53 = vld [vmem:[#allocation7 + $0x178] sm:$0xff] }
  0xc6   : > { %464 = vmatprep.mubr.f32.mxu1 %v4145_v0  ;;  %3089 = vmatpush1.bf16.msra.mxu1 %v3088_v21  ;;  %v2366_v21 = vld [vmem:[#allocation8 + $0xa0] sm:$0xff]  ;;  %v906_v47 = vld [vmem:[#allocation7 + $0x110] sm:$0xff] }
  0xc7   : > { %3091 = vmatprep.subr.bf16.mxu1 %v3090_v22  ;;  %1025 = vmatmul.mubr.f32.gmra.mrb[8].mxu0 %v4419_v6  ;;  %v2367_v22 = vld [vmem:[#allocation8 + $0xa8] sm:$0xff] }
  0xc8   : > { %1030 = vmatprep.mubr.f32.mxu0 %v4145_v0  ;;  %3172 = vmatpush1.bf16.msra.mxu0 %v3171_v59  ;;  %v3189_v24 = vpack.c.bf16 %v2367_v22, %v2366_v21  ;;  %v2377_v59 = vld [vmem:[#allocation8 + $0xf8] sm:$0xff]  ;;  %v890_v21 = vld [vmem:[#allocation7 + $0x90] sm:$0xff] }
  0xc9   : > { %465 = vmatmul.mubr.f32.gmra.mrb[14].mxu1 %v4440_v27  ;;  %3173 = vmatprep.subr.bf16.mxu0 %v4146_v40  ;;  %v3204_v60 = vpack.c.bf16 %v2377_v59, %v2376_v57  ;;  %v894_v22 = vld [vmem:[#allocation7 + $0xb0] sm:$0xff]  ;;  %v3146_v57 = vpack.c.bf16 %v919_v53, %v915_v52 }
  0xca   : > { %470 = vmatprep.mubr.f32.mxu1 %v4145_v0  ;;  %3093 = vmatpush1.bf16.msra.mxu1 %v3092_v28  ;;  %v2369_v28 = vld [vmem:[#allocation8 + $0xb8] sm:$0xff]  ;;  %v914_v59 = vld [vmem:[#allocation7 + $0x150] sm:$0xff] }
  0xcb   : > { %3127 = vmatprep.subr.bf16.mxu1 %v3126_v29  ;;  %1031 = vmatmul.mubr.f32.gmra.mrb[10].mxu0 %v4426_v13  ;;  %v3192_v29 = vpack.c.bf16 %v2369_v28, %v2368_v26  ;;  %v903_v26 = vld [vmem:[#allocation7 + $0xf8] sm:$0xff] }
  0xcc   : > { %1036 = vmatprep.mubr.f32.mxu0 %v4145_v0  ;;  %3175 = vmatpush1.bf16.msra.mxu0 %v3174_v1  ;;  %v4625_v1 = vld [vmem:[%s4380_s9 + $0xf8] sm:$0xff] }
  0xcd   : > { %471 = vmatmul.mubr.f32.gmra.mrb[16].mxu1 %v4447_v30  ;;  %3176 = vmatprep.subr.bf16.mxu0 %v4146_v40 }
  0xce   : > { %476 = vmatprep.mubr.f32.mxu1 %v4145_v0 }
  0xcf   : > { %1037 = vmatmul.mubr.f32.gmra.mrb[12].mxu0 %v4433_v20 }
  0xd0   : > { %1042 = vmatprep.mubr.f32.mxu0 %v4145_v0  ;;  %3178 = vmatpush1.bf16.msra.mxu0 %v3177_v5  ;;  %v883_v5 = vld [vmem:[#allocation7 + $0x58] sm:$0xff] }
  0xd1   : > { %477 = vmatmul.mubr.f32.gmra.mrb[18].mxu1 %v4454_v32  ;;  %3179 = vmatprep.subr.bf16.mxu0 %v4146_v40 }
  0xd2   : > { %482 = vmatprep.mubr.f32.mxu1 %v4145_v0 }
  0xd3   : > { %1043 = vmatmul.mubr.f32.gmra.mrb[14].mxu0 %v4440_v27 }
  0xd4   : > { %1048 = vmatprep.mubr.f32.mxu0 %v4145_v0  ;;  %3181 = vmatpush1.bf16.msra.mxu0 %v3180_v10  ;;  %v3130_v10 = vpack.c.bf16 %v887_v8, %v883_v5  ;;  %v922_v8 = vld [vmem:[#allocation7 + $0x190] sm:$0xff] }
  0xd5   : > { %483 = vmatmul.mubr.f32.gmra.mrb[20].mxu1 %v4461_v33  ;;  %3182 = vmatprep.subr.bf16.mxu0 %v4146_v40 }
  0xd6   : > { %488 = vmatprep.mubr.f32.mxu1 %v4145_v0 }
  0xd7   : > { %1049 = vmatmul.mubr.f32.gmra.mrb[16].mxu0 %v4447_v30 }
  0xd8   : > { %1054 = vmatprep.mubr.f32.mxu0 %v4145_v0  ;;  %3184 = vmatpush1.bf16.msra.mxu0 %v3183_v15  ;;  %v891_v15 = vld [vmem:[#allocation7 + $0x98] sm:$0xff] }
  0xd9   : > { %489 = vmatmul.mubr.f32.gmra.mrb[22].mxu1 %v4468_v34  ;;  %3185 = vmatprep.subr.bf16.mxu0 %v4146_v40 }
  0xda   : > { %494 = vmatprep.mubr.f32.mxu1 %v4145_v0 }
  0xdb   : > { %1055 = vmatmul.mubr.f32.gmra.mrb[18].mxu0 %v4454_v32 }
  0xdc   : > { %1060 = vmatprep.mubr.f32.mxu0 %v4145_v0  ;;  %3187 = vmatpush1.bf16.msra.mxu0 %v3186_v19  ;;  %v3134_v19 = vpack.c.bf16 %v895_v16, %v891_v15  ;;  %v930_v15 = vld [vmem:[#allocation7 + $0x1d0] sm:$0xff] }
  0xdd   : > { %495 = vmatmul.mubr.f32.gmra.mrb[24].mxu1 %v4475_v35  ;;  %3188 = vmatprep.subr.bf16.mxu0 %v4146_v40 }
  0xde   : > { %500 = vmatprep.mubr.f32.mxu1 %v4145_v0 }
  0xdf   : > { %1061 = vmatmul.mubr.f32.gmra.mrb[20].mxu0 %v4461_v33 }
  0xe0   : > { %1066 = vmatprep.mubr.f32.mxu0 %v4145_v0  ;;  %3190 = vmatpush1.bf16.msra.mxu0 %v3189_v24  ;;  %v899_v24 = vld [vmem:[#allocation7 + $0xd8] sm:$0xff] }
  0xe1   : > { %501 = vmatmul.mubr.f32.gmra.mrb[26].mxu1 %v4482_v36  ;;  %3191 = vmatprep.subr.bf16.mxu0 %v4146_v40  ;;  %v3138_v28 = vpack.c.bf16 %v903_v26, %v899_v24 }
  0xe2   : > { %506 = vmatprep.mubr.f32.mxu1 %v4145_v0 }
  0xe3   : > { %1067 = vmatmul.mubr.f32.gmra.mrb[22].mxu0 %v4468_v34 }
  0xe4   : > { %1072 = vmatprep.mubr.f32.mxu0 %v4145_v0  ;;  %3193 = vmatpush1.bf16.msra.mxu0 %v3192_v29  ;;  %v898_v29 = vld [vmem:[#allocation7 + $0xd0] sm:$0xff] }
  0xe5   : > { %507 = vmatmul.mubr.f32.gmra.mrb[28].mxu1 %v4489_v39  ;;  %3194 = vmatprep.subr.bf16.mxu0 %v4146_v40 }
  0xe6   : > { %512 = vmatprep.mubr.f32.mxu1 %v4145_v0 }
  0xe7   : > { %1073 = vmatmul.mubr.f32.gmra.mrb[24].mxu0 %v4475_v35 }
  0xe8   : > { %1078 = vmatprep.mubr.f32.mxu0 %v4145_v0  ;;  %3196 = vmatpush1.bf16.msra.mxu0 %v3195_v42  ;;  %v911_v42 = vld [vmem:[#allocation7 + $0x138] sm:$0xff] }
  0xe9   : > { %513 = vmatmul.mubr.f32.gmra.mrb[30].mxu1 %v4497_v45  ;;  %3197 = vmatprep.subr.bf16.mxu0 %v4146_v40  ;;  %v3142_v46 = vpack.c.bf16 %v911_v42, %v907_v41 }
  0xea   : > { %518 = vmatprep.mubr.f32.mxu1 %v4145_v0 }
  0xeb   : > { %1079 = vmatmul.mubr.f32.gmra.mrb[26].mxu0 %v4482_v36 }
  0xec   : > { %1084 = vmatprep.mubr.f32.mxu0 %v4145_v0  ;;  %3199 = vmatpush1.bf16.msra.mxu0 %v3198_v48  ;;  %v910_v48 = vld [vmem:[#allocation7 + $0x130] sm:$0xff] }
  0xed   : > { %519 = vmatmul.mubr.f32.gmra.mrb[32].mxu1 %v4505_v49  ;;  %3200 = vmatprep.subr.bf16.mxu0 %v4146_v40 }
  0xee   : > { %524 = vmatprep.mubr.f32.mxu1 %v4145_v0 }
  0xef   : > { %1085 = vmatmul.mubr.f32.gmra.mrb[28].mxu0 %v4489_v39 }
  0xf0   : > { %1090 = vmatprep.mubr.f32.mxu0 %v4145_v0  ;;  %3202 = vmatpush1.bf16.msra.mxu0 %v3201_v54  ;;  %v3144_v54 = vpack.c.bf16 %v910_v48, %v906_v47 }
  0xf1   : > { %525 = vmatmul.mubr.f32.gmra.mrb[34].mxu1 %v4513_v51  ;;  %3203 = vmatprep.subr.bf16.mxu0 %v4146_v40 }
  0xf2   : > { %530 = vmatprep.mubr.f32.mxu1 %v4145_v0 }
  0xf3   : > { %1091 = vmatmul.mubr.f32.gmra.mrb[30].mxu0 %v4497_v45 }
  0xf4   : > { %1096 = vmatprep.mubr.f32.mxu0 %v4145_v0  ;;  %3205 = vmatpush1.bf16.msra.mxu0 %v3204_v60  ;;  %v923_v60 = vld [vmem:[#allocation7 + $0x198] sm:$0xff] }
  0xf5   : > { %531 = vmatmul.mubr.f32.gmra.mrb[36].mxu1 %v4521_v58  ;;  %3206 = vmatprep.subr.bf16.mxu0 %v4146_v40  ;;  %v3150_v5 = vpack.c.bf16 %v927_v2, %v923_v60 }
  0xf6   : > { %536 = vmatprep.mubr.f32.mxu1 %v4145_v0 }
  0xf7   : > { %1097 = vmatmul.mubr.f32.gmra.mrb[32].mxu0 %v4505_v49 }
  0xf8   : > { %1102 = vmatprep.mubr.f32.mxu0 %v4145_v0 }
  0xf9   : > { %537 = vmatmul.mubr.f32.gmra.mrb[38].mxu1 %v4529_v63 }
  0xfa   : > { %542 = vmatprep.mubr.f32.mxu1 %v4145_v0 }
  0xfb   : > { %1103 = vmatmul.mubr.f32.gmra.mrb[34].mxu0 %v4513_v51 }
  0xfc   : > { %1108 = vmatprep.mubr.f32.mxu0 %v4145_v0 }
  0xfd   : > { %543 = vmatmul.mubr.f32.gmra.mrb[40].mxu1 %v4537_v4 }
  0xfe   : > { %548 = vmatprep.mubr.f32.mxu1 %v4145_v0 }
  0xff   : > { %1109 = vmatmul.mubr.f32.gmra.mrb[36].mxu0 %v4521_v58 }
 0x100   : > { %1114 = vmatprep.mubr.f32.mxu0 %v4145_v0 }
 0x101   : > { %549 = vmatmul.mubr.f32.gmra.mrb[42].mxu1 %v4545_v7 }
 0x102   : > { %554 = vmatprep.mubr.f32.mxu1 %v4145_v0 }
 0x103   : > { %1115 = vmatmul.mubr.f32.gmra.mrb[38].mxu0 %v4529_v63 }
 0x104   : > { %1120 = vmatprep.mubr.f32.mxu0 %v4145_v0 }
 0x105   : > { %555 = vmatmul.mubr.f32.gmra.mrb[44].mxu1 %v4553_v14 }
 0x106   : > { %560 = vmatprep.mubr.f32.mxu1 %v4145_v0 }
 0x107   : > { %1121 = vmatmul.mubr.f32.gmra.mrb[40].mxu0 %v4537_v4 }
 0x108   : > { %1126 = vmatprep.mubr.f32.mxu0 %v4145_v0 }
 0x109   : > { %561 = vmatmul.mubr.f32.gmra.mrb[46].mxu1 %v4561_v18 }
 0x10a   : > { %566 = vmatprep.mubr.f32.mxu1 %v4145_v0 }
 0x10b   : > { %1127 = vmatmul.mubr.f32.gmra.mrb[42].mxu0 %v4545_v7 }
 0x10c   : > { %1132 = vmatprep.mubr.f32.mxu0 %v4145_v0 }
 0x10d   : > { %567 = vmatmul.mubr.f32.gmra.mrb[48].mxu1 %v4569_v23 }
 0x10e   : > { %572 = vmatprep.mubr.f32.mxu1 %v4145_v0 }
 0x10f   : > { %1133 = vmatmul.mubr.f32.gmra.mrb[44].mxu0 %v4553_v14 }
 0x110   : > { %1138 = vmatprep.mubr.f32.mxu0 %v4145_v0 }
 0x111   : > { %573 = vmatmul.mubr.f32.gmra.mrb[50].mxu1 %v4577_v25 }
 0x112   : > { %578 = vmatprep.mubr.f32.mxu1 %v4145_v0 }
 0x113   : > { %1139 = vmatmul.mubr.f32.gmra.mrb[46].mxu0 %v4561_v18 }
 0x114   : > { %1144 = vmatprep.mubr.f32.mxu0 %v4145_v0 }
 0x115   : > { %579 = vmatmul.mubr.f32.gmra.mrb[52].mxu1 %v4585_v37 }
 0x116   : > { %584 = vmatprep.mubr.f32.mxu1 %v4145_v0 }
 0x117   : > { %1145 = vmatmul.mubr.f32.gmra.mrb[48].mxu0 %v4569_v23 }
 0x118   : > { %1150 = vmatprep.mubr.f32.mxu0 %v4145_v0 }
 0x119   : > { %585 = vmatmul.mubr.f32.gmra.mrb[54].mxu1 %v4593_v43 }
 0x11a   : > { %590 = vmatprep.mubr.f32.mxu1 %v4145_v0 }
 0x11b   : > { %1151 = vmatmul.mubr.f32.gmra.mrb[50].mxu0 %v4577_v25 }
 0x11c   : > { %1156 = vmatprep.mubr.f32.mxu0 %v4145_v0 }
 0x11d   : > { %591 = vmatmul.mubr.f32.gmra.mrb[56].mxu1 %v4601_v50 }
 0x11e   : > { %596 = vmatprep.mubr.f32.mxu1 %v4145_v0 }
 0x11f   : > { %1157 = vmatmul.mubr.f32.gmra.mrb[52].mxu0 %v4585_v37 }
 0x120   : > { %1162 = vmatprep.mubr.f32.mxu0 %v4145_v0 }
 0x121   : > { %597 = vmatmul.mubr.f32.gmra.mrb[58].mxu1 %v4609_v56 }
 0x122   : > { %602 = vmatprep.mubr.f32.mxu1 %v4145_v0 }
 0x123   : > { %1163 = vmatmul.mubr.f32.gmra.mrb[54].mxu0 %v4593_v43 }
 0x124   : > { %1168 = vmatprep.mubr.f32.mxu0 %v4145_v0 }
 0x125   : > { %603 = vmatmul.mubr.f32.gmra.mrb[60].mxu1 %v4617_v61 }
 0x126   : > { %608 = vmatprep.mubr.f32.mxu1 %v4145_v0 }
 0x127   : > { %1169 = vmatmul.mubr.f32.gmra.mrb[56].mxu0 %v4601_v50 }
 0x128   : > { %1174 = vmatprep.mubr.f32.mxu0 %v4145_v0 }
 0x129   : > { %609 = vmatmul.mubr.f32.gmra.mrb[62].mxu1 %v4625_v1 }
 0x12a   : > { %679 = vmatprep.mubr.f32.mxu1 %v4145_v0 }
 0x12b   : > { %1175 = vmatmul.mubr.f32.gmra.mrb[58].mxu0 %v4609_v56 }
 0x12c   : > { %1180 = vmatprep.mubr.f32.mxu0 %v4145_v0 }
 0x12d   : > { %680 = vmatmul.mubr.f32.vlgmr.msra.gmra.mrb[64].mxu1 %v4397_v31  ;;  %v3136_v31 = vpack.c.bf16 %v894_v22, %v890_v21 }
 0x12e   : > { %3129 = vmatpush1.bf16.msra.mxu1 %v3128_v9  ;;  %685 = vmatprep.mubr.f32.mxu1 %v4145_v0  ;;  %v931_v9 = vld [vmem:[#allocation7 + $0x1d8] sm:$0xff] }
 0x12f   : > { %3131 = vmatprep.subr.bf16.mxu1 %v3130_v10  ;;  %1181 = vmatmul.mubr.f32.gmra.mrb[60].mxu0 %v4617_v61  ;;  %v935_v10 = vld [vmem:[#allocation7 + $0x1f8] sm:$0xff] }
 0x130   : > { %1186 = vmatprep.mubr.f32.mxu0 %v4145_v0  ;;  %v3154_v12 = vpack.c.bf16 %v935_v10, %v931_v9 }
 0x131   : > { %686 = vmatmul.mubr.f32.gmra.mrb[66].mxu1 %v4402_v44  ;;  %v3140_v44 = vpack.c.bf16 %v902_v38, %v898_v29 }
 0x132   : > { %691 = vmatprep.mubr.f32.mxu1 %v4145_v0  ;;  %3133 = vmatpush1.bf16.msra.mxu1 %v3132_v17 }
 0x133   : > { %3135 = vmatprep.subr.bf16.mxu1 %v3134_v19  ;;  %1187 = vmatmul.mubr.f32.gmra.mrb[62].mxu0 %v4625_v1 }
 0x135   : > { %692 = vmatmul.mubr.f32.gmra.mrb[68].mxu1 %v4407_v55  ;;  %v918_v55 = vld [vmem:[#allocation7 + $0x170] sm:$0xff] }
 0x136   : > { %697 = vmatprep.mubr.f32.mxu1 %v4145_v0  ;;  %3137 = vmatpush1.bf16.msra.mxu1 %v3136_v31  ;;  %v3148_v3 = vpack.c.bf16 %v918_v55, %v914_v59 }
 0x137   : > { %3139 = vmatprep.subr.bf16.mxu1 %v3138_v28 }
 0x139   : > { %698 = vmatmul.mubr.f32.gmra.mrb[70].mxu1 %v4412_v62  ;;  %v926_v62 = vld [vmem:[#allocation7 + $0x1b0] sm:$0xff] }
 0x13a   : > { %703 = vmatprep.mubr.f32.mxu1 %v4145_v0  ;;  %3141 = vmatpush1.bf16.msra.mxu1 %v3140_v44  ;;  %v3152_v11 = vpack.c.bf16 %v926_v62, %v922_v8 }
 0x13b   : > { %3143 = vmatprep.subr.bf16.mxu1 %v3142_v46 }
 0x13d   : > { %704 = vmatmul.mubr.f32.gmra.mrb[72].mxu1 %v4419_v6  ;;  %v934_v6 = vld [vmem:[#allocation7 + $0x1f0] sm:$0xff] }
 0x13e   : > { %709 = vmatprep.mubr.f32.mxu1 %v4145_v0  ;;  %3145 = vmatpush1.bf16.msra.mxu1 %v3144_v54  ;;  %v3156_v16 = vpack.c.bf16 %v934_v6, %v930_v15 }
 0x13f   : > { %3147 = vmatprep.subr.bf16.mxu1 %v3146_v57 }
 0x141   : > { %710 = vmatmul.mubr.f32.gmra.mrb[74].mxu1 %v4426_v13 }
 0x142   : > { %715 = vmatprep.mubr.f32.mxu1 %v4145_v0  ;;  %3149 = vmatpush1.bf16.msra.mxu1 %v3148_v3 }
 0x143   : > { %3151 = vmatprep.subr.bf16.mxu1 %v3150_v5 }
 0x145   : > { %716 = vmatmul.mubr.f32.gmra.mrb[76].mxu1 %v4433_v20 }
 0x146   : > { %721 = vmatprep.mubr.f32.mxu1 %v4145_v0  ;;  %3153 = vmatpush1.bf16.msra.mxu1 %v3152_v11 }
 0x147   : > { %3155 = vmatprep.subr.bf16.mxu1 %v3154_v12 }
 0x149   : > { %722 = vmatmul.mubr.f32.gmra.mrb[78].mxu1 %v4440_v27 }
 0x14a   : > { %727 = vmatprep.mubr.f32.mxu1 %v4145_v0  ;;  %3157 = vmatpush1.bf16.msra.mxu1 %v3156_v16 }
 0x14d   : > { %728 = vmatmul.mubr.f32.gmra.mrb[80].mxu1 %v4447_v30 }
 0x14e   : > { %733 = vmatprep.mubr.f32.mxu1 %v4145_v0 }
 0x151   : > { %734 = vmatmul.mubr.f32.gmra.mrb[82].mxu1 %v4454_v32 }
 0x152   : > { %739 = vmatprep.mubr.f32.mxu1 %v4145_v0 }
 0x155   : > { %740 = vmatmul.mubr.f32.gmra.mrb[84].mxu1 %v4461_v33 }
 0x156   : > { %745 = vmatprep.mubr.f32.mxu1 %v4145_v0 }
 0x159   : > { %746 = vmatmul.mubr.f32.gmra.mrb[86].mxu1 %v4468_v34 }
 0x15a   : > { %751 = vmatprep.mubr.f32.mxu1 %v4145_v0 }
 0x15d   : > { %752 = vmatmul.mubr.f32.gmra.mrb[88].mxu1 %v4475_v35 }
 0x15e   : > { %757 = vmatprep.mubr.f32.mxu1 %v4145_v0 }
 0x161   : > { %758 = vmatmul.mubr.f32.gmra.mrb[90].mxu1 %v4482_v36 }
 0x162   : > { %763 = vmatprep.mubr.f32.mxu1 %v4145_v0 }
 0x165   : > { %764 = vmatmul.mubr.f32.gmra.mrb[92].mxu1 %v4489_v39 }
 0x166   : > { %769 = vmatprep.mubr.f32.mxu1 %v4145_v0 }
 0x169   : > { %770 = vmatmul.mubr.f32.gmra.mrb[94].mxu1 %v4497_v45 }
 0x16a   : > { %775 = vmatprep.mubr.f32.mxu1 %v4145_v0 }
 0x16d   : > { %776 = vmatmul.mubr.f32.gmra.mrb[96].mxu1 %v4505_v49 }
 0x16e   : > { %781 = vmatprep.mubr.f32.mxu1 %v4145_v0 }
 0x171   : > { %782 = vmatmul.mubr.f32.gmra.mrb[98].mxu1 %v4513_v51 }
 0x172   : > { %787 = vmatprep.mubr.f32.mxu1 %v4145_v0 }
 0x175   : > { %788 = vmatmul.mubr.f32.gmra.mrb[100].mxu1 %v4521_v58 }
 0x176   : > { %793 = vmatprep.mubr.f32.mxu1 %v4145_v0 }
 0x179   : > { %794 = vmatmul.mubr.f32.gmra.mrb[102].mxu1 %v4529_v63 }
 0x17a   : > { %799 = vmatprep.mubr.f32.mxu1 %v4145_v0 }
 0x17d   : > { %800 = vmatmul.mubr.f32.gmra.mrb[104].mxu1 %v4537_v4 }
 0x17e   : > { %805 = vmatprep.mubr.f32.mxu1 %v4145_v0 }
 0x180   : > { %v4678_v13 = vpop.f32.mrb[0].mxu1 }
 0x181   : > { %v1450_v20 = vsub.f32 0.0, %v4678_v13  ;;  %v4681_v27 = vpop.f32.mrb[1].mxu1  ;;  %806 = vmatmul.mubr.f32.gmra.mrb[106].mxu1 %v4545_v7 }
 0x182   : > { %v1451_v30 = vsub.f32 0.0, %v4681_v27  ;;  %811 = vmatprep.mubr.f32.mxu1 %v4145_v0 }
 0x183   : > { %v1578_v32 = vmul.f32 1.442695, %v1450_v20 }
 0x184   : > { %v1580_v33 = vmul.f32 1.442695, %v1451_v30  ;;  %v4686_v34 = vpop.f32.mrb[2].mxu1 }
 0x185   : > { %3403 = vpow2.f32 %v1578_v32  ;;  %v1454_v35 = vsub.f32 0.0, %v4686_v34  ;;  %v4689_v36 = vpop.f32.mrb[3].mxu1  ;;  %812 = vmatmul.mubr.f32.gmra.mrb[108].mxu1 %v4553_v14 }
 0x186   : > { %3405 = vpow2.f32 %v1580_v33  ;;  %v1455_v39 = vsub.f32 0.0, %v4689_v36  ;;  %817 = vmatprep.mubr.f32.mxu1 %v4145_v0 }
 0x187   : > { %v1586_v45 = vmul.f32 1.442695, %v1454_v35 }
 0x188   : > { %v1588_v49 = vmul.f32 1.442695, %v1455_v39  ;;  %v4694_v51 = vpop.f32.mrb[4].mxu1 }
 0x189   : > { %3407 = vpow2.f32 %v1586_v45  ;;  %v1458_v58 = vsub.f32 0.0, %v4694_v51  ;;  %v4697_v63 = vpop.f32.mrb[5].mxu1  ;;  %818 = vmatmul.mubr.f32.gmra.mrb[110].mxu1 %v4561_v18 }
 0x18a   : > { %3409 = vpow2.f32 %v1588_v49  ;;  %v1459_v4 = vsub.f32 0.0, %v4697_v63  ;;  %823 = vmatprep.mubr.f32.mxu1 %v4145_v0  ;;  %v4702_v14 = vpop.f32.mrb[0].mxu0 }
 0x18b   : > { %v1594_v7 = vmul.f32 1.442695, %v1458_v58  ;;  %v4706_v21 = vpop.f32.mrb[1].mxu0 }
 0x18c   : > { %v1596_v17 = vmul.f32 1.442695, %v1459_v4  ;;  %v4704_v19 = vpop.f32.mrb[6].mxu1 }
 0x18d   : > { %3411 = vpow2.f32 %v1594_v7  ;;  %v1462_v22 = vsub.f32 0.0, %v4704_v19  ;;  %v4709_v24 = vpop.f32.mrb[7].mxu1  ;;  %824 = vmatmul.mubr.f32.gmra.mrb[112].mxu1 %v4569_v23 }
 0x18e   : > { %3413 = vpow2.f32 %v1596_v17  ;;  %v1463_v18 = vsub.f32 0.0, %v4709_v24  ;;  %829 = vmatprep.mubr.f32.mxu1 %v4145_v0  ;;  %v4714_v28 = vpop.f32.mrb[2].mxu0 }
 0x18f   : > { %v3404_v26 = vpop.eup %3403  ;;  %v1602_v31 = vmul.f32 1.442695, %v1462_v22  ;;  %v4718_v44 = vpop.f32.mrb[3].mxu0 }
 0x190   : > { %v3406_v29 = vpop.eup %3405  ;;  %v1834_v38 = vadd.f32 1.0, %v3404_v26  ;;  %v1604_v41 = vmul.f32 1.442695, %v1463_v18  ;;  %v4716_v42 = vpop.f32.mrb[8].mxu1 }
 0x191   : > { %v1835_v46 = vadd.f32 1.0, %v3406_v29  ;;  %3415 = vpow2.f32 %v1602_v31  ;;  %v1466_v23 = vsub.f32 0.0, %v4716_v42  ;;  %v4721_v47 = vpop.f32.mrb[9].mxu1  ;;  %830 = vmatmul.mubr.f32.gmra.mrb[114].mxu1 %v4577_v25 }
 0x192   : > { %3417 = vrcp.f32 %v1834_v38  ;;  %v1467_v48 = vsub.f32 0.0, %v4721_v47  ;;  %835 = vmatprep.mubr.f32.mxu1 %v4145_v0  ;;  %v4726_v54 = vpop.f32.mrb[4].mxu0 }
 0x193   : > { %v3408_v52 = vpop.eup %3407  ;;  %3419 = vrcp.f32 %v1835_v46  ;;  %v1610_v53 = vmul.f32 1.442695, %v1466_v23  ;;  %v4730_v2 = vpop.f32.mrb[5].mxu0 }
 0x194   : > { %v3410_v57 = vpop.eup %3409  ;;  %v1838_v59 = vadd.f32 1.0, %v3408_v52  ;;  %3421 = vpow2.f32 %v1604_v41  ;;  %v1612_v55 = vmul.f32 1.442695, %v1467_v48  ;;  %v4728_v60 = vpop.f32.mrb[10].mxu1 }
 0x195   : > { %v1839_v3 = vadd.f32 1.0, %v3410_v57  ;;  %3423 = vpow2.f32 %v1610_v53  ;;  %v1470_v25 = vsub.f32 0.0, %v4728_v60  ;;  %v4733_v5 = vpop.f32.mrb[11].mxu1  ;;  %836 = vmatmul.mubr.f32.gmra.mrb[116].mxu1 %v4585_v37 }
 0x196   : > { %3425 = vrcp.f32 %v1838_v59  ;;  %v1471_v8 = vsub.f32 0.0, %v4733_v5  ;;  %841 = vmatprep.mubr.f32.mxu1 %v4145_v0  ;;  %v4738_v10 = vpop.f32.mrb[6].mxu0 }
 0x197   : > { %v3412_v62 = vpop.eup %3411  ;;  %3427 = vrcp.f32 %v1839_v3  ;;  %v1618_v9 = vmul.f32 1.442695, %v1470_v25  ;;  %v4742_v16 = vpop.f32.mrb[7].mxu0 }
 0x198   : > { %v3414_v11 = vpop.eup %3413  ;;  %v1842_v12 = vadd.f32 1.0, %v3412_v62  ;;  %3429 = vpow2.f32 %v1612_v55  ;;  %v1620_v15 = vmul.f32 1.442695, %v1471_v8  ;;  %v4740_v6 = vpop.f32.mrb[12].mxu1 }
 0x199   : > { %v1843_v20 = vadd.f32 1.0, %v3414_v11  ;;  %3431 = vpow2.f32 %v1618_v9  ;;  %v1474_v37 = vsub.f32 0.0, %v4740_v6  ;;  %v4745_v30 = vpop.f32.mrb[13].mxu1  ;;  %842 = vmatmul.mubr.f32.gmra.mrb[118].mxu1 %v4593_v43 }
 0x19a   : > { %3433 = vrcp.f32 %v1842_v12  ;;  %v1475_v32 = vsub.f32 0.0, %v4745_v30  ;;  %847 = vmatprep.mubr.f32.mxu1 %v4145_v0  ;;  %v4750_v39 = vpop.f32.mrb[8].mxu0 }
 0x19b   : > { %v3416_v33 = vpop.eup %3415  ;;  %3435 = vrcp.f32 %v1843_v20  ;;  %v1626_v35 = vmul.f32 1.442695, %v1474_v37  ;;  %v4754_v7 = vpop.f32.mrb[9].mxu0 }
 0x19c   : > { %v3418_v45 = vpop.eup %3417  ;;  %v1846_v49 = vadd.f32 1.0, %v3416_v33  ;;  %3437 = vpow2.f32 %v1620_v15  ;;  %v1628_v58 = vmul.f32 1.442695, %v1475_v32  ;;  %v4752_v4 = vpop.f32.mrb[14].mxu1  ;;  %v2378_v33 = vld [vmem:[#allocation8 + $0x100] sm:$0xff] }
 0x19d   : > { %v3420_v17 = vpop.eup %3419  ;;  %v2090_v43 = vmul.f32 %v3418_v45, %v4678_v13  ;;  %3439 = vpow2.f32 %v1626_v35  ;;  %v1478_v22 = vsub.f32 0.0, %v4752_v4  ;;  %v4758_v18 = vpop.f32.mrb[15].mxu1  ;;  %848 = vmatmul.mubr.f32.gmra.mrb[120].mxu1 %v4601_v50 }
 0x19e   : > { %v3422_v26 = vpop.eup %3421  ;;  %v2091_v31 = vmul.f32 %v3420_v17, %v4681_v27  ;;  %3441 = vrcp.f32 %v1846_v49  ;;  %v1479_v29 = vsub.f32 0.0, %v4758_v18  ;;  %853 = vmatprep.mubr.f32.mxu1 %v4145_v0  ;;  %v4765_v23 = vpop.f32.mrb[10].mxu0 }
 0x19f   : > { %v3424_v38 = vpop.eup %3423  ;;  %v1847_v41 = vadd.f32 1.0, %v3422_v26  ;;  %3443 = vpow2.f32 %v1628_v58  ;;  %v1634_v46 = vmul.f32 1.442695, %v1478_v22  ;;  %v2218_v13 = vmul.f32 %v2090_v43, %v4702_v14  ;;  %v4770_v27 = vpop.f32.mrb[11].mxu0  ;;  %v2379_v58 = vld [vmem:[#allocation8 + $0x108] sm:$0xff] }
 0x1a0   : > { %v3426_v48 = vpop.eup %3425  ;;  %v1850_v52 = vadd.f32 1.0, %v3424_v38  ;;  %v1636_v53 = vmul.f32 1.442695, %v1479_v29  ;;  %v2219_v50 = vmul.f32 %v2091_v31, %v4706_v21  ;;  %v4768_v57 = vpop.f32.mrb[16].mxu1  ;;  %v3207_v22 = vpack.c.bf16 %v2379_v58, %v2378_v33 }
 0x1a1   : > { %v3428_v59 = vpop.eup %3427  ;;  %v2094_v55 = vmul.f32 %v3426_v48, %v4686_v34  ;;  %3445 = vrcp.f32 %v1847_v41  ;;  %v1482_v3 = vsub.f32 0.0, %v4768_v57  ;;  %v4774_v25 = vpop.f32.mrb[17].mxu1  ;;  %854 = vmatmul.mubr.f32.gmra.mrb[122].mxu1 %v4609_v56 }
 0x1a2   : > { %v3430_v14 = vpop.eup %3429  ;;  %v2095_v8 = vmul.f32 %v3428_v59, %v4689_v36  ;;  %3447 = vrcp.f32 %v1850_v52  ;;  %v1483_v21 = vsub.f32 0.0, %v4774_v25  ;;  %2474 = vmatprep.mubr.f32.mxu0 %v2219_v50  ;;  %859 = vmatprep.mubr.f32.mxu1 %v4145_v0  ;;  %v4781_v12 = vpop.f32.mrb[12].mxu0 }
 0x1a3   : > { %v3432_v62 = vpop.eup %3431  ;;  %v1851_v9 = vadd.f32 1.0, %v3430_v14  ;;  %3449 = vpow2.f32 %v1634_v46  ;;  %v1642_v34 = vmul.f32 1.442695, %v1482_v3  ;;  %v2222_v11 = vmul.f32 %v2094_v55, %v4714_v28  ;;  %2475 = vmatmul.mubr.f32.vlgmr.msra.gmra.mrb[64].mxu0 %v2218_v13  ;;  %v4786_v32 = vpop.f32.mrb[13].mxu0 }
 0x1a4   : > { %v3434_v15 = vpop.eup %3433  ;;  %v1854_v56 = vadd.f32 1.0, %v3432_v62  ;;  %3451 = vpow2.f32 %v1636_v53  ;;  %v1644_v20 = vmul.f32 1.442695, %v1483_v21  ;;  %v2223_v36 = vmul.f32 %v2095_v8, %v4718_v44  ;;  %v4784_v37 = vpop.f32.mrb[18].mxu1  ;;  %3208 = vmatpush1.bf16.msra.mxu0 %v3207_v22 }
 0x1a5   : > { %v3436_v35 = vpop.eup %3435  ;;  %v2098_v45 = vmul.f32 %v3434_v15, %v4694_v51  ;;  %3453 = vrcp.f32 %v1851_v9  ;;  %v1486_v28 = vsub.f32 0.0, %v4784_v37  ;;  %v4790_v49 = vpop.f32.mrb[19].mxu1  ;;  %860 = vmatmul.mubr.f32.gmra.mrb[124].mxu1 %v4617_v61  ;;  %3209 = vmatprep.subr.bf16.mxu0 %v4146_v40 }
 0x1a6   : > { %v3438_v17 = vpop.eup %3437  ;;  %v2099_v43 = vmul.f32 %v3436_v35, %v4697_v63  ;;  %3455 = vrcp.f32 %v1854_v56  ;;  %v1487_v44 = vsub.f32 0.0, %v4790_v49  ;;  %2479 = vmatprep.mubr.f32.mxu0 %v2223_v36  ;;  %865 = vmatprep.mubr.f32.mxu1 %v4145_v0  ;;  %v4797_v38 = vpop.f32.mrb[14].mxu0  ;;  %v2381_v36 = vld [vmem:[#allocation8 + $0x118] sm:$0xff] }
 0x1a7   : > { %v3440_v26 = vpop.eup %3439  ;;  %v1855_v51 = vadd.f32 1.0, %v3438_v17  ;;  %3457 = vpow2.f32 %v1642_v34  ;;  %v1650_v31 = vmul.f32 1.442695, %v1486_v28  ;;  %v2226_v29 = vmul.f32 %v2098_v45, %v4726_v54  ;;  %2480 = vmatmul.mubr.f32.gmra.mrb[66].mxu0 %v2222_v11  ;;  %v4802_v13 = vpop.f32.mrb[15].mxu0 }
 0x1a8   : > { %v3442_v61 = vpop.eup %3441  ;;  %v1858_v41 = vadd.f32 1.0, %v3440_v26  ;;  %3459 = vpow2.f32 %v1644_v20  ;;  %v2227_v63 = vmul.f32 %v2099_v43, %v4730_v2  ;;  %v4800_v46 = vpop.f32.mrb[20].mxu1  ;;  %v1652_v53 = vmul.f32 1.442695, %v1487_v44  ;;  %v2380_v20 = vld [vmem:[#allocation8 + $0x110] sm:$0xff] }
 0x1a9   : > { %v3444_v48 = vpop.eup %3443  ;;  %v2102_v52 = vmul.f32 %v3442_v61, %v4704_v19  ;;  %3461 = vrcp.f32 %v1855_v51  ;;  %v1490_v54 = vsub.f32 0.0, %v4800_v46  ;;  %v4806_v50 = vpop.f32.mrb[21].mxu1  ;;  %866 = vmatmul.mubr.f32.gmra.mrb[126].mxu1 %v4625_v1 }
 0x1aa   : > { %3463 = vrcp.f32 %v1858_v41  ;;  %v1859_v2 = vadd.f32 1.0, %v3444_v48  ;;  %v1491_v59 = vsub.f32 0.0, %v4806_v50  ;;  %2484 = vmatprep.mubr.f32.mxu0 %v2227_v63  ;;  %1257 = vmatprep.mubr.f32.mxu1 %v4145_v0  ;;  %v4813_v14 = vpop.f32.mrb[16].mxu0  ;;  %v3916_v63 = vld [vmem:[%s4380_s9 + $0x8] sm:$0xff] }
 0x1ab   : > { %v3446_v55 = vpop.eup %3445  ;;  %3465 = vpow2.f32 %v1650_v31  ;;  %v1658_v19 = vmul.f32 1.442695, %v1490_v54  ;;  %v2230_v3 = vmul.f32 %v2102_v52, %v4738_v10  ;;  %2485 = vmatmul.mubr.f32.gmra.mrb[68].mxu0 %v2226_v29  ;;  %v4818_v9 = vpop.f32.mrb[17].mxu0  ;;  %v3915_v10 = vld [vmem:[%s4380_s9] sm:$0xff]  ;;  %v3210_v31 = vpack.c.bf16 %v2381_v36, %v2380_v20  ;;  %v3917_v36 = vld [vmem:[%s4380_s9 + $0x10] sm:$0xff] }
 0x1ac   : > { %v3448_v8 = vpop.eup %3447  ;;  %v2103_v1 = vmul.f32 %v3446_v55, %v4709_v24  ;;  %3467 = vrcp.f32 %v1859_v2  ;;  %v1660_v21 = vmul.f32 1.442695, %v1491_v59  ;;  %v4816_v62 = vpop.f32.mrb[22].mxu1 }
 0x1ad   : > { %v3450_v34 = vpop.eup %3449  ;;  %v2106_v11 = vmul.f32 %v3448_v8, %v4716_v42  ;;  %3469 = vpow2.f32 %v1652_v53  ;;  %v1494_v15 = vsub.f32 0.0, %v4816_v62  ;;  %v4822_v56 = vpop.f32.mrb[23].mxu1  ;;  %1258 = vmatmul.mubr.f32.vlgmr.msra.gmra.mrb[128].mxu1 %v3915_v10  ;;  %3211 = vmatpush1.bf16.msra.mxu0 %v3210_v31 }
 0x1ae   : > { %v3452_v33 = vpop.eup %3451  ;;  %v1862_v24 = vadd.f32 1.0, %v3450_v34  ;;  %3471 = vpow2.f32 %v1658_v19  ;;  %v2231_v35 = vmul.f32 %v2103_v1, %v4742_v16  ;;  %v1495_v45 = vsub.f32 0.0, %v4822_v56  ;;  %1263 = vmatprep.mubr.f32.mxu1 %v4145_v0  ;;  %v4829_v43 = vpop.f32.mrb[18].mxu0  ;;  %3212 = vmatprep.subr.bf16.mxu0 %v4146_v40  ;;  %v2382_v19 = vld [vmem:[#allocation8 + $0x120] sm:$0xff] }
 0x1af   : > { %v3454_v28 = vpop.eup %3453  ;;  %v1863_v42 = vadd.f32 1.0, %v3452_v33  ;;  %3473 = vpow2.f32 %v1660_v21  ;;  %v1666_v58 = vmul.f32 1.442695, %v1494_v15  ;;  %v2234_v17 = vmul.f32 %v2106_v11, %v4750_v39  ;;  %v4834_v51 = vpop.f32.mrb[19].mxu0 }
 0x1b0   : > { %v3456_v44 = vpop.eup %3455  ;;  %v2107_v22 = vmul.f32 %v3454_v28, %v4721_v47  ;;  %3475 = vrcp.f32 %v1862_v24  ;;  %v1668_v26 = vmul.f32 1.442695, %v1495_v45  ;;  %2489 = vmatprep.mubr.f32.mxu0 %v2231_v35  ;;  %v4832_v16 = vpop.f32.mrb[24].mxu1 }
 0x1b1   : > { %v3458_v29 = vpop.eup %3457  ;;  %v2110_v61 = vmul.f32 %v3456_v44, %v4728_v60  ;;  %3477 = vrcp.f32 %v1863_v42  ;;  %2490 = vmatmul.mubr.f32.gmra.mrb[70].mxu0 %v2230_v3  ;;  %v1498_v39 = vsub.f32 0.0, %v4832_v16  ;;  %v4838_v41 = vpop.f32.mrb[25].mxu1  ;;  %1264 = vmatmul.mubr.f32.gmra.mrb[130].mxu1 %v3916_v63  ;;  %v2383_v3 = vld [vmem:[#allocation8 + $0x128] sm:$0xff] }
 0x1b2   : > { %v3460_v47 = vpop.eup %3459  ;;  %v1866_v48 = vadd.f32 1.0, %v3458_v29  ;;  %3479 = vpow2.f32 %v1666_v58  ;;  %v2235_v52 = vmul.f32 %v2107_v22, %v4754_v7  ;;  %v1499_v53 = vsub.f32 0.0, %v4838_v41  ;;  %1269 = vmatprep.mubr.f32.mxu1 %v4145_v0  ;;  %v4845_v55 = vpop.f32.mrb[20].mxu0 }
 0x1b3   : > { %v3462_v54 = vpop.eup %3461  ;;  %v1867_v60 = vadd.f32 1.0, %v3460_v47  ;;  %3481 = vpow2.f32 %v1668_v26  ;;  %v1674_v2 = vmul.f32 1.442695, %v1498_v39  ;;  %v2238_v59 = vmul.f32 %v2110_v61, %v4765_v23  ;;  %v4851_v34 = vpop.f32.mrb[21].mxu0  ;;  %v3918_v39 = vld [vmem:[%s4380_s9 + $0x18] sm:$0xff] }
 0x1b4   : > { %v3464_v8 = vpop.eup %3463  ;;  %v2111_v7 = vmul.f32 %v3462_v54, %v4733_v5  ;;  %3483 = vrcp.f32 %v1866_v48  ;;  %v1676_v1 = vmul.f32 1.442695, %v1499_v53  ;;  %2494 = vmatprep.mubr.f32.mxu0 %v2235_v52  ;;  %v4849_v21 = vpop.f32.mrb[26].mxu1  ;;  %v3213_v11 = vpack.c.bf16 %v2383_v3, %v2382_v19 }
 0x1b5   : > { %v3466_v15 = vpop.eup %3465  ;;  %v2114_v23 = vmul.f32 %v3464_v8, %v4740_v6  ;;  %3485 = vrcp.f32 %v1867_v60  ;;  %2495 = vmatmul.mubr.f32.gmra.mrb[72].mxu0 %v2234_v17  ;;  %v1502_v10 = vsub.f32 0.0, %v4849_v21  ;;  %v4855_v20 = vpop.f32.mrb[27].mxu1  ;;  %1270 = vmatmul.mubr.f32.gmra.mrb[132].mxu1 %v3917_v36 }
 0x1b6   : > { %v3468_v5 = vpop.eup %3467  ;;  %v1870_v33 = vadd.f32 1.0, %v3466_v15  ;;  %3487 = vpow2.f32 %v1674_v2  ;;  %v2239_v24 = vmul.f32 %v2111_v7, %v4770_v27  ;;  %v1503_v35 = vsub.f32 0.0, %v4855_v20  ;;  %1275 = vmatprep.mubr.f32.mxu1 %v4145_v0  ;;  %3214 = vmatpush1.bf16.msra.mxu0 %v3213_v11  ;;  %v4863_v58 = vpop.f32.mrb[22].mxu0  ;;  %v3919_v15 = vld [vmem:[%s4380_s9 + $0x20] sm:$0xff] }
 0x1b7   : > { %v3470_v45 = vpop.eup %3469  ;;  %v2115_v6 = vmul.f32 %v3468_v5, %v4745_v30  ;;  %3489 = vpow2.f32 %v1676_v1  ;;  %v1682_v28 = vmul.f32 1.442695, %v1502_v10  ;;  %v2242_v42 = vmul.f32 %v2114_v23, %v4781_v12  ;;  %3215 = vmatprep.subr.bf16.mxu0 %v4146_v40  ;;  %v4868_v26 = vpop.f32.mrb[23].mxu0  ;;  %v2384_v23 = vld [vmem:[#allocation8 + $0x130] sm:$0xff] }
 0x1b8   : > { %v3472_v17 = vpop.eup %3471  ;;  %3491 = vrcp.f32 %v1870_v33  ;;  %v1871_v27 = vadd.f32 1.0, %v3470_v45  ;;  %v1684_v44 = vmul.f32 1.442695, %v1503_v35  ;;  %2499 = vmatprep.mubr.f32.mxu0 %v2239_v24  ;;  %v4866_v22 = vpop.f32.mrb[28].mxu1 }
 0x1b9   : > { %v3474_v31 = vpop.eup %3473  ;;  %v1874_v30 = vadd.f32 1.0, %v3472_v17  ;;  %3493 = vpow2.f32 %v1682_v28  ;;  %v2243_v29 = vmul.f32 %v2115_v6, %v4786_v32  ;;  %2500 = vmatmul.mubr.f32.gmra.mrb[74].mxu0 %v2238_v59  ;;  %v1506_v12 = vsub.f32 0.0, %v4866_v22  ;;  %v4872_v61 = vpop.f32.mrb[29].mxu1  ;;  %1276 = vmatmul.mubr.f32.gmra.mrb[134].mxu1 %v3918_v39 }
 0x1ba   : > { %v3476_v63 = vpop.eup %3475  ;;  %3495 = vrcp.f32 %v1871_v27  ;;  %v1875_v47 = vadd.f32 1.0, %v3474_v31  ;;  %v1507_v48 = vsub.f32 0.0, %v4872_v61  ;;  %1281 = vmatprep.mubr.f32.mxu1 %v4145_v0  ;;  %v4878_v32 = vpop.f32.mrb[24].mxu0 }
 0x1bb   : > { %v3478_v52 = vpop.eup %3477  ;;  %v2118_v53 = vmul.f32 %v3476_v63, %v4752_v4  ;;  %3497 = vrcp.f32 %v1874_v30  ;;  %v1690_v54 = vmul.f32 1.442695, %v1506_v12  ;;  %2504 = vmatprep.mubr.f32.mxu0 %v2243_v29  ;;  %v4883_v3 = vpop.f32.mrb[25].mxu0  ;;  %v3920_v12 = vld [vmem:[%s4380_s9 + $0x28] sm:$0xff] }
 0x1bc   : > { %v3480_v60 = vpop.eup %3479  ;;  %v2119_v2 = vmul.f32 %v3478_v52, %v4758_v18  ;;  %3499 = vrcp.f32 %v1875_v47  ;;  %v1692_v59 = vmul.f32 1.442695, %v1507_v48  ;;  %v4881_v19 = vpop.f32.mrb[30].mxu1  ;;  %v2385_v18 = vld [vmem:[#allocation8 + $0x138] sm:$0xff] }
 0x1bd   : > { %v3482_v8 = vpop.eup %3481  ;;  %v1878_v7 = vadd.f32 1.0, %v3480_v60  ;;  %3501 = vpow2.f32 %v1684_v44  ;;  %v2246_v4 = vmul.f32 %v2118_v53, %v4797_v38  ;;  %2505 = vmatmul.mubr.f32.gmra.mrb[76].mxu0 %v2242_v42  ;;  %v1510_v1 = vsub.f32 0.0, %v4881_v19  ;;  %v4887_v11 = vpop.f32.mrb[31].mxu1  ;;  %1282 = vmatmul.mubr.f32.gmra.mrb[136].mxu1 %v3919_v15  ;;  %v3921_v15 = vld [vmem:[%s4380_s9 + $0x30] sm:$0xff] }
 0x1be   : > { %v3484_v10 = vpop.eup %3483  ;;  %v1879_v36 = vadd.f32 1.0, %v3482_v8  ;;  %3503 = vpow2.f32 %v1690_v54  ;;  %v2247_v5 = vmul.f32 %v2119_v2, %v4802_v13  ;;  %v1511_v33 = vsub.f32 0.0, %v4887_v11  ;;  %1287 = vmatprep.mubr.f32.mxu1 %v4145_v0  ;;  %v4894_v45 = vpop.f32.mrb[26].mxu0 }
 0x1bf   : > { %v3486_v24 = vpop.eup %3485  ;;  %v2122_v38 = vmul.f32 %v3484_v10, %v4768_v57  ;;  %3505 = vrcp.f32 %v1878_v7  ;;  %v1698_v35 = vmul.f32 1.442695, %v1510_v1  ;;  %v3216_v6 = vpack.c.bf16 %v2385_v18, %v2384_v23  ;;  %v4899_v27 = vpop.f32.mrb[27].mxu0  ;;  %v2386_v23 = vld [vmem:[#allocation8 + $0x140] sm:$0xff]  ;;  %v2387_v18 = vld [vmem:[#allocation8 + $0x148] sm:$0xff] }
 0x1c0   : > { %v3488_v28 = vpop.eup %3487  ;;  %v2123_v42 = vmul.f32 %v3486_v24, %v4774_v25  ;;  %3507 = vrcp.f32 %v1879_v36  ;;  %v1700_v17 = vmul.f32 1.442695, %v1511_v33  ;;  %2509 = vmatprep.mubr.f32.mxu0 %v2247_v5  ;;  %v4897_v13 = vpop.f32.mrb[32].mxu1 }
 0x1c1   : > { %v3490_v44 = vpop.eup %3489  ;;  %v1882_v31 = vadd.f32 1.0, %v3488_v28  ;;  %3509 = vpow2.f32 %v1692_v59  ;;  %v2250_v57 = vmul.f32 %v2122_v38, %v4813_v14  ;;  %2510 = vmatmul.mubr.f32.gmra.mrb[78].mxu0 %v2246_v4  ;;  %v1514_v30 = vsub.f32 0.0, %v4897_v13  ;;  %v4903_v29 = vpop.f32.mrb[33].mxu1  ;;  %1288 = vmatmul.mubr.f32.gmra.mrb[138].mxu1 %v3920_v12  ;;  %v3922_v12 = vld [vmem:[%s4380_s9 + $0x38] sm:$0xff] }
 0x1c2   : > { %v3492_v25 = vpop.eup %3491  ;;  %v1883_v39 = vadd.f32 1.0, %v3490_v44  ;;  %3511 = vpow2.f32 %v1698_v35  ;;  %v2251_v63 = vmul.f32 %v2123_v42, %v4818_v9  ;;  %v1515_v47 = vsub.f32 0.0, %v4903_v29  ;;  %1293 = vmatprep.mubr.f32.mxu1 %v4145_v0  ;;  %3217 = vmatpush1.bf16.msra.mxu0 %v3216_v6  ;;  %v4910_v53 = vpop.f32.mrb[28].mxu0 }
 0x1c3   : > { %v3494_v48 = vpop.eup %3493  ;;  %v2126_v14 = vmul.f32 %v3492_v25, %v4784_v37  ;;  %3513 = vrcp.f32 %v1882_v31  ;;  %v1706_v52 = vmul.f32 1.442695, %v1514_v30  ;;  %3218 = vmatprep.subr.bf16.mxu0 %v4146_v40  ;;  %v4915_v59 = vpop.f32.mrb[29].mxu0 }
 0x1c4   : > { %v3496_v54 = vpop.eup %3495  ;;  %3515 = vrcp.f32 %v1883_v39  ;;  %v1886_v60 = vadd.f32 1.0, %v3494_v48  ;;  %v1708_v2 = vmul.f32 1.442695, %v1515_v47  ;;  %2514 = vmatprep.mubr.f32.mxu0 %v2251_v63  ;;  %v4913_v9 = vpop.f32.mrb[34].mxu1 }
 0x1c5   : > { %v3498_v8 = vpop.eup %3497  ;;  %v2127_v7 = vmul.f32 %v3496_v54, %v4790_v49  ;;  %3517 = vpow2.f32 %v1700_v17  ;;  %v2254_v37 = vmul.f32 %v2126_v14, %v4829_v43  ;;  %2515 = vmatmul.mubr.f32.gmra.mrb[80].mxu0 %v2250_v57  ;;  %v1518_v4 = vsub.f32 0.0, %v4913_v9  ;;  %v4920_v1 = vpop.f32.mrb[35].mxu1  ;;  %1294 = vmatmul.mubr.f32.gmra.mrb[140].mxu1 %v3921_v15 }
 0x1c6   : > { %v3500_v10 = vpop.eup %3499  ;;  %v2130_v36 = vmul.f32 %v3498_v8, %v4800_v46  ;;  %3519 = vrcp.f32 %v1886_v60  ;;  %v1519_v5 = vsub.f32 0.0, %v4920_v1  ;;  %1299 = vmatprep.mubr.f32.mxu1 %v4145_v0  ;;  %v3219_v49 = vpack.c.bf16 %v2387_v18, %v2386_v23  ;;  %v4928_v35 = vpop.f32.mrb[30].mxu0  ;;  %v2388_v8 = vld [vmem:[#allocation8 + $0x150] sm:$0xff]  ;;  %v3923_v23 = vld [vmem:[%s4380_s9 + $0x40] sm:$0xff]  ;;  %v2389_v18 = vld [vmem:[#allocation8 + $0x158] sm:$0xff] }
 0x1c7   : > { %v3502_v33 = vpop.eup %3501  ;;  %v2131_v43 = vmul.f32 %v3500_v10, %v4806_v50  ;;  %3521 = vpow2.f32 %v1706_v52  ;;  %v2255_v24 = vmul.f32 %v2127_v7, %v4834_v51  ;;  %v1714_v38 = vmul.f32 1.442695, %v1518_v4  ;;  %v4933_v44 = vpop.f32.mrb[31].mxu0 }
 0x1c8   : > { %v3504_v6 = vpop.eup %3503  ;;  %v1887_v28 = vadd.f32 1.0, %v3502_v33  ;;  %3523 = vpow2.f32 %v1708_v2  ;;  %v1716_v46 = vmul.f32 1.442695, %v1519_v5  ;;  %v2258_v42 = vmul.f32 %v2130_v36, %v4845_v55  ;;  %v4931_v17 = vpop.f32.mrb[36].mxu1  ;;  %3220 = vmatpush1.bf16.msra.mxu0 %v3219_v49 }
 0x1c9   : > { %v3506_v31 = vpop.eup %3505  ;;  %v1890_v50 = vadd.f32 1.0, %v3504_v6  ;;  %3525 = vpow2.f32 %v1714_v38  ;;  %2519 = vmatprep.mubr.f32.mxu0 %v2255_v24  ;;  %v2259_v51 = vmul.f32 %v2131_v43, %v4851_v34  ;;  %v1522_v57 = vsub.f32 0.0, %v4931_v17  ;;  %v4937_v30 = vpop.f32.mrb[37].mxu1  ;;  %1300 = vmatmul.mubr.f32.gmra.mrb[142].mxu1 %v3922_v12 }
 0x1ca   : > { %v3508_v25 = vpop.eup %3507  ;;  %v2134_v55 = vmul.f32 %v3506_v31, %v4816_v62  ;;  %3527 = vrcp.f32 %v1887_v28  ;;  %2520 = vmatmul.mubr.f32.gmra.mrb[82].mxu0 %v2254_v37  ;;  %v1523_v39 = vsub.f32 0.0, %v4937_v30  ;;  %1305 = vmatprep.mubr.f32.mxu1 %v4145_v0  ;;  %v4944_v48 = vpop.f32.mrb[32].mxu0  ;;  %v3222_v5 = vpack.c.bf16 %v2389_v18, %v2388_v8 }
 0x1cb   : > { %v3510_v63 = vpop.eup %3509  ;;  %v2135_v47 = vmul.f32 %v3508_v25, %v4822_v56  ;;  %3529 = vrcp.f32 %v1890_v50  ;;  %v1722_v34 = vmul.f32 1.442695, %v1522_v57  ;;  %2524 = vmatprep.mubr.f32.mxu0 %v2259_v51  ;;  %3221 = vmatprep.subr.bf16.mxu0 %v4146_v40  ;;  %v4950_v2 = vpop.f32.mrb[33].mxu0  ;;  %v3924_v57 = vld [vmem:[%s4380_s9 + $0x48] sm:$0xff] }
 0x1cc   : > { %v3512_v14 = vpop.eup %3511  ;;  %v1891_v52 = vadd.f32 1.0, %v3510_v63  ;;  %3531 = vpow2.f32 %v1716_v46  ;;  %v1724_v62 = vmul.f32 1.442695, %v1523_v39  ;;  %v2262_v54 = vmul.f32 %v2134_v55, %v4863_v58  ;;  %v4948_v60 = vpop.f32.mrb[38].mxu1  ;;  %3223 = vmatpush1.bf16.msra.mxu0 %v3222_v5 }
 0x1cd   : > { %v3514_v56 = vpop.eup %3513  ;;  %v1894_v7 = vadd.f32 1.0, %v3512_v14  ;;  %3533 = vpow2.f32 %v1722_v34  ;;  %v2263_v37 = vmul.f32 %v2135_v47, %v4868_v26  ;;  %v1526_v4 = vsub.f32 0.0, %v4948_v60  ;;  %v4954_v15 = vpop.f32.mrb[39].mxu1  ;;  %1306 = vmatmul.mubr.f32.gmra.mrb[144].mxu1 %v3923_v23  ;;  %3224 = vmatprep.subr.bf16.mxu0 %v4146_v40  ;;  %v2390_v47 = vld [vmem:[#allocation8 + $0x160] sm:$0xff]  ;;  %v2391_v34 = vld [vmem:[#allocation8 + $0x168] sm:$0xff]  ;;  %v3925_v23 = vld [vmem:[%s4380_s9 + $0x50] sm:$0xff] }
 0x1ce   : > { %v3516_v10 = vpop.eup %3515  ;;  %v2138_v58 = vmul.f32 %v3514_v56, %v4832_v16  ;;  %3535 = vrcp.f32 %v1891_v52  ;;  %2525 = vmatmul.mubr.f32.gmra.mrb[84].mxu0 %v2258_v42  ;;  %v1527_v36 = vsub.f32 0.0, %v4954_v15  ;;  %1311 = vmatprep.mubr.f32.mxu1 %v4145_v0  ;;  %v4961_v43 = vpop.f32.mrb[34].mxu0  ;;  %v3225_v56 = vpack.c.bf16 %v2391_v34, %v2390_v47 }
 0x1cf   : > { %v3518_v49 = vpop.eup %3517  ;;  %v2139_v26 = vmul.f32 %v3516_v10, %v4838_v41  ;;  %3537 = vrcp.f32 %v1894_v7  ;;  %v1730_v33 = vmul.f32 1.442695, %v1526_v4  ;;  %2529 = vmatprep.mubr.f32.mxu0 %v2263_v37  ;;  %v4966_v46 = vpop.f32.mrb[35].mxu0 }
 0x1d0   : > { %v3520_v24 = vpop.eup %3519  ;;  %v1895_v38 = vadd.f32 1.0, %v3518_v49  ;;  %3539 = vpow2.f32 %v1724_v62  ;;  %v1732_v16 = vmul.f32 1.442695, %v1527_v36  ;;  %v2266_v6 = vmul.f32 %v2138_v58, %v4878_v32  ;;  %v4964_v28 = vpop.f32.mrb[40].mxu1  ;;  %3226 = vmatpush1.bf16.msra.mxu0 %v3225_v56 }
 0x1d1   : > { %v3522_v42 = vpop.eup %3521  ;;  %v2142_v41 = vmul.f32 %v3520_v24, %v4849_v21  ;;  %3541 = vpow2.f32 %v1730_v33  ;;  %v2267_v31 = vmul.f32 %v2139_v26, %v4883_v3  ;;  %v1530_v50 = vsub.f32 0.0, %v4964_v28  ;;  %v4971_v51 = vpop.f32.mrb[41].mxu1  ;;  %1312 = vmatmul.mubr.f32.gmra.mrb[146].mxu1 %v3924_v57  ;;  %3227 = vmatprep.subr.bf16.mxu0 %v4146_v40 }
 0x1d2   : > { %v3524_v32 = vpop.eup %3523  ;;  %3543 = vrcp.f32 %v1895_v38  ;;  %v1898_v12 = vadd.f32 1.0, %v3522_v42  ;;  %2530 = vmatmul.mubr.f32.gmra.mrb[86].mxu0 %v2262_v54  ;;  %v1531_v25 = vsub.f32 0.0, %v4971_v51  ;;  %1317 = vmatprep.mubr.f32.mxu1 %v4145_v0  ;;  %v4978_v63 = vpop.f32.mrb[36].mxu0 }
 0x1d3   : > { %v3526_v21 = vpop.eup %3525  ;;  %v1899_v55 = vadd.f32 1.0, %v3524_v32  ;;  %3545 = vpow2.f32 %v1732_v16  ;;  %v1738_v3 = vmul.f32 1.442695, %v1530_v50  ;;  %v2270_v39 = vmul.f32 %v2142_v41, %v4894_v45  ;;  %2534 = vmatprep.mubr.f32.mxu0 %v2267_v31  ;;  %v4982_v8 = vpop.f32.mrb[37].mxu0  ;;  %v3926_v50 = vld [vmem:[%s4380_s9 + $0x58] sm:$0xff] }
 0x1d4   : > { %v3528_v14 = vpop.eup %3527  ;;  %3547 = vrcp.f32 %v1898_v12  ;;  %v1902_v52 = vadd.f32 1.0, %v3526_v21  ;;  %v1740_v62 = vmul.f32 1.442695, %v1531_v25  ;;  %v4980_v54 = vpop.f32.mrb[42].mxu1 }
 0x1d5   : > { %v3530_v7 = vpop.eup %3529  ;;  %v2143_v37 = vmul.f32 %v3528_v14, %v4855_v20  ;;  %3549 = vrcp.f32 %v1899_v55  ;;  %v1534_v45 = vsub.f32 0.0, %v4980_v54  ;;  %v4986_v4 = vpop.f32.mrb[43].mxu1  ;;  %1318 = vmatmul.mubr.f32.gmra.mrb[148].mxu1 %v3925_v23  ;;  %v2392_v14 = vld [vmem:[#allocation8 + $0x170] sm:$0xff] }
 0x1d6   : > { %v3532_v18 = vpop.eup %3531  ;;  %v2146_v10 = vmul.f32 %v3530_v7, %v4866_v22  ;;  %3551 = vrcp.f32 %v1902_v52  ;;  %2535 = vmatmul.mubr.f32.gmra.mrb[88].mxu0 %v2266_v6  ;;  %v1535_v58 = vsub.f32 0.0, %v4986_v4  ;;  %1323 = vmatprep.mubr.f32.mxu1 %v4145_v0  ;;  %v4993_v26 = vpop.f32.mrb[38].mxu0 }
 0x1d7   : > { %v3534_v36 = vpop.eup %3533  ;;  %v1903_v5 = vadd.f32 1.0, %v3532_v18  ;;  %3553 = vpow2.f32 %v1738_v3  ;;  %v2271_v20 = vmul.f32 %v2143_v37, %v4899_v27  ;;  %v1746_v49 = vmul.f32 1.442695, %v1534_v45  ;;  %v4998_v6 = vpop.f32.mrb[39].mxu0  ;;  %v3927_v37 = vld [vmem:[%s4380_s9 + $0x60] sm:$0xff]  ;;  %v2393_v45 = vld [vmem:[#allocation8 + $0x178] sm:$0xff] }
 0x1d8   : > { %v3536_v33 = vpop.eup %3535  ;;  %v1906_v24 = vadd.f32 1.0, %v3534_v36  ;;  %3555 = vpow2.f32 %v1740_v62  ;;  %v1748_v22 = vmul.f32 1.442695, %v1535_v58  ;;  %v2274_v38 = vmul.f32 %v2146_v10, %v4910_v53  ;;  %v4996_v16 = vpop.f32.mrb[44].mxu1 }
 0x1d9   : > { %v3538_v42 = vpop.eup %3537  ;;  %v2147_v27 = vmul.f32 %v3536_v33, %v4872_v61  ;;  %3557 = vrcp.f32 %v1903_v5  ;;  %2539 = vmatprep.mubr.f32.mxu0 %v2271_v20  ;;  %v1538_v41 = vsub.f32 0.0, %v4996_v16  ;;  %v5003_v31 = vpop.f32.mrb[45].mxu1  ;;  %1324 = vmatmul.mubr.f32.gmra.mrb[150].mxu1 %v3926_v50  ;;  %v3228_v10 = vpack.c.bf16 %v2393_v45, %v2392_v14  ;;  %v3928_v50 = vld [vmem:[%s4380_s9 + $0x68] sm:$0xff]  ;;  %v3929_v45 = vld [vmem:[%s4380_s9 + $0x70] sm:$0xff] }
 0x1da   : > { %v3540_v57 = vpop.eup %3539  ;;  %v2150_v53 = vmul.f32 %v3538_v42, %v4881_v19  ;;  %3559 = vrcp.f32 %v1906_v24  ;;  %2540 = vmatmul.mubr.f32.gmra.mrb[90].mxu0 %v2270_v39  ;;  %v1539_v32 = vsub.f32 0.0, %v5003_v31  ;;  %1329 = vmatprep.mubr.f32.mxu1 %v4145_v0  ;;  %v5010_v55 = vpop.f32.mrb[40].mxu0 }
 0x1db   : > { %v3542_v12 = vpop.eup %3541  ;;  %v1907_v25 = vadd.f32 1.0, %v3540_v57  ;;  %3561 = vpow2.f32 %v1746_v49  ;;  %v2275_v61 = vmul.f32 %v2147_v27, %v4915_v59  ;;  %v1754_v21 = vmul.f32 1.442695, %v1538_v41  ;;  %v5015_v39 = vpop.f32.mrb[41].mxu0  ;;  %3229 = vmatpush1.bf16.msra.mxu0 %v3228_v10 }
 0x1dc   : > { %v3544_v3 = vpop.eup %3543  ;;  %v1910_v47 = vadd.f32 1.0, %v3542_v12  ;;  %3563 = vpow2.f32 %v1748_v22  ;;  %v2278_v19 = vmul.f32 %v2150_v53, %v4928_v35  ;;  %v5013_v34 = vpop.f32.mrb[46].mxu1  ;;  %v1756_v56 = vmul.f32 1.442695, %v1539_v32  ;;  %3230 = vmatprep.subr.bf16.mxu0 %v4146_v40 }
 0x1dd   : > { %v3546_v52 = vpop.eup %3545  ;;  %v2151_v62 = vmul.f32 %v3544_v3, %v4887_v11  ;;  %3565 = vrcp.f32 %v1907_v25  ;;  %2544 = vmatprep.mubr.f32.mxu0 %v2275_v61  ;;  %v1542_v59 = vsub.f32 0.0, %v5013_v34  ;;  %v5019_v7 = vpop.f32.mrb[47].mxu1  ;;  %1330 = vmatmul.mubr.f32.gmra.mrb[152].mxu1 %v3927_v37  ;;  %v2395_v3 = vld [vmem:[#allocation8 + $0x188] sm:$0xff] }
 0x1de   : > { %v3548_v23 = vpop.eup %3547  ;;  %3567 = vrcp.f32 %v1910_v47  ;;  %v1911_v35 = vadd.f32 1.0, %v3546_v52  ;;  %2545 = vmatmul.mubr.f32.gmra.mrb[92].mxu0 %v2274_v38  ;;  %v1543_v18 = vsub.f32 0.0, %v5019_v7  ;;  %1335 = vmatprep.mubr.f32.mxu1 %v4145_v0  ;;  %v5026_v20 = vpop.f32.mrb[42].mxu0 }
 0x1df   : > { %v3550_v11 = vpop.eup %3549  ;;  %v2154_v58 = vmul.f32 %v3548_v23, %v4897_v13  ;;  %3569 = vpow2.f32 %v1754_v21  ;;  %v2279_v36 = vmul.f32 %v2151_v62, %v4933_v44  ;;  %v1762_v5 = vmul.f32 1.442695, %v1542_v59  ;;  %v5031_v38 = vpop.f32.mrb[43].mxu0  ;;  %v2394_v21 = vld [vmem:[#allocation8 + $0x180] sm:$0xff] }
 0x1e0   : > { %v3552_v49 = vpop.eup %3551  ;;  %v2155_v33 = vmul.f32 %v3550_v11, %v4903_v29  ;;  %3571 = vrcp.f32 %v1911_v35  ;;  %v1764_v24 = vmul.f32 1.442695, %v1543_v18  ;;  %v5029_v22 = vpop.f32.mrb[48].mxu1  ;;  %v3231_v62 = vpack.c.bf16 %v2395_v3, %v2394_v21 }
 0x1e1   : > { %v3554_v42 = vpop.eup %3553  ;;  %v2158_v13 = vmul.f32 %v3552_v49, %v4913_v9  ;;  %3573 = vpow2.f32 %v1756_v56  ;;  %v2282_v44 = vmul.f32 %v2154_v58, %v4944_v48  ;;  %2549 = vmatprep.mubr.f32.mxu0 %v2279_v36  ;;  %v1546_v27 = vsub.f32 0.0, %v5029_v22  ;;  %v5036_v41 = vpop.f32.mrb[49].mxu1  ;;  %1336 = vmatmul.mubr.f32.gmra.mrb[154].mxu1 %v3928_v50 }
 0x1e2   : > { %v3556_v29 = vpop.eup %3555  ;;  %v1914_v57 = vadd.f32 1.0, %v3554_v42  ;;  %3575 = vpow2.f32 %v1762_v5  ;;  %v2283_v53 = vmul.f32 %v2155_v33, %v4950_v2  ;;  %2550 = vmatmul.mubr.f32.gmra.mrb[94].mxu0 %v2278_v19  ;;  %v1547_v32 = vsub.f32 0.0, %v5036_v41  ;;  %1341 = vmatprep.mubr.f32.mxu1 %v4145_v0  ;;  %v5043_v61 = vpop.f32.mrb[44].mxu0 }
 0x1e3   : > { %v3558_v9 = vpop.eup %3557  ;;  %v1915_v12 = vadd.f32 1.0, %v3556_v29  ;;  %3577 = vpow2.f32 %v1764_v24  ;;  %v1770_v48 = vmul.f32 1.442695, %v1546_v27  ;;  %v2286_v25 = vmul.f32 %v2158_v13, %v4961_v43  ;;  %v5049_v52 = vpop.f32.mrb[45].mxu0  ;;  %3232 = vmatpush1.bf16.msra.mxu0 %v3231_v62  ;;  %v3930_v27 = vld [vmem:[%s4380_s9 + $0x78] sm:$0xff] }
 0x1e4   : > { %v3560_v47 = vpop.eup %3559  ;;  %v2159_v2 = vmul.f32 %v3558_v9, %v4920_v1  ;;  %3579 = vrcp.f32 %v1914_v57  ;;  %v1772_v19 = vmul.f32 1.442695, %v1547_v32  ;;  %2554 = vmatprep.mubr.f32.mxu0 %v2283_v53  ;;  %v5047_v14 = vpop.f32.mrb[50].mxu1  ;;  %3233 = vmatprep.subr.bf16.mxu0 %v4146_v40  ;;  %v2396_v53 = vld [vmem:[#allocation8 + $0x190] sm:$0xff]  ;;  %v2397_v32 = vld [vmem:[#allocation8 + $0x198] sm:$0xff] }
 0x1e5   : > { %v3562_v56 = vpop.eup %3561  ;;  %v2162_v43 = vmul.f32 %v3560_v47, %v4931_v17  ;;  %3581 = vrcp.f32 %v1915_v12  ;;  %v1550_v59 = vsub.f32 0.0, %v5047_v14  ;;  %v5053_v37 = vpop.f32.mrb[51].mxu1  ;;  %1342 = vmatmul.mubr.f32.gmra.mrb[156].mxu1 %v3929_v45 }
 0x1e6   : > { %v3564_v23 = vpop.eup %3563  ;;  %v1918_v1 = vadd.f32 1.0, %v3562_v56  ;;  %3583 = vpow2.f32 %v1770_v48  ;;  %v2287_v35 = vmul.f32 %v2159_v2, %v4966_v46  ;;  %2555 = vmatmul.mubr.f32.gmra.mrb[96].mxu0 %v2282_v44  ;;  %v1551_v18 = vsub.f32 0.0, %v5053_v37  ;;  %1347 = vmatprep.mubr.f32.mxu1 %v4145_v0  ;;  %v5060_v36 = vpop.f32.mrb[46].mxu0 }
 0x1e7   : > { %v3566_v10 = vpop.eup %3565  ;;  %v1919_v11 = vadd.f32 1.0, %v3564_v23  ;;  %3585 = vpow2.f32 %v1772_v19  ;;  %v1778_v17 = vmul.f32 1.442695, %v1550_v59  ;;  %v2290_v58 = vmul.f32 %v2162_v43, %v4978_v63  ;;  %v5065_v24 = vpop.f32.mrb[47].mxu0  ;;  %v3931_v59 = vld [vmem:[%s4380_s9 + $0x80] sm:$0xff] }
 0x1e8   : > { %v3568_v5 = vpop.eup %3567  ;;  %v2163_v49 = vmul.f32 %v3566_v10, %v4937_v30  ;;  %3587 = vrcp.f32 %v1918_v1  ;;  %v1780_v46 = vmul.f32 1.442695, %v1551_v18  ;;  %2559 = vmatprep.mubr.f32.mxu0 %v2287_v35  ;;  %v5063_v33 = vpop.f32.mrb[52].mxu1  ;;  %v3234_v19 = vpack.c.bf16 %v2397_v32, %v2396_v53  ;;  %v2398_v35 = vld [vmem:[#allocation8 + $0x1a0] sm:$0xff]  ;;  %v2399_v18 = vld [vmem:[#allocation8 + $0x1a8] sm:$0xff] }
 0x1e9   : > { %v3570_v42 = vpop.eup %3569  ;;  %v2166_v13 = vmul.f32 %v3568_v5, %v4948_v60  ;;  %3589 = vrcp.f32 %v1919_v11  ;;  %v1554_v63 = vsub.f32 0.0, %v5063_v33  ;;  %v5070_v44 = vpop.f32.mrb[53].mxu1  ;;  %1348 = vmatmul.mubr.f32.gmra.mrb[158].mxu1 %v3930_v27  ;;  %v3237_v5 = vpack.c.bf16 %v2399_v18, %v2398_v35 }
 0x1ea   : > { %v3572_v30 = vpop.eup %3571  ;;  %v1922_v50 = vadd.f32 1.0, %v3570_v42  ;;  %3591 = vpow2.f32 %v1778_v17  ;;  %v2291_v29 = vmul.f32 %v2163_v49, %v4982_v8  ;;  %2560 = vmatmul.mubr.f32.gmra.mrb[98].mxu0 %v2286_v25  ;;  %v1555_v57 = vsub.f32 0.0, %v5070_v44  ;;  %1353 = vmatprep.mubr.f32.mxu1 %v4145_v0  ;;  %v5078_v21 = vpop.f32.mrb[48].mxu0 }
 0x1eb   : > { %v3574_v60 = vpop.eup %3573  ;;  %v2167_v9 = vmul.f32 %v3572_v30, %v4954_v15  ;;  %3593 = vpow2.f32 %v1780_v46  ;;  %v1786_v12 = vmul.f32 1.442695, %v1554_v63  ;;  %v2294_v48 = vmul.f32 %v2166_v13, %v4993_v26  ;;  %v5082_v2 = vpop.f32.mrb[49].mxu0  ;;  %3235 = vmatpush1.bf16.msra.mxu0 %v3234_v19 }
 0x1ec   : > { %v3576_v3 = vpop.eup %3575  ;;  %3595 = vrcp.f32 %v1922_v50  ;;  %v1923_v8 = vadd.f32 1.0, %v3574_v60  ;;  %v1788_v25 = vmul.f32 1.442695, %v1555_v57  ;;  %2564 = vmatprep.mubr.f32.mxu0 %v2291_v29  ;;  %v5080_v47 = vpop.f32.mrb[54].mxu1  ;;  %3236 = vmatprep.subr.bf16.mxu0 %v4146_v40  ;;  %v3932_v29 = vld [vmem:[%s4380_s9 + $0x88] sm:$0xff]  ;;  %v2400_v60 = vld [vmem:[#allocation8 + $0x1b0] sm:$0xff] }
 0x1ed   : > { %v3578_v62 = vpop.eup %3577  ;;  %v1926_v56 = vadd.f32 1.0, %v3576_v3  ;;  %3597 = vpow2.f32 %v1786_v12  ;;  %v2295_v15 = vmul.f32 %v2167_v9, %v4998_v6  ;;  %v1558_v26 = vsub.f32 0.0, %v5080_v47  ;;  %v5086_v43 = vpop.f32.mrb[55].mxu1  ;;  %1354 = vmatmul.mubr.f32.gmra.mrb[160].mxu1 %v3931_v59  ;;  %v2401_v9 = vld [vmem:[#allocation8 + $0x1b8] sm:$0xff] }
 0x1ee   : > { %v3580_v45 = vpop.eup %3579  ;;  %3599 = vrcp.f32 %v1923_v8  ;;  %v1927_v23 = vadd.f32 1.0, %v3578_v62  ;;  %2565 = vmatmul.mubr.f32.gmra.mrb[100].mxu0 %v2290_v58  ;;  %v1559_v1 = vsub.f32 0.0, %v5086_v43  ;;  %1359 = vmatprep.mubr.f32.mxu1 %v4145_v0  ;;  %v5092_v17 = vpop.f32.mrb[50].mxu0 }
 0x1ef   : > { %v3582_v10 = vpop.eup %3581  ;;  %v2170_v11 = vmul.f32 %v3580_v45, %v4964_v28  ;;  %3601 = vrcp.f32 %v1926_v56  ;;  %v1794_v6 = vmul.f32 1.442695, %v1558_v26  ;;  %2569 = vmatprep.mubr.f32.mxu0 %v2295_v15  ;;  %v5097_v13 = vpop.f32.mrb[51].mxu0  ;;  %3238 = vmatpush1.bf16.msra.mxu0 %v3237_v5 }
 0x1f0   : > { %v3584_v49 = vpop.eup %3583  ;;  %v2171_v58 = vmul.f32 %v3582_v10, %v4971_v51  ;;  %3603 = vrcp.f32 %v1927_v23  ;;  %v1796_v46 = vmul.f32 1.442695, %v1559_v1  ;;  %v5095_v42 = vpop.f32.mrb[56].mxu1  ;;  %3239 = vmatprep.subr.bf16.mxu0 %v4146_v40  ;;  %v3933_v23 = vld [vmem:[%s4380_s9 + $0x90] sm:$0xff]  ;;  %v2402_v10 = vld [vmem:[#allocation8 + $0x1c0] sm:$0xff] }
 0x1f1   : > { %v3586_v28 = vpop.eup %3585  ;;  %v1930_v63 = vadd.f32 1.0, %v3584_v49  ;;  %3605 = vpow2.f32 %v1788_v25  ;;  %v2298_v27 = vmul.f32 %v2170_v11, %v5010_v55  ;;  %v1562_v30 = vsub.f32 0.0, %v5095_v42  ;;  %v5102_v50 = vpop.f32.mrb[57].mxu1  ;;  %1360 = vmatmul.mubr.f32.gmra.mrb[162].mxu1 %v3932_v29  ;;  %v2403_v11 = vld [vmem:[#allocation8 + $0x1c8] sm:$0xff] }
 0x1f2   : > { %v3588_v51 = vpop.eup %3587  ;;  %v1931_v57 = vadd.f32 1.0, %v3586_v28  ;;  %3607 = vpow2.f32 %v1794_v6  ;;  %v2299_v53 = vmul.f32 %v2171_v58, %v5015_v39  ;;  %2570 = vmatmul.mubr.f32.gmra.mrb[102].mxu0 %v2294_v48  ;;  %v1563_v32 = vsub.f32 0.0, %v5102_v50  ;;  %1365 = vmatprep.mubr.f32.mxu1 %v4145_v0  ;;  %v5109_v8 = vpop.f32.mrb[52].mxu0 }
 0x1f3   : > { %v3590_v12 = vpop.eup %3589  ;;  %v2174_v55 = vmul.f32 %v3588_v51, %v4980_v54  ;;  %3609 = vrcp.f32 %v1930_v63  ;;  %v1802_v3 = vmul.f32 1.442695, %v1562_v30  ;;  %v3240_v25 = vpack.c.bf16 %v2401_v9, %v2400_v60  ;;  %v5114_v56 = vpop.f32.mrb[53].mxu0 }
 0x1f4   : > { %v3592_v19 = vpop.eup %3591  ;;  %v2175_v39 = vmul.f32 %v3590_v12, %v4986_v4  ;;  %3611 = vrcp.f32 %v1931_v57  ;;  %v1804_v48 = vmul.f32 1.442695, %v1563_v32  ;;  %2574 = vmatprep.mubr.f32.mxu0 %v2299_v53  ;;  %v5112_v62 = vpop.f32.mrb[58].mxu1  ;;  %v3243_v58 = vpack.c.bf16 %v2403_v11, %v2402_v10  ;;  %v3934_v53 = vld [vmem:[%s4380_s9 + $0x98] sm:$0xff]  ;;  %v2406_v11 = vld [vmem:[#allocation8 + $0x1e0] sm:$0xff] }
 0x1f5   : > { %v3594_v54 = vpop.eup %3593  ;;  %v1934_v15 = vadd.f32 1.0, %v3592_v19  ;;  %3613 = vpow2.f32 %v1796_v46  ;;  %v2302_v26 = vmul.f32 %v2174_v55, %v5026_v20  ;;  %v1566_v59 = vsub.f32 0.0, %v5112_v62  ;;  %v5119_v45 = vpop.f32.mrb[59].mxu1  ;;  %1366 = vmatmul.mubr.f32.gmra.mrb[164].mxu1 %v3933_v23  ;;  %3241 = vmatpush1.bf16.msra.mxu0 %v3240_v25  ;;  %v2404_v25 = vld [vmem:[#allocation8 + $0x1d0] sm:$0xff]  ;;  %v2405_v19 = vld [vmem:[#allocation8 + $0x1d8] sm:$0xff] }
 0x1f6   : > { %v3596_v4 = vpop.eup %3595  ;;  %v1935_v1 = vadd.f32 1.0, %v3594_v54  ;;  %3615 = vpow2.f32 %v1802_v3  ;;  %v2303_v35 = vmul.f32 %v2175_v39, %v5031_v38  ;;  %2575 = vmatmul.mubr.f32.gmra.mrb[104].mxu0 %v2298_v27  ;;  %v1567_v18 = vsub.f32 0.0, %v5119_v45  ;;  %1371 = vmatprep.mubr.f32.mxu1 %v4145_v0  ;;  %v5126_v49 = vpop.f32.mrb[54].mxu0 }
 0x1f7   : > { %v3598_v6 = vpop.eup %3597  ;;  %v2178_v20 = vmul.f32 %v3596_v4, %v4996_v16  ;;  %3617 = vrcp.f32 %v1934_v15  ;;  %v1810_v5 = vmul.f32 1.442695, %v1566_v59  ;;  %v5130_v27 = vpop.f32.mrb[55].mxu0  ;;  %3242 = vmatprep.subr.bf16.mxu0 %v4146_v40  ;;  %v3246_v10 = vpack.c.bf16 %v2405_v19, %v2404_v25 }
 0x1f8   : > { %v3600_v46 = vpop.eup %3599  ;;  %3619 = vrcp.f32 %v1935_v1  ;;  %v1938_v38 = vadd.f32 1.0, %v3598_v6  ;;  %v1812_v28 = vmul.f32 1.442695, %v1567_v18  ;;  %2579 = vmatprep.mubr.f32.mxu0 %v2303_v35  ;;  %v5128_v63 = vpop.f32.mrb[60].mxu1  ;;  %v3935_v1 = vld [vmem:[%s4380_s9 + $0xa0] sm:$0xff]  ;;  %v2407_v6 = vld [vmem:[#allocation8 + $0x1e8] sm:$0xff] }
 0x1f9   : > { %v3602_v30 = vpop.eup %3601  ;;  %v2179_v16 = vmul.f32 %v3600_v46, %v5003_v31  ;;  %3621 = vpow2.f32 %v1804_v48  ;;  %v2306_v29 = vmul.f32 %v2178_v20, %v5043_v61  ;;  %v1570_v51 = vsub.f32 0.0, %v5128_v63  ;;  %v5136_v57 = vpop.f32.mrb[61].mxu1  ;;  %1372 = vmatmul.mubr.f32.gmra.mrb[166].mxu1 %v3934_v53  ;;  %3244 = vmatpush1.bf16.msra.mxu0 %v3243_v58 }
 0x1fa   : > { %v3604_v32 = vpop.eup %3603  ;;  %v2182_v60 = vmul.f32 %v3602_v30, %v5013_v34  ;;  %3623 = vrcp.f32 %v1938_v38  ;;  %2580 = vmatmul.mubr.f32.gmra.mrb[106].mxu0 %v2302_v26  ;;  %v1571_v9 = vsub.f32 0.0, %v5136_v57  ;;  %1377 = vmatprep.mubr.f32.mxu1 %v4145_v0  ;;  %v5144_v3 = vpop.f32.mrb[56].mxu0  ;;  %v3249_v46 = vpack.c.bf16 %v2407_v6, %v2406_v11 }
 0x1fb   : > { %v3606_v12 = vpop.eup %3605  ;;  %v2183_v31 = vmul.f32 %v3604_v32, %v5019_v7  ;;  %3625 = vpow2.f32 %v1810_v5  ;;  %v2307_v61 = vmul.f32 %v2179_v16, %v5049_v52  ;;  %v1818_v55 = vmul.f32 1.442695, %v1570_v51  ;;  %v5149_v26 = vpop.f32.mrb[57].mxu0  ;;  %3245 = vmatprep.subr.bf16.mxu0 %v4146_v40 }
 0x1fc   : > { %v3608_v34 = vpop.eup %3607  ;;  %v1939_v39 = vadd.f32 1.0, %v3606_v12  ;;  %3627 = vpow2.f32 %v1812_v28  ;;  %v1820_v48 = vmul.f32 1.442695, %v1571_v9  ;;  %v2310_v54 = vmul.f32 %v2182_v60, %v5060_v36  ;;  %v5147_v15 = vpop.f32.mrb[62].mxu1  ;;  %v3936_v60 = vld [vmem:[%s4380_s9 + $0xa8] sm:$0xff] }
 0x1fd   : > { %v3610_v7 = vpop.eup %3609  ;;  %v1942_v52 = vadd.f32 1.0, %v3608_v34  ;;  %3629 = vpow2.f32 %v1818_v55  ;;  %2584 = vmatprep.mubr.f32.mxu0 %v2307_v61  ;;  %v2311_v59 = vmul.f32 %v2183_v31, %v5065_v24  ;;  %v1574_v23 = vsub.f32 0.0, %v5147_v15  ;;  %v5154_v4 = vpop.f32.mrb[63].mxu1  ;;  %1378 = vmatmul.mubr.f32.gmra.mrb[168].mxu1 %v3935_v1  ;;  %v2409_v31 = vld [vmem:[#allocation8 + $0x1f8] sm:$0xff] }
 0x1fe   : > { %v3612_v35 = vpop.eup %3611  ;;  %v2186_v36 = vmul.f32 %v3610_v7, %v5029_v22  ;;  %3631 = vrcp.f32 %v1939_v39  ;;  %2585 = vmatmul.mubr.f32.gmra.mrb[108].mxu0 %v2306_v29  ;;  %v1575_v18 = vsub.f32 0.0, %v5154_v4  ;;  %1383 = vmatprep.mubr.f32.mxu1 %v4145_v0  ;;  %v5161_v58 = vpop.f32.mrb[58].mxu0 }
 0x1ff   : > { %v3614_v20 = vpop.eup %3613  ;;  %v2187_v24 = vmul.f32 %v3612_v35, %v5036_v41  ;;  %3633 = vrcp.f32 %v1942_v52  ;;  %v1826_v5 = vmul.f32 1.442695, %v1574_v23  ;;  %2589 = vmatprep.mubr.f32.mxu0 %v2311_v59  ;;  %v5166_v29 = vpop.f32.mrb[59].mxu0  ;;  %3247 = vmatpush1.bf16.msra.mxu0 %v3246_v10  ;;  %v3937_v59 = vld [vmem:[%s4380_s9 + $0xb0] sm:$0xff] }
 0x200   : > { %v3616_v22 = vpop.eup %3615  ;;  %v1943_v38 = vadd.f32 1.0, %v3614_v20  ;;  %3635 = vpow2.f32 %v1820_v48  ;;  %v1828_v28 = vmul.f32 1.442695, %v1575_v18  ;;  %v2314_v30 = vmul.f32 %v2186_v36, %v5078_v21  ;;  %v5164_v16 = vpop.f32.mrb[64].mxu1  ;;  %3248 = vmatprep.subr.bf16.mxu0 %v4146_v40  ;;  %v2408_v21 = vld [vmem:[#allocation8 + $0x1f0] sm:$0xff] }
 0x201   : > { %v3618_v51 = vpop.eup %3617  ;;  %v1946_v41 = vadd.f32 1.0, %v3616_v22  ;;  %3637 = vpow2.f32 %v1826_v5  ;;  %v2315_v53 = vmul.f32 %v2187_v24, %v5082_v2  ;;  %v5169_v32 = vpop.f32.mrb[65].mxu1  ;;  %1384 = vmatmul.mubr.f32.gmra.mrb[170].mxu1 %v3936_v60  ;;  %v3252_v48 = vpack.c.bf16 %v2409_v31, %v2408_v21  ;;  %v3938_v24 = vld [vmem:[%s4380_s9 + $0xb8] sm:$0xff]  ;;  %v3939_v60 = vld [vmem:[%s4380_s9 + $0xc0] sm:$0xff] }
 0x202   : > { %v3620_v9 = vpop.eup %3619  ;;  %v2190_v12 = vmul.f32 %v3618_v51, %v5047_v14  ;;  %3639 = vrcp.f32 %v1943_v38  ;;  %2590 = vmatmul.mubr.f32.gmra.mrb[110].mxu0 %v2310_v54  ;;  %1389 = vmatprep.mubr.f32.mxu1 %v4145_v0  ;;  %v5176_v2 = vpop.f32.mrb[60].mxu0 }
 0x203   : > { %v3622_v61 = vpop.eup %3621  ;;  %v2191_v55 = vmul.f32 %v3620_v9, %v5053_v37  ;;  %3641 = vrcp.f32 %v1946_v41  ;;  %2594 = vmatprep.mubr.f32.mxu0 %v2315_v53  ;;  %v5181_v39 = vpop.f32.mrb[61].mxu0  ;;  %3250 = vmatpush1.bf16.msra.mxu0 %v3249_v46 }
 0x204   : > { %v3624_v25 = vpop.eup %3623  ;;  %v1947_v19 = vadd.f32 1.0, %v3622_v61  ;;  %3643 = vpow2.f32 %v1828_v28  ;;  %v2318_v34 = vmul.f32 %v2190_v12, %v5092_v17  ;;  %v5179_v14 = vpop.f32.mrb[66].mxu1  ;;  %3251 = vmatprep.subr.bf16.mxu0 %v4146_v40 }
 0x205   : > { %v3626_v54 = vpop.eup %3625  ;;  %v2194_v7 = vmul.f32 %v3624_v25, %v5063_v33  ;;  %v2319_v37 = vmul.f32 %v2191_v55, %v5097_v13  ;;  %v5185_v52 = vpop.f32.mrb[67].mxu1  ;;  %1390 = vmatmul.mubr.f32.gmra.mrb[172].mxu1 %v3937_v59  ;;  %v3941_v59 = vld [vmem:[%s4380_s9 + $0xd0] sm:$0xff] }
 0x206   : > { %v3628_v23 = vpop.eup %3627  ;;  %3645 = vrcp.f32 %v1947_v19  ;;  %v1950_v17 = vadd.f32 1.0, %v3626_v54  ;;  %2595 = vmatmul.mubr.f32.gmra.mrb[112].mxu0 %v2314_v30  ;;  %1395 = vmatprep.mubr.f32.mxu1 %v4145_v0  ;;  %v5191_v33 = vpop.f32.mrb[62].mxu0 }
 0x207   : > { %v3630_v1 = vpop.eup %3629  ;;  %v1951_v35 = vadd.f32 1.0, %v3628_v23  ;;  %v2322_v36 = vmul.f32 %v2194_v7, %v5109_v8  ;;  %2599 = vmatprep.mubr.f32.mxu0 %v2319_v37  ;;  %v5195_v40 = vpop.f32.mrb[63].mxu0  ;;  %3253 = vmatpush1.bf16.msra.mxu0 %v3252_v48 }
 0x208   : > { %v3632_v13 = vpop.eup %3631  ;;  %3647 = vrcp.f32 %v1950_v17  ;;  %v1954_v18 = vadd.f32 1.0, %v3630_v1  ;;  %v5193_v10 = vpop.f32.mrb[68].mxu1 }
 0x209   : > { %v3634_v11 = vpop.eup %3633  ;;  %v2195_v6 = vmul.f32 %v3632_v13, %v5070_v44  ;;  %3649 = vrcp.f32 %v1951_v35  ;;  %v5198_v20 = vpop.f32.mrb[69].mxu1  ;;  %1396 = vmatmul.mubr.f32.gmra.mrb[174].mxu1 %v3938_v24  ;;  %v3942_v35 = vld [vmem:[%s4380_s9 + $0xd8] sm:$0xff] }
 0x20a   : > { %v3636_v8 = vpop.eup %3635  ;;  %v2198_v5 = vmul.f32 %v3634_v11, %v5080_v47  ;;  %3651 = vrcp.f32 %v1954_v18  ;;  %2600 = vmatmul.mubr.f32.gmra.mrb[114].mxu0 %v2318_v34  ;;  %1401 = vmatprep.mubr.f32.mxu1 %v4145_v0  ;;  %v3943_v18 = vld [vmem:[%s4380_s9 + $0xe0] sm:$0xff] }
 0x20b   : > { %v3638_v46 = vpop.eup %3637  ;;  %v1955_v22 = vadd.f32 1.0, %v3636_v8  ;;  %v2323_v38 = vmul.f32 %v2195_v6, %v5114_v56  ;;  %v3945_v8 = vld [vmem:[%s4380_s9 + $0xf0] sm:$0xff] }
 0x20c   : > { %v3640_v28 = vpop.eup %3639  ;;  %v1958_v30 = vadd.f32 1.0, %v3638_v46  ;;  %v2326_v44 = vmul.f32 %v2198_v5, %v5126_v49  ;;  %v5205_v51 = vpop.f32.mrb[70].mxu1  ;;  %v3946_v46 = vld [vmem:[%s4380_s9 + $0xf8] sm:$0xff] }
 0x20d   : > { %v3642_v41 = vpop.eup %3641  ;;  %v2199_v53 = vmul.f32 %v3640_v28, %v5086_v43  ;;  %3653 = vrcp.f32 %v1955_v22  ;;  %2604 = vmatprep.mubr.f32.mxu0 %v2323_v38  ;;  %v5208_v47 = vpop.f32.mrb[71].mxu1  ;;  %1402 = vmatmul.mubr.f32.gmra.mrb[176].mxu1 %v3939_v60 }
 0x20e   : > { %v3644_v9 = vpop.eup %3643  ;;  %v2202_v12 = vmul.f32 %v3642_v41, %v5095_v42  ;;  %3655 = vrcp.f32 %v1958_v30  ;;  %2605 = vmatmul.mubr.f32.gmra.mrb[116].mxu0 %v2322_v36  ;;  %1407 = vmatprep.mubr.f32.mxu1 %v4145_v0  ;;  %v3940_v42 = vld [vmem:[%s4380_s9 + $0xc8] sm:$0xff] }
 0x20f   : > { %v1959_v56 = vadd.f32 1.0, %v3644_v9  ;;  %v2327_v49 = vmul.f32 %v2199_v53, %v5130_v27 }
 0x210   : > { %v3646_v21 = vpop.eup %3645  ;;  %v2330_v43 = vmul.f32 %v2202_v12, %v5144_v3  ;;  %v5215_v31 = vpop.f32.mrb[72].mxu1 }
 0x211   : > { %v2203_v61 = vmul.f32 %v3646_v21, %v5102_v50  ;;  %3657 = vrcp.f32 %v1959_v56  ;;  %2609 = vmatprep.mubr.f32.mxu0 %v2327_v49  ;;  %v5218_v55 = vpop.f32.mrb[73].mxu1  ;;  %1408 = vmatmul.mubr.f32.gmra.mrb[178].mxu1 %v3940_v42 }
 0x212   : > { %v3648_v25 = vpop.eup %3647  ;;  %2610 = vmatmul.mubr.f32.gmra.mrb[118].mxu0 %v2326_v44  ;;  %1413 = vmatprep.mubr.f32.mxu1 %v4145_v0 }
 0x213   : > { %v3650_v19 = vpop.eup %3649  ;;  %v2206_v27 = vmul.f32 %v3648_v25, %v5112_v62  ;;  %v2331_v3 = vmul.f32 %v2203_v61, %v5149_v26 }
 0x214   : > { %v3652_v34 = vpop.eup %3651  ;;  %v2207_v48 = vmul.f32 %v3650_v19, %v5119_v45  ;;  %v5225_v50 = vpop.f32.mrb[74].mxu1 }
 0x215   : > { %v2210_v54 = vmul.f32 %v3652_v34, %v5128_v63  ;;  %v2334_v7 = vmul.f32 %v2206_v27, %v5161_v58  ;;  %2614 = vmatprep.mubr.f32.mxu0 %v2331_v3  ;;  %v5229_v37 = vpop.f32.mrb[75].mxu1  ;;  %1414 = vmatmul.mubr.f32.gmra.mrb[180].mxu1 %v3941_v59 }
 0x216   : > { %v2335_v23 = vmul.f32 %v2207_v48, %v5166_v29  ;;  %2615 = vmatmul.mubr.f32.gmra.mrb[120].mxu0 %v2330_v43  ;;  %1419 = vmatprep.mubr.f32.mxu1 %v4145_v0  ;;  %v1452_v48 = vsub.f32 0.0, %v5164_v16 }
 0x217   : > { %v3654_v62 = vpop.eup %3653  ;;  %v2338_v45 = vmul.f32 %v2210_v54, %v5176_v2 }
 0x218   : > { %v3656_v26 = vpop.eup %3655  ;;  %v2211_v17 = vmul.f32 %v3654_v62, %v5136_v57  ;;  %2619 = vmatprep.mubr.f32.mxu0 %v2335_v23  ;;  %v5236_v63 = vpop.f32.mrb[76].mxu1  ;;  %v1582_v23 = vmul.f32 1.442695, %v1452_v48  ;;  %v1456_v62 = vsub.f32 0.0, %v5179_v14 }
 0x219   : > { %v2214_v58 = vmul.f32 %v3656_v26, %v5147_v15  ;;  %v5239_v1 = vpop.f32.mrb[77].mxu1  ;;  %1420 = vmatmul.mubr.f32.gmra.mrb[182].mxu1 %v3942_v35  ;;  %v1460_v35 = vsub.f32 0.0, %v5193_v10 }
 0x21a   : > { %v2339_v29 = vmul.f32 %v2211_v17, %v5181_v39  ;;  %2620 = vmatmul.mubr.f32.gmra.mrb[122].mxu0 %v2334_v7  ;;  %1425 = vmatprep.mubr.f32.mxu1 %v4145_v0  ;;  %v1453_v7 = vsub.f32 0.0, %v5169_v32  ;;  %v1457_v17 = vsub.f32 0.0, %v5185_v52  ;;  %3659 = vpow2.f32 %v1582_v23 }
 0x21b   : > { %v3658_v2 = vpop.eup %3657  ;;  %v2342_v36 = vmul.f32 %v2214_v58, %v5191_v33 }
 0x21c   : > { %v2215_v57 = vmul.f32 %v3658_v2, %v5154_v4  ;;  %2624 = vmatprep.mubr.f32.mxu0 %v2339_v29  ;;  %v5246_v13 = vpop.f32.mrb[78].mxu1  ;;  %v3944_v4 = vld [vmem:[%s4380_s9 + $0xe8] sm:$0xff]  ;;  %v1584_v26 = vmul.f32 1.442695, %v1453_v7  ;;  %v1590_v29 = vmul.f32 1.442695, %v1456_v62 }
 0x21d   : > { %v5248_v15 = vpop.f32.mrb[79].mxu1  ;;  %1426 = vmatmul.mubr.f32.gmra.mrb[184].mxu1 %v3943_v18  ;;  %v1461_v2 = vsub.f32 0.0, %v5198_v20  ;;  %v1468_v62 = vsub.f32 0.0, %v5215_v31 }
 0x21e   : > { %v2343_v11 = vmul.f32 %v2215_v57, %v5195_v40  ;;  %2625 = vmatmul.mubr.f32.gmra.mrb[124].mxu0 %v2338_v45  ;;  %1431 = vmatprep.mubr.f32.mxu1 %v4145_v0  ;;  %3661 = vpow2.f32 %v1584_v26  ;;  %v1592_v57 = vmul.f32 1.442695, %v1457_v17  ;;  %v1469_v17 = vsub.f32 0.0, %v5218_v55 }
 0x21f   : > { %3663 = vpow2.f32 %v1590_v29 }
 0x220   : > { %2629 = vmatprep.mubr.f32.mxu0 %v2343_v11  ;;  %v5253_v39 = vpop.f32.mrb[80].mxu1  ;;  %v1598_v11 = vmul.f32 1.442695, %v1460_v35  ;;  %3665 = vpow2.f32 %v1592_v57  ;;  %v1472_v57 = vsub.f32 0.0, %v5225_v50 }
 0x221   : > { %v5255_v33 = vpop.f32.mrb[81].mxu1  ;;  %1432 = vmatmul.mubr.f32.gmra.mrb[186].mxu1 %v3944_v4  ;;  %v1464_v4 = vsub.f32 0.0, %v5205_v51 }
 0x222   : > { %2630 = vmatmul.mubr.f32.gmra.mrb[126].mxu0 %v2342_v36  ;;  %1437 = vmatprep.mubr.f32.mxu1 %v4145_v0  ;;  %3667 = vpow2.f32 %v1598_v11  ;;  %v1473_v11 = vsub.f32 0.0, %v5229_v37 }
 0x223   : > { %v1606_v23 = vmul.f32 1.442695, %v1464_v4 }
 0x224   : > { %v5259_v6 = vpop.f32.mrb[82].mxu1  ;;  %v3660_v29 = vpop.eup %3659 }
 0x225   : > { %v5261_v24 = vpop.f32.mrb[83].mxu1  ;;  %1438 = vmatmul.mubr.f32.gmra.mrb[188].mxu1 %v3945_v8  ;;  %v1600_v8 = vmul.f32 1.442695, %v1461_v2 }
 0x226   : > { %1443 = vmatprep.mubr.f32.mxu1 %v4145_v0 }
 0x227   : > { %3669 = vpow2.f32 %v1600_v8  ;;  %v1836_v8 = vadd.f32 1.0, %v3660_v29 }
 0x228   : > { %v5265_v40 = vpop.f32.mrb[84].mxu1  ;;  %v3662_v2 = vpop.eup %3661  ;;  %3671 = vpow2.f32 %v1606_v23  ;;  %v1624_v23 = vmul.f32 1.442695, %v1473_v11 }
 0x229   : > { %5616 = vst [vmem:[#allocation15_spill] sm:$0xff] %v5265_v40  ;;  %v5267_v5 = vpop.f32.mrb[85].mxu1  ;;  %1444 = vmatmul.mubr.f32.gmra.mrb[190].mxu1 %v3946_v46  ;;  %v1465_v46 = vsub.f32 0.0, %v5208_v47 }
 0x22b   : > { %v1608_v26 = vmul.f32 1.442695, %v1465_v46 }
 0x22c   : > { %v5270_v22 = vpop.f32.mrb[86].mxu1 }
 0x22d   : > { %v5272_v38 = vpop.f32.mrb[87].mxu1  ;;  %3673 = vpow2.f32 %v1608_v26 }
 0x230   : > { %v5274_v28 = vpop.f32.mrb[88].mxu1 }
 0x231   : > { %v5276_v30 = vpop.f32.mrb[89].mxu1 }
 0x234   : > { %v5278_v44 = vpop.f32.mrb[90].mxu1 }
 0x235   : > { %v5280_v41 = vpop.f32.mrb[91].mxu1 }
 0x238   : > { %v5282_v53 = vpop.f32.mrb[92].mxu1 }
 0x239   : > { %v5284_v0 = vpop.f32.mrb[93].mxu1 }
 0x23c   : > { %v5286_v60 = vpop.f32.mrb[94].mxu1 }
 0x23d   : > { %v5288_v9 = vpop.f32.mrb[95].mxu1 }
 0x240   : > { %v5290_v12 = vpop.f32.mrb[96].mxu1 }
 0x241   : > { %v5292_v56 = vpop.f32.mrb[97].mxu1 }
 0x244   : > { %v5294_v49 = vpop.f32.mrb[98].mxu1 }
 0x245   : > { %v5296_v21 = vpop.f32.mrb[99].mxu1 }
 0x248   : > { %v5298_v43 = vpop.f32.mrb[100].mxu1 }
 0x249   : > { %v5300_v61 = vpop.f32.mrb[101].mxu1 }
 0x24c   : > { %v5302_v42 = vpop.f32.mrb[102].mxu1 }
 0x24d   : > { %v5304_v25 = vpop.f32.mrb[103].mxu1 }
 0x250   : > { %v5306_v19 = vpop.f32.mrb[104].mxu1 }
 0x251   : > { %5617 = vst [vmem:[#allocation16_spill] sm:$0xff] %v5306_v19  ;;  %v5308_v27 = vpop.f32.mrb[105].mxu1 }
 0x252   : > { %5618 = vst [vmem:[#allocation17_spill] sm:$0xff] %v5308_v27 }
 0x254   : > { %v5310_v3 = vpop.f32.mrb[106].mxu1 }
 0x255   : > { %5619 = vst [vmem:[#allocation18_spill] sm:$0xff] %v5310_v3  ;;  %v5312_v34 = vpop.f32.mrb[107].mxu1 }
 0x256   : > { %5620 = vst [vmem:[#allocation19_spill] sm:$0xff] %v5312_v34 }
 0x258   : > { %v5315_v54 = vpop.f32.mrb[108].mxu1 }
 0x259   : > { %5621 = vst [vmem:[#allocation20_spill] sm:$0xff] %v5315_v54  ;;  %v5318_v59 = vpop.f32.mrb[109].mxu1 }
 0x25a   : > { %5622 = vst [vmem:[#allocation21_spill] sm:$0xff] %v5318_v59 }
 0x25c   : > { %v5321_v45 = vpop.f32.mrb[110].mxu1 }
 0x25d   : > { %5623 = vst [vmem:[#allocation22_spill] sm:$0xff] %v5321_v45  ;;  %v5324_v58 = vpop.f32.mrb[111].mxu1 }
 0x25e   : > { %5624 = vst [vmem:[#allocation23_spill] sm:$0xff] %v5324_v58  ;;  %v1837_v58 = vadd.f32 1.0, %v3662_v2 }
 0x260   : > { %v5328_v36 = vpop.f32.mrb[112].mxu1 }
 0x261   : > { %5625 = vst [vmem:[#allocation24_spill] sm:$0xff] %v5328_v36  ;;  %v5330_v18 = vpop.f32.mrb[113].mxu1  ;;  %v1614_v36 = vmul.f32 1.442695, %v1468_v62  ;;  %v1476_v62 = vsub.f32 0.0, %v5236_v63 }
 0x262   : > { %5626 = vst [vmem:[#allocation25_spill] sm:$0xff] %v5330_v18 }
 0x263   : > { %3675 = vpow2.f32 %v1614_v36  ;;  %v1480_v36 = vsub.f32 0.0, %v5246_v13 }
 0x264   : > { %v5334_v48 = vpop.f32.mrb[114].mxu1 }
 0x265   : > { %5627 = vst [vmem:[#allocation26_spill] sm:$0xff] %v5334_v48  ;;  %v5336_v7 = vpop.f32.mrb[115].mxu1  ;;  %v3664_v48 = vpop.eup %3663 }
 0x266   : > { %5628 = vst [vmem:[#allocation27_spill] sm:$0xff] %v5336_v7  ;;  %v1616_v7 = vmul.f32 1.442695, %v1469_v17  ;;  %v1840_v26 = vadd.f32 1.0, %v3664_v48 }
 0x268   : > { %v5340_v35 = vpop.f32.mrb[116].mxu1  ;;  %3677 = vpow2.f32 %v1616_v7  ;;  %v1630_v7 = vmul.f32 1.442695, %v1476_v62 }
 0x269   : > { %5629 = vst [vmem:[#allocation28_spill] sm:$0xff] %v5340_v35  ;;  %v5342_v18 = vpop.f32.mrb[117].mxu1  ;;  %v3666_v35 = vpop.eup %3665  ;;  %3679 = vrcp.f32 %v1836_v8 }
 0x26a   : > { %5630 = vst [vmem:[#allocation29_spill] sm:$0xff] %v5342_v18  ;;  %v1622_v18 = vmul.f32 1.442695, %v1472_v57  ;;  %v3668_v45 = vpop.eup %3667  ;;  %3681 = vrcp.f32 %v1837_v58  ;;  %v1841_v29 = vadd.f32 1.0, %v3666_v35  ;;  %v1481_v58 = vsub.f32 0.0, %v5248_v15 }
 0x26b   : > { %v1844_v2 = vadd.f32 1.0, %v3668_v45  ;;  %v1638_v35 = vmul.f32 1.442695, %v1480_v36  ;;  %v1484_v45 = vsub.f32 0.0, %v5253_v39  ;;  %v1488_v36 = vsub.f32 0.0, %v5259_v6 }
 0x26c   : > { %v5346_v4 = vpop.f32.mrb[118].mxu1  ;;  %3683 = vpow2.f32 %v1622_v18 }
 0x26d   : > { %5631 = vst [vmem:[#allocation30_spill] sm:$0xff] %v5346_v4  ;;  %v5348_v46 = vpop.f32.mrb[119].mxu1  ;;  %v3670_v4 = vpop.eup %3669  ;;  %3685 = vpow2.f32 %v1624_v23 }
 0x26e   : > { %5632 = vst [vmem:[#allocation31_spill] sm:$0xff] %v5348_v46  ;;  %v1477_v46 = vsub.f32 0.0, %v5239_v1  ;;  %v3672_v11 = vpop.eup %3671  ;;  %3687 = vrcp.f32 %v1840_v26 }
 0x26f   : > { %v3674_v48 = vpop.eup %3673  ;;  %3689 = vrcp.f32 %v1841_v29  ;;  %v1848_v18 = vadd.f32 1.0, %v3672_v11 }
 0x270   : > { %v5351_v59 = vpop.f32.mrb[120].mxu1  ;;  %3691 = vrcp.f32 %v1844_v2  ;;  %v3676_v62 = vpop.eup %3675  ;;  %v1646_v2 = vmul.f32 1.442695, %v1484_v45  ;;  %v1654_v45 = vmul.f32 1.442695, %v1488_v36 }
 0x271   : > { %5633 = vst [vmem:[#allocation32_spill] sm:$0xff] %v5351_v59  ;;  %v5353_v17 = vpop.f32.mrb[121].mxu1  ;;  %v1845_v59 = vadd.f32 1.0, %v3670_v4  ;;  %3693 = vpow2.f32 %v1630_v7  ;;  %v1852_v7 = vadd.f32 1.0, %v3676_v62 }
 0x272   : > { %5634 = vst [vmem:[#allocation33_spill] sm:$0xff] %v5353_v17  ;;  %v1632_v17 = vmul.f32 1.442695, %v1477_v46  ;;  %v3678_v4 = vpop.eup %3677  ;;  %v1485_v46 = vsub.f32 0.0, %v5255_v33 }
 0x273   : > { %3695 = vrcp.f32 %v1845_v59  ;;  %v3680_v29 = vpop.eup %3679  ;;  %v1853_v59 = vadd.f32 1.0, %v3678_v4  ;;  %v1493_v4 = vsub.f32 0.0, %v5267_v5 }
 0x274   : > { %v5357_v57 = vpop.f32.mrb[122].mxu1  ;;  %3697 = vpow2.f32 %v1632_v17  ;;  %v3682_v54 = vpop.eup %3681  ;;  %v1648_v17 = vmul.f32 1.442695, %v1485_v46 }
 0x275   : > { %5635 = vst [vmem:[#allocation34_spill] sm:$0xff] %v5357_v57  ;;  %v5359_v8 = vpop.f32.mrb[123].mxu1  ;;  %v1849_v57 = vadd.f32 1.0, %v3674_v48  ;;  %3699 = vpow2.f32 %v1638_v35  ;;  %v2092_v35 = vmul.f32 %v3680_v29, %v5164_v16  ;;  %v1496_v29 = vsub.f32 0.0, %v5270_v22 }
 0x276   : > { %5636 = vst [vmem:[#allocation35_spill] sm:$0xff] %v5359_v8  ;;  %v1640_v8 = vmul.f32 1.442695, %v1481_v58  ;;  %3701 = vrcp.f32 %v1848_v18  ;;  %v1489_v58 = vsub.f32 0.0, %v5261_v24  ;;  %v1492_v18 = vsub.f32 0.0, %v5265_v40 }
 0x277   : > { %3703 = vrcp.f32 %v1849_v57 }
 0x278   : > { %v5363_v23 = vpop.f32.mrb[124].mxu1  ;;  %3705 = vpow2.f32 %v1640_v8  ;;  %v1656_v16 = vmul.f32 1.442695, %v1489_v58 }
 0x279   : > { %5637 = vst [vmem:[#allocation36_spill] sm:$0xff] %v5363_v23  ;;  %v5365_v26 = vpop.f32.mrb[125].mxu1  ;;  %v3684_v23 = vpop.eup %3683  ;;  %3707 = vpow2.f32 %v1646_v2 }
 0x27a   : > { %5638 = vst [vmem:[#allocation37_spill] sm:$0xff] %v5365_v26  ;;  %v3686_v26 = vpop.eup %3685  ;;  %3709 = vrcp.f32 %v1852_v7  ;;  %v1856_v57 = vadd.f32 1.0, %v3684_v23  ;;  %v1664_v7 = vmul.f32 1.442695, %v1493_v4 }
 0x27b   : > { %v3688_v34 = vpop.eup %3687  ;;  %3711 = vrcp.f32 %v1853_v59  ;;  %v1857_v8 = vadd.f32 1.0, %v3686_v26 }
 0x27c   : > { %v5369_v11 = vpop.f32.mrb[126].mxu1  ;;  %v3690_v62 = vpop.eup %3689  ;;  %3713 = vpow2.f32 %v1648_v17  ;;  %v2096_v40 = vmul.f32 %v3688_v34, %v5179_v14  ;;  %v1497_v17 = vsub.f32 0.0, %v5272_v38  ;;  %v1670_v14 = vmul.f32 1.442695, %v1496_v29 }
 0x27d   : > { %5639 = vst [vmem:[#allocation38_spill] sm:$0xff] %v5369_v11  ;;  %v5371_v48 = vpop.f32.mrb[127].mxu1  ;;  %v2093_v11 = vmul.f32 %v3682_v54, %v5169_v32  ;;  %v3692_v3 = vpop.eup %3691  ;;  %3715 = vpow2.f32 %v1654_v45  ;;  %v1662_v32 = vmul.f32 1.442695, %v1492_v18  ;;  %v2097_v23 = vmul.f32 %v3690_v62, %v5185_v52 }
 0x27e   : > { %5640 = vst [vmem:[#allocation39_spill] sm:$0xff] %v5371_v48  ;;  %v3694_v19 = vpop.eup %3693  ;;  %3717 = vrcp.f32 %v1856_v57  ;;  %v1500_v34 = vsub.f32 0.0, %v5274_v28  ;;  %v2100_v52 = vmul.f32 %v3692_v3, %v5193_v10  ;;  %v1504_v3 = vsub.f32 0.0, %v5278_v44 }
 0x27f   : > { %v3696_v36 = vpop.eup %3695  ;;  %3719 = vrcp.f32 %v1857_v8  ;;  %v1672_v8 = vmul.f32 1.442695, %v1497_v17 }
 0x280   : > { %v1259_v48 = vpop.f32.mrb[128].mxu1  ;;  %v3698_v54 = vpop.eup %3697  ;;  %3721 = vpow2.f32 %v1656_v16  ;;  %v2101_v57 = vmul.f32 %v3696_v36, %v5198_v20  ;;  %v1678_v10 = vmul.f32 1.442695, %v1500_v34 }
 0x281   : > { %v2220_v46 = vmul.f32 %v2092_v35, %v1259_v48  ;;  %v1261_v27 = vpop.f32.mrb[129].mxu1  ;;  %v3700_v26 = vpop.eup %3699  ;;  %v1860_v48 = vadd.f32 1.0, %v3694_v19  ;;  %v1861_v18 = vadd.f32 1.0, %v3698_v54  ;;  %3723 = vpow2.f32 %v1662_v32 }
 0x282   : > { %v2221_v2 = vmul.f32 %v2093_v11, %v1261_v27  ;;  %v3702_v27 = vpop.eup %3701  ;;  %v1864_v19 = vadd.f32 1.0, %v3700_v26  ;;  %3725 = vpow2.f32 %v1664_v7 }
 0x283   : > { %v3704_v45 = vpop.eup %3703  ;;  %3727 = vrcp.f32 %v1860_v48  ;;  %v2104_v20 = vmul.f32 %v3702_v27, %v5205_v51  ;;  %v1686_v51 = vmul.f32 1.442695, %v1504_v3  ;;  %v1508_v27 = vsub.f32 0.0, %v5282_v53 }
 0x284   : > { %v1265_v59 = vpop.f32.mrb[130].mxu1  ;;  %2699 = vmatprep.mubr.f32.mxu0 %v2221_v2  ;;  %v3706_v62 = vpop.eup %3705  ;;  %3729 = vpow2.f32 %v1670_v14  ;;  %v2105_v7 = vmul.f32 %v3704_v45, %v5208_v47 }
 0x285   : > { %v2224_v58 = vmul.f32 %v2096_v40, %v1265_v59  ;;  %v1267_v35 = vpop.f32.mrb[131].mxu1  ;;  %2700 = vmatmul.mubr.f32.vlgmr.msra.gmra.mrb[64].mxu0 %v2220_v46  ;;  %v3708_v40 = vpop.eup %3707  ;;  %v1501_v46 = vsub.f32 0.0, %v5276_v30  ;;  %3731 = vrcp.f32 %v1861_v18  ;;  %v1865_v36 = vadd.f32 1.0, %v3706_v62 }
 0x286   : > { %v2225_v11 = vmul.f32 %v2097_v23, %v1267_v35  ;;  %v3710_v2 = vpop.eup %3709  ;;  %3733 = vrcp.f32 %v1864_v19  ;;  %v1868_v59 = vadd.f32 1.0, %v3708_v40 }
 0x287   : > { %v3712_v54 = vpop.eup %3711  ;;  %3735 = vpow2.f32 %v1672_v8  ;;  %v1680_v17 = vmul.f32 1.442695, %v1501_v46  ;;  %v2108_v47 = vmul.f32 %v3710_v2, %v5215_v31  ;;  %v1509_v31 = vsub.f32 0.0, %v5284_v0 }
 0x288   : > { %v1271_v4 = vpop.f32.mrb[132].mxu1  ;;  %2704 = vmatprep.mubr.f32.mxu0 %v2225_v11  ;;  %v3714_v23 = vpop.eup %3713  ;;  %3737 = vpow2.f32 %v1678_v10  ;;  %v2109_v62 = vmul.f32 %v3712_v54, %v5218_v55 }
 0x289   : > { %v2228_v16 = vmul.f32 %v2100_v52, %v1271_v4  ;;  %v1273_v29 = vpop.f32.mrb[133].mxu1  ;;  %2705 = vmatmul.mubr.f32.gmra.mrb[66].mxu0 %v2224_v58  ;;  %v3716_v48 = vpop.eup %3715  ;;  %v1505_v58 = vsub.f32 0.0, %v5280_v41  ;;  %3739 = vrcp.f32 %v1865_v36  ;;  %v1869_v45 = vadd.f32 1.0, %v3714_v23 }
 0x28a   : > { %v2229_v32 = vmul.f32 %v2101_v57, %v1273_v29  ;;  %v3718_v34 = vpop.eup %3717  ;;  %3741 = vrcp.f32 %v1868_v59  ;;  %v1872_v57 = vadd.f32 1.0, %v3716_v48  ;;  %v1694_v29 = vmul.f32 1.442695, %v1508_v27 }
 0x28b   : > { %v3720_v52 = vpop.eup %3719  ;;  %3743 = vpow2.f32 %v1680_v17  ;;  %v1688_v40 = vmul.f32 1.442695, %v1505_v58  ;;  %v2112_v3 = vmul.f32 %v3718_v34, %v5225_v50  ;;  %v1512_v36 = vsub.f32 0.0, %v5286_v60 }
 0x28c   : > { %v1277_v26 = vpop.f32.mrb[134].mxu1  ;;  %2709 = vmatprep.mubr.f32.mxu0 %v2229_v32  ;;  %v3722_v18 = vpop.eup %3721  ;;  %3745 = vpow2.f32 %v1686_v51  ;;  %v2113_v54 = vmul.f32 %v3720_v52, %v5229_v37  ;;  %v1696_v58 = vmul.f32 1.442695, %v1509_v31  ;;  %v1516_v52 = vsub.f32 0.0, %v5290_v12 }
 0x28d   : > { %v2232_v35 = vmul.f32 %v2104_v20, %v1277_v26  ;;  %v1279_v14 = vpop.f32.mrb[135].mxu1  ;;  %2710 = vmatmul.mubr.f32.gmra.mrb[68].mxu0 %v2228_v16  ;;  %v3724_v4 = vpop.eup %3723  ;;  %3747 = vrcp.f32 %v1869_v45  ;;  %v1873_v55 = vadd.f32 1.0, %v3722_v18  ;;  %v1513_v26 = vsub.f32 0.0, %v5288_v9 }
 0x28e   : > { %v2233_v11 = vmul.f32 %v2105_v7, %v1279_v14  ;;  %v3726_v16 = vpop.eup %3725  ;;  %3749 = vrcp.f32 %v1872_v57  ;;  %v1876_v20 = vadd.f32 1.0, %v3724_v4  ;;  %v1710_v31 = vmul.f32 1.442695, %v1516_v52 }
 0x28f   : > { %v3728_v10 = vpop.eup %3727  ;;  %v1877_v59 = vadd.f32 1.0, %v3726_v16  ;;  %3751 = vpow2.f32 %v1688_v40  ;;  %v1704_v18 = vmul.f32 1.442695, %v1513_v26 }
 0x290   : > { %v1283_v19 = vpop.f32.mrb[136].mxu1  ;;  %2714 = vmatprep.mubr.f32.mxu0 %v2233_v11  ;;  %v3730_v32 = vpop.eup %3729  ;;  %3753 = vpow2.f32 %v1694_v29  ;;  %v2116_v37 = vmul.f32 %v3728_v10, %v5236_v63  ;;  %v1702_v11 = vmul.f32 1.442695, %v1512_v36 }
 0x291   : > { %v2236_v8 = vmul.f32 %v2108_v47, %v1283_v19  ;;  %v1285_v46 = vpop.f32.mrb[137].mxu1  ;;  %2715 = vmatmul.mubr.f32.gmra.mrb[70].mxu0 %v2232_v35  ;;  %v3732_v7 = vpop.eup %3731  ;;  %3755 = vrcp.f32 %v1873_v55  ;;  %v1880_v34 = vadd.f32 1.0, %v3730_v32  ;;  %v1521_v32 = vsub.f32 0.0, %v5296_v21 }
 0x292   : > { %v2237_v2 = vmul.f32 %v2109_v62, %v1285_v46  ;;  %v3734_v50 = vpop.eup %3733  ;;  %v2117_v27 = vmul.f32 %v3732_v7, %v5239_v1  ;;  %3757 = vrcp.f32 %v1876_v20  ;;  %v1517_v62 = vsub.f32 0.0, %v5292_v56 }
 0x293   : > { %v3736_v14 = vpop.eup %3735  ;;  %3759 = vrcp.f32 %v1877_v59  ;;  %v2120_v1 = vmul.f32 %v3734_v50, %v5246_v13  ;;  %v1524_v50 = vsub.f32 0.0, %v5298_v43 }
 0x294   : > { %v1289_v23 = vpop.f32.mrb[138].mxu1  ;;  %2719 = vmatprep.mubr.f32.mxu0 %v2237_v2  ;;  %v3738_v51 = vpop.eup %3737  ;;  %v1881_v4 = vadd.f32 1.0, %v3736_v14  ;;  %3761 = vpow2.f32 %v1696_v58  ;;  %v1520_v2 = vsub.f32 0.0, %v5294_v49  ;;  %v1712_v55 = vmul.f32 1.442695, %v1517_v62 }
 0x295   : > { %v2240_v48 = vmul.f32 %v2112_v3, %v1289_v23  ;;  %v1291_v17 = vpop.f32.mrb[139].mxu1  ;;  %2720 = vmatmul.mubr.f32.gmra.mrb[72].mxu0 %v2236_v8  ;;  %v3740_v45 = vpop.eup %3739  ;;  %3763 = vrcp.f32 %v1880_v34  ;;  %v1884_v46 = vadd.f32 1.0, %v3738_v51  ;;  %v1720_v14 = vmul.f32 1.442695, %v1521_v32 }
 0x296   : > { %v2241_v35 = vmul.f32 %v2113_v54, %v1291_v17  ;;  %v3742_v63 = vpop.eup %3741  ;;  %v2121_v29 = vmul.f32 %v3740_v45, %v5248_v15  ;;  %3765 = vpow2.f32 %v1702_v11  ;;  %v1718_v17 = vmul.f32 1.442695, %v1520_v2 }
 0x297   : > { %v3744_v8 = vpop.eup %3743  ;;  %3767 = vpow2.f32 %v1704_v18  ;;  %v2124_v15 = vmul.f32 %v3742_v63, %v5253_v39  ;;  %v1528_v11 = vsub.f32 0.0, %v5302_v42 }
 0x298   : > { %v1295_v47 = vpop.f32.mrb[140].mxu1  ;;  %2724 = vmatprep.mubr.f32.mxu0 %v2241_v35  ;;  %v3746_v16 = vpop.eup %3745  ;;  %3769 = vrcp.f32 %v1881_v4  ;;  %v1885_v36 = vadd.f32 1.0, %v3744_v8 }
 0x299   : > { %v2244_v57 = vmul.f32 %v2116_v37, %v1295_v47  ;;  %v1297_v19 = vpop.f32.mrb[141].mxu1  ;;  %2725 = vmatmul.mubr.f32.gmra.mrb[74].mxu0 %v2240_v48  ;;  %v3748_v3 = vpop.eup %3747  ;;  %3771 = vrcp.f32 %v1884_v46  ;;  %v1888_v59 = vadd.f32 1.0, %v3746_v16  ;;  %v1525_v37 = vsub.f32 0.0, %v5300_v61 }
 0x29a   : > { %v2245_v40 = vmul.f32 %v2117_v27, %v1297_v19  ;;  %v3750_v13 = vpop.eup %3749  ;;  %v2125_v48 = vmul.f32 %v3748_v3, %v5255_v33  ;;  %3773 = vpow2.f32 %v1710_v31  ;;  %v1529_v19 = vsub.f32 0.0, %v5304_v25  ;;  %v5641_v31 = vld [vmem:[#allocation15_spill] sm:$0xff] }
 0x29b   : > { %v3752_v7 = vpop.eup %3751  ;;  %3775 = vpow2.f32 %v1712_v55  ;;  %v2128_v47 = vmul.f32 %v3750_v13, %v5259_v6  ;;  %v1734_v6 = vmul.f32 1.442695, %v1528_v11 }
 0x29c   : > { %v1301_v10 = vpop.f32.mrb[142].mxu1  ;;  %2729 = vmatprep.mubr.f32.mxu0 %v2245_v40  ;;  %v3754_v26 = vpop.eup %3753  ;;  %3777 = vrcp.f32 %v1885_v36  ;;  %v1889_v27 = vadd.f32 1.0, %v3752_v7  ;;  %v1728_v40 = vmul.f32 1.442695, %v1525_v37 }
 0x29d   : > { %v2248_v54 = vmul.f32 %v2120_v1, %v1301_v10  ;;  %v1303_v20 = vpop.f32.mrb[143].mxu1  ;;  %2730 = vmatmul.mubr.f32.gmra.mrb[76].mxu0 %v2244_v57  ;;  %v3756_v35 = vpop.eup %3755  ;;  %3779 = vrcp.f32 %v1888_v59  ;;  %v1892_v45 = vadd.f32 1.0, %v3754_v26  ;;  %v1726_v57 = vmul.f32 1.442695, %v1524_v50  ;;  %v5642_v10 = vld [vmem:[#allocation16_spill] sm:$0xff] }
 0x29e   : > { %v2249_v23 = vmul.f32 %v2121_v29, %v1303_v20  ;;  %v3758_v39 = vpop.eup %3757  ;;  %v2129_v62 = vmul.f32 %v3756_v35, %v5261_v24  ;;  %3781 = vpow2.f32 %v1718_v17  ;;  %v1532_v3 = vsub.f32 0.0, %v5642_v10  ;;  %v5643_v20 = vld [vmem:[#allocation17_spill] sm:$0xff]  ;;  %v5644_v35 = vld [vmem:[#allocation18_spill] sm:$0xff] }
 0x29f   : > { %v3760_v52 = vpop.eup %3759  ;;  %3783 = vpow2.f32 %v1720_v14  ;;  %v2132_v2 = vmul.f32 %v3758_v39, %v5641_v31  ;;  %v1533_v13 = vsub.f32 0.0, %v5643_v20  ;;  %v1536_v14 = vsub.f32 0.0, %v5644_v35  ;;  %v5645_v39 = vld [vmem:[#allocation19_spill] sm:$0xff] }
 0x2a0   : > { %v1307_v58 = vpop.f32.mrb[144].mxu1  ;;  %2734 = vmatprep.mubr.f32.mxu0 %v2249_v23  ;;  %v3762_v18 = vpop.eup %3761  ;;  %3785 = vrcp.f32 %v1889_v27  ;;  %v2133_v32 = vmul.f32 %v3760_v52, %v5267_v5  ;;  %v1742_v5 = vmul.f32 1.442695, %v1532_v3  ;;  %v1537_v27 = vsub.f32 0.0, %v5645_v39 }
 0x2a1   : > { %v2252_v34 = vmul.f32 %v2124_v15, %v1307_v58  ;;  %v1309_v51 = vpop.f32.mrb[145].mxu1  ;;  %2735 = vmatmul.mubr.f32.gmra.mrb[78].mxu0 %v2248_v54  ;;  %v3764_v4 = vpop.eup %3763  ;;  %3787 = vrcp.f32 %v1892_v45  ;;  %v1893_v24 = vadd.f32 1.0, %v3762_v18  ;;  %v1736_v54 = vmul.f32 1.442695, %v1529_v19 }
 0x2a2   : > { %v2253_v33 = vmul.f32 %v2125_v48, %v1309_v51  ;;  %v3766_v46 = vpop.eup %3765  ;;  %3789 = vpow2.f32 %v1726_v57  ;;  %v2136_v58 = vmul.f32 %v3764_v4, %v5270_v22  ;;  %v1744_v51 = vmul.f32 1.442695, %v1533_v13 }
 0x2a3   : > { %v3768_v29 = vpop.eup %3767  ;;  %v1896_v7 = vadd.f32 1.0, %v3766_v46  ;;  %3791 = vpow2.f32 %v1728_v40  ;;  %v5647_v46 = vld [vmem:[#allocation21_spill] sm:$0xff] }
 0x2a4   : > { %v1313_v63 = vpop.f32.mrb[146].mxu1  ;;  %2739 = vmatprep.mubr.f32.mxu0 %v2253_v33  ;;  %v3770_v55 = vpop.eup %3769  ;;  %v1897_v48 = vadd.f32 1.0, %v3768_v29  ;;  %3793 = vpow2.f32 %v1734_v6  ;;  %v1541_v6 = vsub.f32 0.0, %v5647_v46 }
 0x2a5   : > { %v2256_v8 = vmul.f32 %v2128_v47, %v1313_v63  ;;  %v1315_v1 = vpop.f32.mrb[147].mxu1  ;;  %2740 = vmatmul.mubr.f32.gmra.mrb[80].mxu0 %v2252_v34  ;;  %v3772_v23 = vpop.eup %3771  ;;  %3795 = vrcp.f32 %v1893_v24  ;;  %v2137_v34 = vmul.f32 %v3770_v55, %v5272_v38  ;;  %v1750_v38 = vmul.f32 1.442695, %v1536_v14  ;;  %v5646_v63 = vld [vmem:[#allocation20_spill] sm:$0xff] }
 0x2a6   : > { %v2257_v16 = vmul.f32 %v2129_v62, %v1315_v1  ;;  %v3774_v26 = vpop.eup %3773  ;;  %3797 = vpow2.f32 %v1736_v54  ;;  %v2140_v19 = vmul.f32 %v3772_v23, %v5274_v28  ;;  %v1540_v4 = vsub.f32 0.0, %v5646_v63 }
 0x2a7   : > { %v3776_v50 = vpop.eup %3775  ;;  %3799 = vrcp.f32 %v1896_v7  ;;  %v1900_v52 = vadd.f32 1.0, %v3774_v26  ;;  %v1752_v1 = vmul.f32 1.442695, %v1537_v27  ;;  %v1760_v23 = vmul.f32 1.442695, %v1541_v6  ;;  %v5648_v7 = vld [vmem:[#allocation22_spill] sm:$0xff] }
 0x2a8   : > { %v1319_v36 = vpop.f32.mrb[148].mxu1  ;;  %2744 = vmatprep.mubr.f32.mxu0 %v2257_v16  ;;  %v3778_v37 = vpop.eup %3777  ;;  %3801 = vrcp.f32 %v1897_v48  ;;  %v1901_v18 = vadd.f32 1.0, %v3776_v50  ;;  %v5650_v27 = vld [vmem:[#allocation24_spill] sm:$0xff]  ;;  %v5652_v6 = vld [vmem:[#allocation26_spill] sm:$0xff] }
 0x2a9   : > { %v2260_v15 = vmul.f32 %v2132_v2, %v1319_v36  ;;  %v1321_v59 = vpop.f32.mrb[149].mxu1  ;;  %2745 = vmatmul.mubr.f32.gmra.mrb[82].mxu0 %v2256_v8  ;;  %v3780_v33 = vpop.eup %3779  ;;  %3803 = vpow2.f32 %v1742_v5  ;;  %v2141_v8 = vmul.f32 %v3778_v37, %v5276_v30  ;;  %v1758_v30 = vmul.f32 1.442695, %v1540_v4  ;;  %v5649_v5 = vld [vmem:[#allocation23_spill] sm:$0xff] }
 0x2aa   : > { %v2261_v17 = vmul.f32 %v2133_v32, %v1321_v59  ;;  %v3782_v22 = vpop.eup %3781  ;;  %3805 = vpow2.f32 %v1744_v51  ;;  %v2144_v54 = vmul.f32 %v3780_v33, %v5278_v44  ;;  %v1545_v14 = vsub.f32 0.0, %v5649_v5 }
 0x2ab   : > { %v3784_v57 = vpop.eup %3783  ;;  %3807 = vrcp.f32 %v1900_v52  ;;  %v1904_v31 = vadd.f32 1.0, %v3782_v22 }
 0x2ac   : > { %v1325_v11 = vpop.f32.mrb[150].mxu1  ;;  %2749 = vmatprep.mubr.f32.mxu0 %v2261_v17  ;;  %v3786_v40 = vpop.eup %3785  ;;  %3809 = vrcp.f32 %v1901_v18  ;;  %v1905_v3 = vadd.f32 1.0, %v3784_v57 }
 0x2ad   : > { %v2264_v47 = vmul.f32 %v2136_v58, %v1325_v11  ;;  %v1327_v45 = vpop.f32.mrb[151].mxu1  ;;  %2750 = vmatmul.mubr.f32.gmra.mrb[84].mxu0 %v2260_v15  ;;  %v3788_v29 = vpop.eup %3787  ;;  %3811 = vpow2.f32 %v1750_v38  ;;  %v2145_v36 = vmul.f32 %v3786_v40, %v5280_v41  ;;  %v1544_v15 = vsub.f32 0.0, %v5648_v7  ;;  %v5651_v38 = vld [vmem:[#allocation25_spill] sm:$0xff] }
 0x2ae   : > { %v2265_v62 = vmul.f32 %v2137_v34, %v1327_v45  ;;  %v3790_v28 = vpop.eup %3789  ;;  %3813 = vpow2.f32 %v1752_v1  ;;  %v2148_v41 = vmul.f32 %v3788_v29, %v5282_v53  ;;  %v1548_v11 = vsub.f32 0.0, %v5650_v27 }
 0x2af   : > { %v3792_v32 = vpop.eup %3791  ;;  %3815 = vrcp.f32 %v1904_v31  ;;  %v1908_v48 = vadd.f32 1.0, %v3790_v28  ;;  %v1768_v53 = vmul.f32 1.442695, %v1545_v14  ;;  %v1549_v4 = vsub.f32 0.0, %v5651_v38 }
 0x2b0   : > { %v1331_v16 = vpop.f32.mrb[152].mxu1  ;;  %2754 = vmatprep.mubr.f32.mxu0 %v2265_v62  ;;  %v3794_v13 = vpop.eup %3793  ;;  %3817 = vrcp.f32 %v1905_v3  ;;  %v1909_v44 = vadd.f32 1.0, %v3792_v32 }
 0x2b1   : > { %v2268_v2 = vmul.f32 %v2140_v19, %v1331_v16  ;;  %v1333_v24 = vpop.f32.mrb[153].mxu1  ;;  %2755 = vmatmul.mubr.f32.gmra.mrb[86].mxu0 %v2264_v47  ;;  %v3796_v26 = vpop.eup %3795  ;;  %v1912_v51 = vadd.f32 1.0, %v3794_v13  ;;  %3819 = vpow2.f32 %v1758_v30  ;;  %v1766_v47 = vmul.f32 1.442695, %v1544_v15  ;;  %v5653_v30 = vld [vmem:[#allocation27_spill] sm:$0xff] }
 0x2b2   : > { %v2269_v55 = vmul.f32 %v2141_v8, %v1333_v24  ;;  %v3798_v58 = vpop.eup %3797  ;;  %v2149_v52 = vmul.f32 %v3796_v26, %v5284_v0  ;;  %3821 = vpow2.f32 %v1760_v23  ;;  %v1774_v0 = vmul.f32 1.442695, %v1548_v11 }
 0x2b3   : > { %v3800_v34 = vpop.eup %3799  ;;  %3823 = vrcp.f32 %v1908_v48  ;;  %v1913_v18 = vadd.f32 1.0, %v3798_v58  ;;  %v1552_v16 = vsub.f32 0.0, %v5652_v6  ;;  %v1553_v13 = vsub.f32 0.0, %v5653_v30 }
 0x2b4   : > { %v1337_v59 = vpop.f32.mrb[154].mxu1  ;;  %2759 = vmatprep.mubr.f32.mxu0 %v2269_v55  ;;  %v3802_v33 = vpop.eup %3801  ;;  %3825 = vrcp.f32 %v1909_v44  ;;  %v2152_v1 = vmul.f32 %v3800_v34, %v5286_v60  ;;  %v1776_v60 = vmul.f32 1.442695, %v1549_v4 }
 0x2b5   : > { %v2272_v17 = vmul.f32 %v2144_v54, %v1337_v59  ;;  %v1339_v50 = vpop.f32.mrb[155].mxu1  ;;  %2760 = vmatmul.mubr.f32.gmra.mrb[88].mxu0 %v2268_v2  ;;  %v3804_v22 = vpop.eup %3803  ;;  %3827 = vrcp.f32 %v1912_v51  ;;  %v2153_v31 = vmul.f32 %v3802_v33, %v5288_v9  ;;  %v1782_v9 = vmul.f32 1.442695, %v1552_v16  ;;  %v5654_v59 = vld [vmem:[#allocation28_spill] sm:$0xff]  ;;  %v5655_v51 = vld [vmem:[#allocation29_spill] sm:$0xff] }
 0x2b6   : > { %v2273_v37 = vmul.f32 %v2145_v36, %v1339_v50  ;;  %v3806_v19 = vpop.eup %3805  ;;  %v1916_v2 = vadd.f32 1.0, %v3804_v22  ;;  %3829 = vpow2.f32 %v1766_v47  ;;  %v1556_v26 = vsub.f32 0.0, %v5654_v59 }
 0x2b7   : > { %v3808_v8 = vpop.eup %3807  ;;  %3831 = vrcp.f32 %v1913_v18  ;;  %v1917_v3 = vadd.f32 1.0, %v3806_v19  ;;  %v1557_v11 = vsub.f32 0.0, %v5655_v51 }
 0x2b8   : > { %v1343_v45 = vpop.f32.mrb[156].mxu1  ;;  %2764 = vmatprep.mubr.f32.mxu0 %v2273_v37  ;;  %v3810_v29 = vpop.eup %3809  ;;  %3833 = vpow2.f32 %v1768_v53  ;;  %v2156_v15 = vmul.f32 %v3808_v8, %v5290_v12  ;;  %v1784_v12 = vmul.f32 1.442695, %v1553_v13 }
 0x2b9   : > { %v2276_v62 = vmul.f32 %v2148_v41, %v1343_v45  ;;  %v1345_v57 = vpop.f32.mrb[157].mxu1  ;;  %2765 = vmatmul.mubr.f32.gmra.mrb[90].mxu0 %v2272_v17  ;;  %v3812_v28 = vpop.eup %3811  ;;  %3835 = vpow2.f32 %v1774_v0  ;;  %v2157_v17 = vmul.f32 %v3810_v29, %v5292_v56  ;;  %v1790_v56 = vmul.f32 1.442695, %v1556_v26  ;;  %v5656_v45 = vld [vmem:[#allocation30_spill] sm:$0xff]  ;;  %v5657_v0 = vld [vmem:[#allocation31_spill] sm:$0xff] }
 0x2ba   : > { %v2277_v40 = vmul.f32 %v2149_v52, %v1345_v57  ;;  %v3814_v54 = vpop.eup %3813  ;;  %3837 = vrcp.f32 %v1916_v2  ;;  %v1920_v50 = vadd.f32 1.0, %v3812_v28  ;;  %v1560_v22 = vsub.f32 0.0, %v5656_v45 }
 0x2bb   : > { %v3816_v23 = vpop.eup %3815  ;;  %3839 = vrcp.f32 %v1917_v3  ;;  %v1921_v14 = vadd.f32 1.0, %v3814_v54  ;;  %v1561_v16 = vsub.f32 0.0, %v5657_v0  ;;  %v5658_v54 = vld [vmem:[#allocation32_spill] sm:$0xff] }
 0x2bc   : > { %v1349_v24 = vpop.f32.mrb[158].mxu1  ;;  %2769 = vmatprep.mubr.f32.mxu0 %v2277_v40  ;;  %v3818_v48 = vpop.eup %3817  ;;  %3841 = vpow2.f32 %v1776_v60  ;;  %v2160_v47 = vmul.f32 %v3816_v23, %v5294_v49  ;;  %v1792_v49 = vmul.f32 1.442695, %v1557_v11  ;;  %v1564_v60 = vsub.f32 0.0, %v5658_v54 }
 0x2bd   : > { %v2280_v55 = vmul.f32 %v2152_v1, %v1349_v24  ;;  %v1351_v32 = vpop.f32.mrb[159].mxu1  ;;  %2770 = vmatmul.mubr.f32.gmra.mrb[92].mxu0 %v2276_v62  ;;  %v3820_v44 = vpop.eup %3819  ;;  %3843 = vpow2.f32 %v1782_v9  ;;  %v2161_v62 = vmul.f32 %v3818_v48, %v5296_v21  ;;  %v1798_v21 = vmul.f32 1.442695, %v1560_v22 }
 0x2be   : > { %v2281_v36 = vmul.f32 %v2153_v31, %v1351_v32  ;;  %v3822_v41 = vpop.eup %3821  ;;  %3845 = vrcp.f32 %v1920_v50  ;;  %v1924_v57 = vadd.f32 1.0, %v3820_v44 }
 0x2bf   : > { %v3824_v52 = vpop.eup %3823  ;;  %3847 = vrcp.f32 %v1921_v14  ;;  %v1925_v4 = vadd.f32 1.0, %v3822_v41  ;;  %v5660_v41 = vld [vmem:[#allocation34_spill] sm:$0xff] }
 0x2c0   : > { %v1355_v58 = vpop.f32.mrb[160].mxu1  ;;  %2774 = vmatprep.mubr.f32.mxu0 %v2281_v36  ;;  %v3826_v18 = vpop.eup %3825  ;;  %3849 = vpow2.f32 %v1784_v12  ;;  %v2164_v2 = vmul.f32 %v3824_v52, %v5298_v43  ;;  %v5659_v43 = vld [vmem:[#allocation33_spill] sm:$0xff]  ;;  %v1568_v12 = vsub.f32 0.0, %v5660_v41 }
 0x2c1   : > { %v2284_v37 = vmul.f32 %v2156_v15, %v1355_v58  ;;  %v1357_v34 = vpop.f32.mrb[161].mxu1  ;;  %2775 = vmatmul.mubr.f32.gmra.mrb[94].mxu0 %v2280_v55  ;;  %v3828_v53 = vpop.eup %3827  ;;  %3851 = vpow2.f32 %v1790_v56  ;;  %v2165_v28 = vmul.f32 %v3826_v18, %v5300_v61  ;;  %v1800_v15 = vmul.f32 1.442695, %v1561_v16 }
 0x2c2   : > { %v2285_v33 = vmul.f32 %v2157_v17, %v1357_v34  ;;  %v3830_v1 = vpop.eup %3829  ;;  %3853 = vrcp.f32 %v1924_v57  ;;  %v1565_v9 = vsub.f32 0.0, %v5659_v43  ;;  %v2168_v61 = vmul.f32 %v3828_v53, %v5302_v42  ;;  %v5661_v42 = vld [vmem:[#allocation35_spill] sm:$0xff] }
 0x2c3   : > { %v3832_v31 = vpop.eup %3831  ;;  %3855 = vrcp.f32 %v1925_v4  ;;  %v1928_v32 = vadd.f32 1.0, %v3830_v1  ;;  %v1806_v34 = vmul.f32 1.442695, %v1564_v60  ;;  %v1569_v56 = vsub.f32 0.0, %v5661_v42  ;;  %v5662_v1 = vld [vmem:[#allocation36_spill] sm:$0xff] }
 0x2c4   : > { %v1361_v19 = vpop.f32.mrb[162].mxu1  ;;  %2779 = vmatprep.mubr.f32.mxu0 %v2285_v33  ;;  %v3834_v24 = vpop.eup %3833  ;;  %3857 = vpow2.f32 %v1792_v49  ;;  %v2169_v58 = vmul.f32 %v3832_v31, %v5304_v25  ;;  %v1572_v49 = vsub.f32 0.0, %v5662_v1 }
 0x2c5   : > { %v2288_v40 = vmul.f32 %v2160_v47, %v1361_v19  ;;  %v1363_v8 = vpop.f32.mrb[163].mxu1  ;;  %2780 = vmatmul.mubr.f32.gmra.mrb[96].mxu0 %v2284_v37  ;;  %v3836_v55 = vpop.eup %3835  ;;  %v1929_v17 = vadd.f32 1.0, %v3834_v24  ;;  %3859 = vpow2.f32 %v1798_v21  ;;  %v1808_v47 = vmul.f32 1.442695, %v1565_v9 }
 0x2c6   : > { %v2289_v29 = vmul.f32 %v2161_v62, %v1363_v8  ;;  %v3838_v23 = vpop.eup %3837  ;;  %v1932_v44 = vadd.f32 1.0, %v3836_v55  ;;  %3861 = vrcp.f32 %v1928_v32  ;;  %v1814_v8 = vmul.f32 1.442695, %v1568_v12 }
 0x2c7   : > { %v3840_v48 = vpop.eup %3839  ;;  %3863 = vpow2.f32 %v1800_v15  ;;  %v2172_v25 = vmul.f32 %v3838_v23, %v5642_v10  ;;  %v1816_v10 = vmul.f32 1.442695, %v1569_v56  ;;  %v1822_v23 = vmul.f32 1.442695, %v1572_v49  ;;  %v5664_v15 = vld [vmem:[#allocation38_spill] sm:$0xff] }
 0x2c8   : > { %v1367_v3 = vpop.f32.mrb[164].mxu1  ;;  %2784 = vmatprep.mubr.f32.mxu0 %v2289_v29  ;;  %v3842_v50 = vpop.eup %3841  ;;  %3865 = vrcp.f32 %v1929_v17  ;;  %v2173_v19 = vmul.f32 %v3840_v48, %v5643_v20  ;;  %v1576_v9 = vsub.f32 0.0, %v5664_v15 }
 0x2c9   : > { %v2292_v13 = vmul.f32 %v2164_v2, %v1367_v3  ;;  %v1369_v36 = vpop.f32.mrb[165].mxu1  ;;  %2785 = vmatmul.mubr.f32.gmra.mrb[98].mxu0 %v2288_v40  ;;  %v3844_v37 = vpop.eup %3843  ;;  %v1933_v62 = vadd.f32 1.0, %v3842_v50  ;;  %3867 = vrcp.f32 %v1932_v44  ;;  %v5663_v2 = vld [vmem:[#allocation37_spill] sm:$0xff] }
 0x2ca   : > { %v2293_v26 = vmul.f32 %v2165_v28, %v1369_v36  ;;  %v3846_v52 = vpop.eup %3845  ;;  %v1936_v53 = vadd.f32 1.0, %v3844_v37  ;;  %3869 = vpow2.f32 %v1806_v34  ;;  %v1573_v21 = vsub.f32 0.0, %v5663_v2 }
 0x2cb   : > { %v3848_v18 = vpop.eup %3847  ;;  %3871 = vpow2.f32 %v1808_v47  ;;  %v2176_v20 = vmul.f32 %v3846_v52, %v5644_v35  ;;  %v5665_v35 = vld [vmem:[#allocation39_spill] sm:$0xff] }
 0x2cc   : > { %v1373_v14 = vpop.f32.mrb[166].mxu1  ;;  %2789 = vmatprep.mubr.f32.mxu0 %v2293_v26  ;;  %v3850_v57 = vpop.eup %3849  ;;  %3873 = vrcp.f32 %v1933_v62  ;;  %v2177_v32 = vmul.f32 %v3848_v18, %v5645_v39  ;;  %v1577_v17 = vsub.f32 0.0, %v5665_v35 }
 0x2cd   : > { %v2296_v11 = vmul.f32 %v2168_v61, %v1373_v14  ;;  %v1375_v33 = vpop.f32.mrb[167].mxu1  ;;  %2790 = vmatmul.mubr.f32.gmra.mrb[100].mxu0 %v2292_v13  ;;  %v3852_v40 = vpop.eup %3851  ;;  %v1937_v3 = vadd.f32 1.0, %v3850_v57  ;;  %3875 = vrcp.f32 %v1936_v53  ;;  %v1824_v61 = vmul.f32 1.442695, %v1573_v21 }
 0x2ce   : > { %v2297_v22 = vmul.f32 %v2169_v58, %v1375_v33  ;;  %v3854_v31 = vpop.eup %3853  ;;  %v1940_v60 = vadd.f32 1.0, %v3852_v40  ;;  %3877 = vpow2.f32 %v1814_v8  ;;  %v1830_v33 = vmul.f32 1.442695, %v1576_v9 }
 0x2cf   : > { %v3856_v28 = vpop.eup %3855  ;;  %3879 = vpow2.f32 %v1816_v10  ;;  %v2180_v39 = vmul.f32 %v3854_v31, %v5646_v63 }
 0x2d0   : > { %v1379_v4 = vpop.f32.mrb[168].mxu1  ;;  %2794 = vmatprep.mubr.f32.mxu0 %v2297_v22  ;;  %v3858_v55 = vpop.eup %3857  ;;  %3881 = vrcp.f32 %v1937_v3  ;;  %v2181_v37 = vmul.f32 %v3856_v28, %v5647_v46  ;;  %v1832_v22 = vmul.f32 1.442695, %v1577_v17 }
 0x2d1   : > { %v2300_v16 = vmul.f32 %v2172_v25, %v1379_v4  ;;  %v1381_v29 = vpop.f32.mrb[169].mxu1  ;;  %2795 = vmatmul.mubr.f32.gmra.mrb[102].mxu0 %v2296_v11  ;;  %v3860_v36 = vpop.eup %3859  ;;  %v1941_v44 = vadd.f32 1.0, %v3858_v55  ;;  %3883 = vrcp.f32 %v1940_v60 }
 0x2d2   : > { %v2301_v24 = vmul.f32 %v2173_v19, %v1381_v29  ;;  %v3862_v58 = vpop.eup %3861  ;;  %v1944_v34 = vadd.f32 1.0, %v3860_v36  ;;  %3885 = vpow2.f32 %v1822_v23 }
 0x2d3   : > { %v3864_v14 = vpop.eup %3863  ;;  %3887 = vpow2.f32 %v1824_v61  ;;  %v2184_v25 = vmul.f32 %v3862_v58, %v5648_v7 }
 0x2d4   : > { %v1385_v13 = vpop.f32.mrb[170].mxu1  ;;  %2799 = vmatprep.mubr.f32.mxu0 %v2301_v24  ;;  %v3866_v11 = vpop.eup %3865  ;;  %3889 = vrcp.f32 %v1941_v44  ;;  %v1945_v62 = vadd.f32 1.0, %v3864_v14 }
 0x2d5   : > { %v2304_v26 = vmul.f32 %v2176_v20, %v1385_v13  ;;  %v1387_v48 = vpop.f32.mrb[171].mxu1  ;;  %2800 = vmatmul.mubr.f32.gmra.mrb[104].mxu0 %v2300_v16  ;;  %v3868_v56 = vpop.eup %3867  ;;  %v2185_v57 = vmul.f32 %v3866_v11, %v5649_v5  ;;  %3891 = vrcp.f32 %v1944_v34 }
 0x2d6   : > { %v2305_v50 = vmul.f32 %v2177_v32, %v1387_v48  ;;  %v3870_v63 = vpop.eup %3869  ;;  %3893 = vpow2.f32 %v1830_v33  ;;  %v2188_v7 = vmul.f32 %v3868_v56, %v5650_v27 }
 0x2d7   : > { %v3872_v46 = vpop.eup %3871  ;;  %v1948_v49 = vadd.f32 1.0, %v3870_v63  ;;  %3895 = vpow2.f32 %v1832_v22 }
 0x2d8   : > { %v1391_v12 = vpop.f32.mrb[172].mxu1  ;;  %2804 = vmatprep.mubr.f32.mxu0 %v2305_v50  ;;  %v3874_v53 = vpop.eup %3873  ;;  %3897 = vrcp.f32 %v1945_v62  ;;  %v1949_v31 = vadd.f32 1.0, %v3872_v46 }
 0x2d9   : > { %v2308_v52 = vmul.f32 %v2180_v39, %v1391_v12  ;;  %v1393_v47 = vpop.f32.mrb[173].mxu1  ;;  %2805 = vmatmul.mubr.f32.gmra.mrb[106].mxu0 %v2304_v26  ;;  %v3876_v8 = vpop.eup %3875  ;;  %v2189_v5 = vmul.f32 %v3874_v53, %v5651_v38  ;;  %3899 = vrcp.f32 %v1948_v49 }
 0x2da   : > { %v2309_v18 = vmul.f32 %v2181_v37, %v1393_v47  ;;  %v3878_v29 = vpop.eup %3877  ;;  %v2192_v13 = vmul.f32 %v3876_v8, %v5652_v6  ;;  %3901 = vrcp.f32 %v1949_v31 }
 0x2db   : > { %v3880_v10 = vpop.eup %3879  ;;  %v1952_v55 = vadd.f32 1.0, %v3878_v29 }
 0x2dc   : > { %v1397_v19 = vpop.f32.mrb[174].mxu1  ;;  %2809 = vmatprep.mubr.f32.mxu0 %v2309_v18  ;;  %v3882_v24 = vpop.eup %3881  ;;  %v1953_v27 = vadd.f32 1.0, %v3880_v10 }
 0x2dd   : > { %v2312_v4 = vmul.f32 %v2184_v25, %v1397_v19  ;;  %v1399_v40 = vpop.f32.mrb[175].mxu1  ;;  %2810 = vmatmul.mubr.f32.gmra.mrb[108].mxu0 %v2308_v52  ;;  %v3884_v3 = vpop.eup %3883  ;;  %v2193_v23 = vmul.f32 %v3882_v24, %v5653_v30  ;;  %3903 = vrcp.f32 %v1952_v55 }
 0x2de   : > { %v2313_v16 = vmul.f32 %v2185_v57, %v1399_v40  ;;  %v3886_v60 = vpop.eup %3885  ;;  %v2196_v39 = vmul.f32 %v3884_v3, %v5654_v59  ;;  %3905 = vrcp.f32 %v1953_v27 }
 0x2df   : > { %v3888_v36 = vpop.eup %3887  ;;  %v1956_v17 = vadd.f32 1.0, %v3886_v60 }
 0x2e0   : > { %v1403_v21 = vpop.f32.mrb[176].mxu1  ;;  %2814 = vmatprep.mubr.f32.mxu0 %v2313_v16  ;;  %v3890_v38 = vpop.eup %3889  ;;  %v1957_v6 = vadd.f32 1.0, %v3888_v36 }
 0x2e1   : > { %v2316_v28 = vmul.f32 %v2188_v7, %v1403_v21  ;;  %v1405_v20 = vpop.f32.mrb[177].mxu1  ;;  %2815 = vmatmul.mubr.f32.gmra.mrb[110].mxu0 %v2312_v4  ;;  %v3892_v61 = vpop.eup %3891  ;;  %v2197_v14 = vmul.f32 %v3890_v38, %v5655_v51  ;;  %3907 = vrcp.f32 %v1956_v17 }
 0x2e2   : > { %v2317_v32 = vmul.f32 %v2189_v5, %v1405_v20  ;;  %v3894_v58 = vpop.eup %3893  ;;  %v2200_v52 = vmul.f32 %v3892_v61, %v5656_v45  ;;  %3909 = vrcp.f32 %v1957_v6 }
 0x2e3   : > { %v3896_v44 = vpop.eup %3895  ;;  %v1960_v11 = vadd.f32 1.0, %v3894_v58 }
 0x2e4   : > { %v1409_v9 = vpop.f32.mrb[178].mxu1  ;;  %2819 = vmatprep.mubr.f32.mxu0 %v2317_v32  ;;  %v3898_v30 = vpop.eup %3897  ;;  %v1961_v47 = vadd.f32 1.0, %v3896_v44 }
 0x2e5   : > { %v2320_v26 = vmul.f32 %v2192_v13, %v1409_v9  ;;  %v1411_v48 = vpop.f32.mrb[179].mxu1  ;;  %2820 = vmatmul.mubr.f32.gmra.mrb[112].mxu0 %v2316_v28  ;;  %v3900_v56 = vpop.eup %3899  ;;  %v2201_v59 = vmul.f32 %v3898_v30, %v5657_v0  ;;  %3911 = vrcp.f32 %v1960_v11 }
 0x2e6   : > { %v2321_v50 = vmul.f32 %v2193_v23, %v1411_v48  ;;  %v3902_v18 = vpop.eup %3901  ;;  %v2204_v62 = vmul.f32 %v3900_v56, %v5658_v54  ;;  %3913 = vrcp.f32 %v1961_v47 }
 0x2e7   : > { %v3904_v46 = vpop.eup %3903  ;;  %v2205_v57 = vmul.f32 %v3902_v18, %v5659_v43 }
 0x2e8   : > { %v1415_v37 = vpop.f32.mrb[180].mxu1  ;;  %2824 = vmatprep.mubr.f32.mxu0 %v2321_v50  ;;  %v3906_v19 = vpop.eup %3905  ;;  %v2208_v40 = vmul.f32 %v3904_v46, %v5660_v41 }
 0x2e9   : > { %v2324_v34 = vmul.f32 %v2196_v39, %v1415_v37  ;;  %v1417_v12 = vpop.f32.mrb[181].mxu1  ;;  %2825 = vmatmul.mubr.f32.gmra.mrb[114].mxu0 %v2320_v26  ;;  %v2209_v49 = vmul.f32 %v3906_v19, %v5661_v42 }
 0x2ea   : > { %v2325_v33 = vmul.f32 %v2197_v14, %v1417_v12 }
 0x2eb   : > { %v3908_v8 = vpop.eup %3907 }
 0x2ec   : > { %v1421_v22 = vpop.f32.mrb[182].mxu1  ;;  %2829 = vmatprep.mubr.f32.mxu0 %v2325_v33  ;;  %v3910_v29 = vpop.eup %3909  ;;  %v2212_v43 = vmul.f32 %v3908_v8, %v5662_v1 }
 0x2ed   : > { %v2328_v51 = vmul.f32 %v2200_v52, %v1421_v22  ;;  %v1423_v63 = vpop.f32.mrb[183].mxu1  ;;  %2830 = vmatmul.mubr.f32.gmra.mrb[116].mxu0 %v2324_v34  ;;  %v2213_v5 = vmul.f32 %v3910_v29, %v5663_v2 }
 0x2ee   : > { %v2329_v25 = vmul.f32 %v2201_v59, %v1423_v63 }
 0x2ef   : > { %v3912_v10 = vpop.eup %3911 }
 0x2f0   : > { %v1427_v45 = vpop.f32.mrb[184].mxu1  ;;  %2834 = vmatprep.mubr.f32.mxu0 %v2329_v25  ;;  %v3914_v24 = vpop.eup %3913  ;;  %v2216_v20 = vmul.f32 %v3912_v10, %v5664_v15 }
 0x2f1   : > { %v2332_v53 = vmul.f32 %v2204_v62, %v1427_v45  ;;  %v1429_v4 = vpop.f32.mrb[185].mxu1  ;;  %2835 = vmatmul.mubr.f32.gmra.mrb[118].mxu0 %v2328_v51  ;;  %v2217_v3 = vmul.f32 %v3914_v24, %v5665_v35 }
 0x2f2   : > { %v2333_v0 = vmul.f32 %v2205_v57, %v1429_v4 }
 0x2f4   : > { %v1433_v16 = vpop.f32.mrb[186].mxu1  ;;  %2839 = vmatprep.mubr.f32.mxu0 %v2333_v0 }
 0x2f5   : > { %v2336_v54 = vmul.f32 %v2208_v40, %v1433_v16  ;;  %v1435_v7 = vpop.f32.mrb[187].mxu1  ;;  %2840 = vmatmul.mubr.f32.gmra.mrb[120].mxu0 %v2332_v53 }
 0x2f6   : > { %v2337_v31 = vmul.f32 %v2209_v49, %v1435_v7 }
 0x2f8   : > { %v1439_v21 = vpop.f32.mrb[188].mxu1  ;;  %2844 = vmatprep.mubr.f32.mxu0 %v2337_v31 }
 0x2f9   : > { %v2340_v41 = vmul.f32 %v2212_v43, %v1439_v21  ;;  %v1441_v28 = vpop.f32.mrb[189].mxu1  ;;  %2845 = vmatmul.mubr.f32.gmra.mrb[122].mxu0 %v2336_v54 }
 0x2fa   : > { %v2341_v42 = vmul.f32 %v2213_v5, %v1441_v28 }
 0x2fc   : > { %v1445_v55 = vpop.f32.mrb[190].mxu1  ;;  %2849 = vmatprep.mubr.f32.mxu0 %v2341_v42 }
 0x2fd   : > { %v2344_v32 = vmul.f32 %v2216_v20, %v1445_v55  ;;  %v1447_v60 = vpop.f32.mrb[191].mxu1  ;;  %2850 = vmatmul.mubr.f32.gmra.mrb[124].mxu0 %v2340_v41 }
 0x2fe   : > { %v2345_v1 = vmul.f32 %v2217_v3, %v1447_v60 }
 0x300   : > { %2854 = vmatprep.mubr.f32.mxu0 %v2345_v1 }
 0x301   : > { %2855 = vmatmul.mubr.f32.gmra.mrb[126].mxu0 %v2344_v32 }
 0x358   : > { %v2701_v2 = vpop.f32.mrb[64].mxu0 }
 0x359   : > { %2860 = vst [vmem:[%s5484_s21] sm:$0xff] %v2701_v2  ;;  %v2703_v15 = vpop.f32.mrb[65].mxu0 }
 0x35c   : > { %v2706_v35 = vpop.f32.mrb[66].mxu0 }
 0x35d   : > { %2861 = vst [vmem:[%s5484_s21 + $0x8] sm:$0xff] %v2706_v35  ;;  %v2708_v13 = vpop.f32.mrb[67].mxu0 }
 0x360   : > { %v2711_v27 = vpop.f32.mrb[68].mxu0 }
 0x361   : > { %2862 = vst [vmem:[%s5484_s21 + $0x10] sm:$0xff] %v2711_v27  ;;  %v2713_v36 = vpop.f32.mrb[69].mxu0 }
 0x364   : > { %v2716_v23 = vpop.f32.mrb[70].mxu0 }
 0x365   : > { %2863 = vst [vmem:[%s5484_s21 + $0x18] sm:$0xff] %v2716_v23  ;;  %v2718_v9 = vpop.f32.mrb[71].mxu0 }
 0x368   : > { %v2721_v38 = vpop.f32.mrb[72].mxu0 }
 0x369   : > { %2864 = vst [vmem:[%s5484_s21 + $0x20] sm:$0xff] %v2721_v38  ;;  %v2723_v26 = vpop.f32.mrb[73].mxu0 }
 0x36c   : > { %v2726_v48 = vpop.f32.mrb[74].mxu0 }
 0x36d   : > { %2865 = vst [vmem:[%s5484_s21 + $0x28] sm:$0xff] %v2726_v48  ;;  %v2728_v61 = vpop.f32.mrb[75].mxu0 }
 0x370   : > { %v2731_v17 = vpop.f32.mrb[76].mxu0 }
 0x371   : > { %2866 = vst [vmem:[%s5484_s21 + $0x30] sm:$0xff] %v2731_v17  ;;  %v2733_v50 = vpop.f32.mrb[77].mxu0 }
 0x374   : > { %v2736_v58 = vpop.f32.mrb[78].mxu0 }
 0x375   : > { %2867 = vst [vmem:[%s5484_s21 + $0x38] sm:$0xff] %v2736_v58  ;;  %v2738_v39 = vpop.f32.mrb[79].mxu0 }
 0x378   : > { %v2741_v6 = vpop.f32.mrb[80].mxu0 }
 0x379   : > { %2868 = vst [vmem:[%s5484_s21 + $0x40] sm:$0xff] %v2741_v6  ;;  %v2743_v44 = vpop.f32.mrb[81].mxu0 }
 0x37c   : > { %v2746_v14 = vpop.f32.mrb[82].mxu0 }
 0x37d   : > { %2869 = vst [vmem:[%s5484_s21 + $0x48] sm:$0xff] %v2746_v14  ;;  %v2748_v37 = vpop.f32.mrb[83].mxu0 }
 0x380   : > { %v2751_v30 = vpop.f32.mrb[84].mxu0 }
 0x381   : > { %2870 = vst [vmem:[%s5484_s21 + $0x50] sm:$0xff] %v2751_v30  ;;  %v2753_v34 = vpop.f32.mrb[85].mxu0 }
 0x384   : > { %v2756_v12 = vpop.f32.mrb[86].mxu0 }
 0x385   : > { %2871 = vst [vmem:[%s5484_s21 + $0x58] sm:$0xff] %v2756_v12  ;;  %v2758_v11 = vpop.f32.mrb[87].mxu0 }
 0x388   : > { %v2761_v33 = vpop.f32.mrb[88].mxu0 }
 0x389   : > { %2872 = vst [vmem:[%s5484_s21 + $0x60] sm:$0xff] %v2761_v33  ;;  %v2763_v52 = vpop.f32.mrb[89].mxu0 }
 0x38c   : > { %v2766_v47 = vpop.f32.mrb[90].mxu0 }
 0x38d   : > { %2873 = vst [vmem:[%s5484_s21 + $0x68] sm:$0xff] %v2766_v47  ;;  %v2768_v56 = vpop.f32.mrb[91].mxu0 }
 0x390   : > { %v2771_v59 = vpop.f32.mrb[92].mxu0 }
 0x391   : > { %2874 = vst [vmem:[%s5484_s21 + $0x70] sm:$0xff] %v2771_v59  ;;  %v2773_v22 = vpop.f32.mrb[93].mxu0 }
 0x394   : > { %v2776_v18 = vpop.f32.mrb[94].mxu0 }
 0x395   : > { %2875 = vst [vmem:[%s5484_s21 + $0x78] sm:$0xff] %v2776_v18  ;;  %v2778_v51 = vpop.f32.mrb[95].mxu0 }
 0x398   : > { %v2781_v63 = vpop.f32.mrb[96].mxu0 }
 0x399   : > { %2876 = vst [vmem:[%s5484_s21 + $0x80] sm:$0xff] %v2781_v63  ;;  %v2783_v25 = vpop.f32.mrb[97].mxu0 }
 0x39c   : > { %v2786_v62 = vpop.f32.mrb[98].mxu0 }
 0x39d   : > { %2877 = vst [vmem:[%s5484_s21 + $0x88] sm:$0xff] %v2786_v62  ;;  %v2788_v46 = vpop.f32.mrb[99].mxu0 }
 0x3a0   : > { %v2791_v57 = vpop.f32.mrb[100].mxu0 }
 0x3a1   : > { %2878 = vst [vmem:[%s5484_s21 + $0x90] sm:$0xff] %v2791_v57  ;;  %v2793_v45 = vpop.f32.mrb[101].mxu0 }
 0x3a4   : > { %v2796_v19 = vpop.f32.mrb[102].mxu0 }
 0x3a5   : > { %2879 = vst [vmem:[%s5484_s21 + $0x98] sm:$0xff] %v2796_v19  ;;  %v2798_v53 = vpop.f32.mrb[103].mxu0 }
 0x3a8   : > { %v2801_v4 = vpop.f32.mrb[104].mxu0 }
 0x3a9   : > { %2880 = vst [vmem:[%s5484_s21 + $0xa0] sm:$0xff] %v2801_v4  ;;  %v2803_v0 = vpop.f32.mrb[105].mxu0 }
 0x3ac   : > { %v2806_v40 = vpop.f32.mrb[106].mxu0 }
 0x3ad   : > { %2881 = vst [vmem:[%s5484_s21 + $0xa8] sm:$0xff] %v2806_v40  ;;  %v2808_v8 = vpop.f32.mrb[107].mxu0 }
 0x3b0   : > { %v2811_v49 = vpop.f32.mrb[108].mxu0 }
 0x3b1   : > { %2882 = vst [vmem:[%s5484_s21 + $0xb0] sm:$0xff] %v2811_v49  ;;  %v2813_v16 = vpop.f32.mrb[109].mxu0 }
 0x3b4   : > { %v2816_v29 = vpop.f32.mrb[110].mxu0 }
 0x3b5   : > { %2883 = vst [vmem:[%s5484_s21 + $0xb8] sm:$0xff] %v2816_v29  ;;  %v2818_v54 = vpop.f32.mrb[111].mxu0 }
 0x3b8   : > { %v2821_v7 = vpop.f32.mrb[112].mxu0 }
 0x3b9   : > { %2884 = vst [vmem:[%s5484_s21 + $0xc0] sm:$0xff] %v2821_v7  ;;  %v2823_v31 = vpop.f32.mrb[113].mxu0 }
 0x3bc   : > { %v2826_v43 = vpop.f32.mrb[114].mxu0 }
 0x3bd   : > { %2885 = vst [vmem:[%s5484_s21 + $0xc8] sm:$0xff] %v2826_v43  ;;  %v2828_v10 = vpop.f32.mrb[115].mxu0 }
 0x3c0   : > { %v2831_v5 = vpop.f32.mrb[116].mxu0 }
 0x3c1   : > { %2886 = vst [vmem:[%s5484_s21 + $0xd0] sm:$0xff] %v2831_v5  ;;  %v2833_v21 = vpop.f32.mrb[117].mxu0 }
 0x3c4   : > { %v2836_v24 = vpop.f32.mrb[118].mxu0 }
 0x3c5   : > { %2887 = vst [vmem:[%s5484_s21 + $0xd8] sm:$0xff] %v2836_v24  ;;  %v2838_v41 = vpop.f32.mrb[119].mxu0 }
 0x3c8   : > { %v2841_v28 = vpop.f32.mrb[120].mxu0 }
 0x3c9   : > { %2888 = vst [vmem:[%s5484_s21 + $0xe0] sm:$0xff] %v2841_v28  ;;  %v2843_v42 = vpop.f32.mrb[121].mxu0 }
 0x3cc   : > { %v2846_v20 = vpop.f32.mrb[122].mxu0 }
 0x3cd   : > { %2889 = vst [vmem:[%s5484_s21 + $0xe8] sm:$0xff] %v2846_v20  ;;  %v2848_v3 = vpop.f32.mrb[123].mxu0 }
 0x3d0   : > { %v2851_v55 = vpop.f32.mrb[124].mxu0 }
 0x3d1   : > { %2890 = vst [vmem:[%s5484_s21 + $0xf0] sm:$0xff] %v2851_v55  ;;  %v2853_v32 = vpop.f32.mrb[125].mxu0 }
 0x3d4   : > { %v2856_v60 = vpop.f32.mrb[126].mxu0 }
 0x3d5   : > { %2891 = vst [vmem:[%s5484_s21 + $0xf8] sm:$0xff] %v2856_v60  ;;  %v2858_v1 = vpop.f32.mrb[127].mxu0 }
 0x3d6   : > { %4074 = shalt.err (!%p4071_p4)
}
 0x3d7   : > { %s4075_s5 = scalar_lea.hbm %s5522_s8, 4096  ;;  %s4079_s12 = scalar_lea.hbm %s5573_s4, 8192 }
 0x3d8   : > { %p4076_p9 = scmp.ne.s32.totalorder %s5522_s8, %s4075_s5  ;;  %p4080_p8 = scmp.lt.u32.totalorder %s5522_s8, %s5573_s4 }
 0x3d9   : > { %p4081_p13 = scmp.lt.u32.totalorder %s4079_s12, %s4075_s5  ;;  %p4083_p10 = scmp.lt.u32.totalorder %s4075_s5, %s5522_s8 }
 0x3da   : > { %p4077_p0 = pnand %p4076_p9, %p4323_p5 }
 0x3db   : > { %p4082_p6 = por %p4081_p13, %p4080_p8 }
 0x3dc   : > { %p4078_p11 = pneg %p4077_p0 }
 0x3dd   : > { %p4084_p3 = por %p4083_p10, %p4082_p6 }
 0x3df   : > { %p4085_p7 = pnand %p4084_p3, %p4078_p11 }
 0x3e1   : > { %4088 = shalt.err (!%p4085_p7)
}
 0x3e2   : > { %s4148_s21 = smov 128   ;;  %s4149_s23 = smov 8  }
 0x3e3   : > { %3332 = dma.vmem_to_hbm [thread:$0]  (%p4323_p5), %s5524_s28, 4096, %s5522_s8, %s2893_s14, %s4148_s21, %s4148_s21, %s4149_s23  }
 0x3e4 PF: > { %s2921_s10 = sand.u32 1, %s4123_s15   ;;  %p5666_p12 = scmp.ne.s32.totalorder %s5603_s22, 0 }
 0x3e5   : > { %p5667_p2 = scmp.ge.s32.totalorder %s4135_s18, 2  ;;  %s2922_s6 = scalar_lea.sflag [#allocation4], %s2921_s10 }
 0x3e7   : > { %p3349_p1 = pnand %p5667_p2, %p5666_p12 }
 0x3e9   : > { %4118 = dma.done.wait (!%p3349_p1), %s2922_s6, 4096  }
 0x3ea   : > { %4120 = vsyncadd (!%p3349_p1), %s2922_s6, 4294963200  ;;  %p19_p4 = scmp.ge.s32.totalorder %s4309_s11, 4   ;;  %s5668_s15 = smov %s4127_s16 }
 0x3eb   : > { %s5669_s16 = smov %s4131_s17  ;;  %s5670_s17 = smov %s4319_s13 }
 0x3ec   : > { %s5671_s18 = smov %s4309_s11  ;;  %21 = sbr.rel (!%p19_p4) target bundleno = 7 (0x7), region = 93 }
 0x3f3   :  { %2927 = vsyncpa [#allocation3], 1 }
 0x3f4   :  { %2929 = vsyncpa [#allocation3 + $0x1], 1 }
 0x3f5   :  { %2930 = vsyncpa [#allocation6], 1 }
 0x3f6   :  { %2931 = vsyncpa [#allocation9], 1 }
 0x3f7   :  { %2932 = vsyncpa [#allocation4], 1 }
 0x3f8   :  { %2934 = vsyncpa [#allocation4 + $0x1], 1 }

</bundles_post_ra>
